<compile_context>
chip_gen: v7x
topology: tpu7x:2x2x1
jax: 0.10.0
libtpu: 0.0.40
codegen_flags: <defaults>
</compile_context>

<pallas_src>
import jax
import jax.numpy as jnp
from jax.experimental import pallas as pl
from jax.experimental.pallas import tpu as pltpu

K = 7      # conv kernel size
PAD = 3    # padding


def fused_conv_kernel(x2_ref, x6_ref, x5_ref, w2_ref, b2_ref, w1_ref, b1_ref,
                      out_ref, xpad_ref):
    """One batch element per grid step.

    x2_ref, x6_ref, x5_ref, out_ref : (1, H, W*C)     lane-dense rows
    w2_ref, w1_ref                  : (K, W*C, W*C)   per-kh block-Toeplitz weights
    b2_ref, b1_ref                  : (1, W*C)        bias tiled over width
    xpad_ref                        : (H + 2*PAD, W*C) VMEM scratch (height halo)
    """
    Hp, WC = xpad_ref.shape
    H = Hp - 2 * PAD

    # Zero only the height halo rows; the interior is fully overwritten below.
    zero_halo = jnp.zeros((PAD, WC), jnp.float32)
    xpad_ref[0:PAD, :] = zero_halo
    xpad_ref[PAD + H:Hp, :] = zero_halo

    # ---- conv2(x2): 7 accumulated (H, WC) @ (WC, WC) MXU dots --------------
    xpad_ref[PAD:PAD + H, :] = x2_ref[0].astype(jnp.float32)
    acc = jnp.broadcast_to(b2_ref[...], (H, WC)).astype(jnp.float32)
    for kh in range(K):
        acc = acc + jnp.dot(xpad_ref[kh:kh + H, :], w2_ref[kh],
                            preferred_element_type=jnp.float32)

    # ---- add + relu ---------------------------------------------------------
    v3 = jnp.maximum(acc + x6_ref[0], 0.0)

    # ---- conv1(v3): reuse the same padded scratch (halo already zero) -------
    xpad_ref[PAD:PAD + H, :] = v3
    acc2 = jnp.broadcast_to(b1_ref[...], (H, WC)).astype(jnp.float32)
    for kh in range(K):
        acc2 = acc2 + jnp.dot(xpad_ref[kh:kh + H, :], w1_ref[kh],
                              preferred_element_type=jnp.float32)

    # ---- final residual add (full-width, unmasked store) --------------------
    out_ref[0] = (acc2 + x5_ref[0]).astype(out_ref.dtype)


def _toeplitz_weights(w, W):
    """OIHW (Cout, Cin, K, K) -> (K, W*Cin, W*Cout) width-folded Toeplitz weights.

    Wk[kh][w2*Cin + ci, wo*Cout + co] = w[co, ci, kh, w2 - wo + PAD]
    when 0 <= w2 - wo + PAD < K, else 0 (implements "same" width padding).
    """
    Cout, Cin, _, _ = w.shape
    whwio = jnp.transpose(w, (2, 3, 1, 0))                  # (Kh, Kw, Cin, Cout)
    w2i = jnp.arange(W)[:, None]                            # source width index
    woi = jnp.arange(W)[None, :]                            # output width index
    kwi = w2i - woi + PAD                                   # (W, W)
    valid = (kwi >= 0) & (kwi < K)
    kwc = jnp.clip(kwi, 0, K - 1)
    per = whwio[:, kwc]                                     # (Kh, W2, Wo, Cin, Cout)
    per = jnp.where(valid[None, :, :, None, None], per, 0.0)
    per = jnp.transpose(per, (0, 1, 3, 2, 4))               # (Kh, W2, Cin, Wo, Cout)
    return per.reshape(K, W * Cin, W * Cout).astype(jnp.float32)


def model_forward(x6, x2, x5, w1, b1, w2, b2):
    """Inputs in PyTorch NCHW / OIHW convention. Returns NCHW output."""
    N, C, H, W = x2.shape
    WC = W * C
    Hp = H + 2 * PAD

    # NCHW -> lane-dense (N, H, W*C) rows.
    def to_rows(x):
        return jnp.transpose(x, (0, 2, 3, 1)).reshape(N, H, WC)

    x2r, x6r, x5r = to_rows(x2), to_rows(x6), to_rows(x5)

    # Per-kh block-Toeplitz weights and width-tiled biases (parameter prep).
    wk1 = _toeplitz_weights(w1, W)            # (K, WC, WC)
    wk2 = _toeplitz_weights(w2, W)
    b1r = jnp.tile(b1, W)[None, :]            # (1, WC): b1r[w*C + co] = b1[co]
    b2r = jnp.tile(b2, W)[None, :]

    out_rows = pl.pallas_call(
        fused_conv_kernel,
        out_shape=jax.ShapeDtypeStruct((N, H, WC), x2.dtype),
        grid_spec=pltpu.PrefetchScalarGridSpec(
            num_scalar_prefetch=0,
            grid=(N,),
            in_specs=[
                pl.BlockSpec((1, H, WC), lambda n: (n, 0, 0)),    # x2
                pl.BlockSpec((1, H, WC), lambda n: (n, 0, 0)),    # x6
                pl.BlockSpec((1, H, WC), lambda n: (n, 0, 0)),    # x5
                pl.BlockSpec((K, WC, WC), lambda n: (0, 0, 0)),   # w2 (resident)
                pl.BlockSpec((1, WC), lambda n: (0, 0)),          # b2
                pl.BlockSpec((K, WC, WC), lambda n: (0, 0, 0)),   # w1 (resident)
                pl.BlockSpec((1, WC), lambda n: (0, 0)),          # b1
            ],
            out_specs=pl.BlockSpec((1, H, WC), lambda n: (n, 0, 0)),
            scratch_shapes=[pltpu.VMEM((Hp, WC), jnp.float32)],
        ),
        compiler_params=pltpu.CompilerParams(
            dimension_semantics=("parallel",)),
    )(x2r, x6r, x5r, wk2, b2r, wk1, b1r)

    # (N, H, W*C) -> NCHW
    return jnp.transpose(out_rows.reshape(N, H, W, C), (0, 3, 1, 2))


def ref_forward(x6, x2, x5, w1, b1, w2, b2):
    """Pure-JAX reference (NCHW), matching PyTorch semantics."""
    dn = ('NCHW', 'OIHW', 'NCHW')

    def conv(x, w, b):
        y = jax.lax.conv_general_dilated(
            x, w, window_strides=(1, 1),
            padding=((PAD, PAD), (PAD, PAD)),
            dimension_numbers=dn,
            precision=jax.lax.Precision.HIGHEST)
        return y + b.reshape(1, -1, 1, 1)

    v1 = conv(x2, w2, b2)
    v3 = jnp.maximum(v1 + x6, 0.0)
    v4 = conv(v3, w1, b1)
    return v4 + x5


if __name__ == "__main__":
    # Small shapes consistent with the module: channels fixed to 16 by the convs.
    N, C, H, W = 2, 16, 16, 16

    key = jax.random.PRNGKey(0)
    k1, k2, k3, k4, k5, k6, k7 = jax.random.split(key, 7)

    x6 = jax.random.normal(k1, (N, C, H, W), jnp.float32)
    x2 = jax.random.normal(k2, (N, C, H, W), jnp.float32)
    x5 = jax.random.normal(k3, (N, C, H, W), jnp.float32)

    # Deterministic synthetic parameters (Conv2d(16, 16, 7): OIHW weights).
    w1 = 0.05 * jax.random.normal(k4, (C, C, K, K), jnp.float32)
    b1 = 0.05 * jax.random.normal(k5, (C,), jnp.float32)
    w2 = 0.05 * jax.random.normal(k6, (C, C, K, K), jnp.float32)
    b2 = 0.05 * jax.random.normal(k7, (C,), jnp.float32)

    out = model_forward(x6, x2, x5, w1, b1, w2, b2)
    out = jax.block_until_ready(out)

    ref = ref_forward(x6, x2, x5, w1, b1, w2, b2)
    assert out.shape == (N, C, H, W)
    max_err = jnp.max(jnp.abs(out - ref))
    assert jnp.allclose(out, ref, atol=1e-2, rtol=1e-2), f"max abs err {max_err}"

    print("KERNEL_OK")
</pallas_src>

<mosaic_0001>
module attributes {stable_mosaic.version = 11 : i64} {
  func.func @fused_conv_kernel(%arg0: i32, %arg1: memref<1x16x256xf32, #tpu.memory_space<vmem>>, %arg2: memref<1x16x256xf32, #tpu.memory_space<vmem>>, %arg3: memref<1x16x256xf32, #tpu.memory_space<vmem>>, %arg4: memref<7x256x256xf32, #tpu.memory_space<vmem>>, %arg5: memref<1x256xf32, #tpu.memory_space<vmem>>, %arg6: memref<7x256x256xf32, #tpu.memory_space<vmem>>, %arg7: memref<1x256xf32, #tpu.memory_space<vmem>>, %arg8: memref<1x16x256xf32, #tpu.memory_space<vmem>>, %arg9: memref<22x256xf32, #tpu.memory_space<vmem>>) attributes {dimension_semantics = [#tpu.dimension_semantics<parallel>], iteration_bounds = array<i64: 2>, scalar_prefetch = 0 : i64, scratch_operands = 1 : i64, tpu.core_type = #tpu.core_type<tc>, window_params = [{transform_indices = @transform_0, window_bounds = array<i64: 1, 16, 256>}, {transform_indices = @transform_1, window_bounds = array<i64: 1, 16, 256>}, {transform_indices = @transform_2, window_bounds = array<i64: 1, 16, 256>}, {pipeline_mode = #tpu.pipeline_mode<synchronous>, transform_indices = @transform_3, window_bounds = array<i64: 7, 256, 256>}, {pipeline_mode = #tpu.pipeline_mode<synchronous>, transform_indices = @transform_4, window_bounds = array<i64: 1, 256>}, {pipeline_mode = #tpu.pipeline_mode<synchronous>, transform_indices = @transform_5, window_bounds = array<i64: 7, 256, 256>}, {pipeline_mode = #tpu.pipeline_mode<synchronous>, transform_indices = @transform_6, window_bounds = array<i64: 1, 256>}, {transform_indices = @transform_7, window_bounds = array<i64: 1, 16, 256>}]} {
    %cst = arith.constant 0.000000e+00 : f32
    %0 = vector.broadcast %cst : f32 to vector<3x256xf32>
    %c0 = arith.constant 0 : index
    %c0_0 = arith.constant 0 : index
    %1 = vector.load %arg9[%c0, %c0_0] : memref<22x256xf32, #tpu.memory_space<vmem>>, vector<3x256xf32>
    tpu.vector_store %arg9[%c0, %c0_0], %0 {strides = array<i32>} : memref<22x256xf32, #tpu.memory_space<vmem>>, vector<3x256xf32>,
    %c19 = arith.constant 19 : index
    %c0_1 = arith.constant 0 : index
    %2 = vector.load %arg9[%c19, %c0_1] : memref<22x256xf32, #tpu.memory_space<vmem>>, vector<3x256xf32>
    tpu.vector_store %arg9[%c19, %c0_1], %0 {strides = array<i32>} : memref<22x256xf32, #tpu.memory_space<vmem>>, vector<3x256xf32>,
    %c0_2 = arith.constant 0 : index
    %c0_3 = arith.constant 0 : index
    %c0_4 = arith.constant 0 : index
    %3 = vector.load %arg1[%c0_2, %c0_3, %c0_4] : memref<1x16x256xf32, #tpu.memory_space<vmem>>, vector<1x16x256xf32>
    %4 = vector.shape_cast %3 : vector<1x16x256xf32> to vector<16x256xf32>
    %c3 = arith.constant 3 : index
    %c0_5 = arith.constant 0 : index
    %5 = vector.load %arg9[%c3, %c0_5] : memref<22x256xf32, #tpu.memory_space<vmem>>, vector<16x256xf32>
    tpu.vector_store %arg9[%c3, %c0_5], %4 {strides = array<i32>} : memref<22x256xf32, #tpu.memory_space<vmem>>, vector<16x256xf32>,
    %c0_6 = arith.constant 0 : index
    %c0_7 = arith.constant 0 : index
    %6 = vector.load %arg5[%c0_6, %c0_7] : memref<1x256xf32, #tpu.memory_space<vmem>>, vector<1x256xf32>
    %7 = vector.shape_cast %6 : vector<1x256xf32> to vector<1x256xf32>
    %8 = vector.broadcast %7 : vector<1x256xf32> to vector<16x256xf32>
    %c0_8 = arith.constant 0 : index
    %c0_9 = arith.constant 0 : index
    %9 = vector.load %arg9[%c0_8, %c0_9] : memref<22x256xf32, #tpu.memory_space<vmem>>, vector<16x256xf32>
    %c0_10 = arith.constant 0 : index
    %c0_11 = arith.constant 0 : index
    %c0_12 = arith.constant 0 : index
    %10 = vector.load %arg4[%c0_10, %c0_11, %c0_12] : memref<7x256x256xf32, #tpu.memory_space<vmem>>, vector<1x256x256xf32>
    %11 = vector.shape_cast %10 : vector<1x256x256xf32> to vector<256x256xf32>
    %cst_13 = arith.constant dense<0.000000e+00> : vector<16x256xf32>
    %12 = tpu.matmul %9, %11, %cst_13 {dimension_numbers = #tpu.dot_dimension_numbers<[1], [0], [0], [1], [0, 0, 1, 1], [], []>} : vector<16x256xf32>, vector<256x256xf32>, vector<16x256xf32> -> vector<16x256xf32>
    %13 = arith.addf %8, %12 : vector<16x256xf32>
    %c1 = arith.constant 1 : index
    %c0_14 = arith.constant 0 : index
    %14 = vector.load %arg9[%c1, %c0_14] : memref<22x256xf32, #tpu.memory_space<vmem>>, vector<16x256xf32>
    %c1_15 = arith.constant 1 : index
    %c0_16 = arith.constant 0 : index
    %c0_17 = arith.constant 0 : index
    %15 = vector.load %arg4[%c1_15, %c0_16, %c0_17] : memref<7x256x256xf32, #tpu.memory_space<vmem>>, vector<1x256x256xf32>
    %16 = vector.shape_cast %15 : vector<1x256x256xf32> to vector<256x256xf32>
    %cst_18 = arith.constant dense<0.000000e+00> : vector<16x256xf32>
    %17 = tpu.matmul %14, %16, %cst_18 {dimension_numbers = #tpu.dot_dimension_numbers<[1], [0], [0], [1], [0, 0, 1, 1], [], []>} : vector<16x256xf32>, vector<256x256xf32>, vector<16x256xf32> -> vector<16x256xf32>
    %18 = arith.addf %13, %17 : vector<16x256xf32>
    %c2 = arith.constant 2 : index
    %c0_19 = arith.constant 0 : index
    %19 = vector.load %arg9[%c2, %c0_19] : memref<22x256xf32, #tpu.memory_space<vmem>>, vector<16x256xf32>
    %c2_20 = arith.constant 2 : index
    %c0_21 = arith.constant 0 : index
    %c0_22 = arith.constant 0 : index
    %20 = vector.load %arg4[%c2_20, %c0_21, %c0_22] : memref<7x256x256xf32, #tpu.memory_space<vmem>>, vector<1x256x256xf32>
    %21 = vector.shape_cast %20 : vector<1x256x256xf32> to vector<256x256xf32>
    %cst_23 = arith.constant dense<0.000000e+00> : vector<16x256xf32>
    %22 = tpu.matmul %19, %21, %cst_23 {dimension_numbers = #tpu.dot_dimension_numbers<[1], [0], [0], [1], [0, 0, 1, 1], [], []>} : vector<16x256xf32>, vector<256x256xf32>, vector<16x256xf32> -> vector<16x256xf32>
    %23 = arith.addf %18, %22 : vector<16x256xf32>
    %c3_24 = arith.constant 3 : index
    %c0_25 = arith.constant 0 : index
    %24 = vector.load %arg9[%c3_24, %c0_25] : memref<22x256xf32, #tpu.memory_space<vmem>>, vector<16x256xf32>
    %c3_26 = arith.constant 3 : index
    %c0_27 = arith.constant 0 : index
    %c0_28 = arith.constant 0 : index
    %25 = vector.load %arg4[%c3_26, %c0_27, %c0_28] : memref<7x256x256xf32, #tpu.memory_space<vmem>>, vector<1x256x256xf32>
    %26 = vector.shape_cast %25 : vector<1x256x256xf32> to vector<256x256xf32>
    %cst_29 = arith.constant dense<0.000000e+00> : vector<16x256xf32>
    %27 = tpu.matmul %24, %26, %cst_29 {dimension_numbers = #tpu.dot_dimension_numbers<[1], [0], [0], [1], [0, 0, 1, 1], [], []>} : vector<16x256xf32>, vector<256x256xf32>, vector<16x256xf32> -> vector<16x256xf32>
    %28 = arith.addf %23, %27 : vector<16x256xf32>
    %c4 = arith.constant 4 : index
    %c0_30 = arith.constant 0 : index
    %29 = vector.load %arg9[%c4, %c0_30] : memref<22x256xf32, #tpu.memory_space<vmem>>, vector<16x256xf32>
    %c4_31 = arith.constant 4 : index
    %c0_32 = arith.constant 0 : index
    %c0_33 = arith.constant 0 : index
    %30 = vector.load %arg4[%c4_31, %c0_32, %c0_33] : memref<7x256x256xf32, #tpu.memory_space<vmem>>, vector<1x256x256xf32>
    %31 = vector.shape_cast %30 : vector<1x256x256xf32> to vector<256x256xf32>
    %cst_34 = arith.constant dense<0.000000e+00> : vector<16x256xf32>
    %32 = tpu.matmul %29, %31, %cst_34 {dimension_numbers = #tpu.dot_dimension_numbers<[1], [0], [0], [1], [0, 0, 1, 1], [], []>} : vector<16x256xf32>, vector<256x256xf32>, vector<16x256xf32> -> vector<16x256xf32>
    %33 = arith.addf %28, %32 : vector<16x256xf32>
    %c5 = arith.constant 5 : index
    %c0_35 = arith.constant 0 : index
    %34 = vector.load %arg9[%c5, %c0_35] : memref<22x256xf32, #tpu.memory_space<vmem>>, vector<16x256xf32>
    %c5_36 = arith.constant 5 : index
    %c0_37 = arith.constant 0 : index
    %c0_38 = arith.constant 0 : index
    %35 = vector.load %arg4[%c5_36, %c0_37, %c0_38] : memref<7x256x256xf32, #tpu.memory_space<vmem>>, vector<1x256x256xf32>
    %36 = vector.shape_cast %35 : vector<1x256x256xf32> to vector<256x256xf32>
    %cst_39 = arith.constant dense<0.000000e+00> : vector<16x256xf32>
    %37 = tpu.matmul %34, %36, %cst_39 {dimension_numbers = #tpu.dot_dimension_numbers<[1], [0], [0], [1], [0, 0, 1, 1], [], []>} : vector<16x256xf32>, vector<256x256xf32>, vector<16x256xf32> -> vector<16x256xf32>
    %38 = arith.addf %33, %37 : vector<16x256xf32>
    %c6 = arith.constant 6 : index
    %c0_40 = arith.constant 0 : index
    %39 = vector.load %arg9[%c6, %c0_40] : memref<22x256xf32, #tpu.memory_space<vmem>>, vector<16x256xf32>
    %c6_41 = arith.constant 6 : index
    %c0_42 = arith.constant 0 : index
    %c0_43 = arith.constant 0 : index
    %40 = vector.load %arg4[%c6_41, %c0_42, %c0_43] : memref<7x256x256xf32, #tpu.memory_space<vmem>>, vector<1x256x256xf32>
    %41 = vector.shape_cast %40 : vector<1x256x256xf32> to vector<256x256xf32>
    %cst_44 = arith.constant dense<0.000000e+00> : vector<16x256xf32>
    %42 = tpu.matmul %39, %41, %cst_44 {dimension_numbers = #tpu.dot_dimension_numbers<[1], [0], [0], [1], [0, 0, 1, 1], [], []>} : vector<16x256xf32>, vector<256x256xf32>, vector<16x256xf32> -> vector<16x256xf32>
    %43 = arith.addf %38, %42 : vector<16x256xf32>
    %c0_45 = arith.constant 0 : index
    %c0_46 = arith.constant 0 : index
    %c0_47 = arith.constant 0 : index
    %44 = vector.load %arg2[%c0_45, %c0_46, %c0_47] : memref<1x16x256xf32, #tpu.memory_space<vmem>>, vector<1x16x256xf32>
    %45 = vector.shape_cast %44 : vector<1x16x256xf32> to vector<16x256xf32>
    %46 = arith.addf %43, %45 : vector<16x256xf32>
    %cst_48 = arith.constant 0.000000e+00 : f32
    %47 = vector.broadcast %cst_48 : f32 to vector<16x256xf32>
    %48 = arith.maximumf %46, %47 : vector<16x256xf32>
    %c3_49 = arith.constant 3 : index
    %c0_50 = arith.constant 0 : index
    %49 = vector.load %arg9[%c3_49, %c0_50] : memref<22x256xf32, #tpu.memory_space<vmem>>, vector<16x256xf32>
    tpu.vector_store %arg9[%c3_49, %c0_50], %48 {strides = array<i32>} : memref<22x256xf32, #tpu.memory_space<vmem>>, vector<16x256xf32>,
    %c0_51 = arith.constant 0 : index
    %c0_52 = arith.constant 0 : index
    %50 = vector.load %arg7[%c0_51, %c0_52] : memref<1x256xf32, #tpu.memory_space<vmem>>, vector<1x256xf32>
    %51 = vector.shape_cast %50 : vector<1x256xf32> to vector<1x256xf32>
    %52 = vector.broadcast %51 : vector<1x256xf32> to vector<16x256xf32>
    %c0_53 = arith.constant 0 : index
    %c0_54 = arith.constant 0 : index
    %53 = vector.load %arg9[%c0_53, %c0_54] : memref<22x256xf32, #tpu.memory_space<vmem>>, vector<16x256xf32>
    %c0_55 = arith.constant 0 : index
    %c0_56 = arith.constant 0 : index
    %c0_57 = arith.constant 0 : index
    %54 = vector.load %arg6[%c0_55, %c0_56, %c0_57] : memref<7x256x256xf32, #tpu.memory_space<vmem>>, vector<1x256x256xf32>
    %55 = vector.shape_cast %54 : vector<1x256x256xf32> to vector<256x256xf32>
    %cst_58 = arith.constant dense<0.000000e+00> : vector<16x256xf32>
    %56 = tpu.matmul %53, %55, %cst_58 {dimension_numbers = #tpu.dot_dimension_numbers<[1], [0], [0], [1], [0, 0, 1, 1], [], []>} : vector<16x256xf32>, vector<256x256xf32>, vector<16x256xf32> -> vector<16x256xf32>
    %57 = arith.addf %52, %56 : vector<16x256xf32>
    %c1_59 = arith.constant 1 : index
    %c0_60 = arith.constant 0 : index
    %58 = vector.load %arg9[%c1_59, %c0_60] : memref<22x256xf32, #tpu.memory_space<vmem>>, vector<16x256xf32>
    %c1_61 = arith.constant 1 : index
    %c0_62 = arith.constant 0 : index
    %c0_63 = arith.constant 0 : index
    %59 = vector.load %arg6[%c1_61, %c0_62, %c0_63] : memref<7x256x256xf32, #tpu.memory_space<vmem>>, vector<1x256x256xf32>
    %60 = vector.shape_cast %59 : vector<1x256x256xf32> to vector<256x256xf32>
    %cst_64 = arith.constant dense<0.000000e+00> : vector<16x256xf32>
    %61 = tpu.matmul %58, %60, %cst_64 {dimension_numbers = #tpu.dot_dimension_numbers<[1], [0], [0], [1], [0, 0, 1, 1], [], []>} : vector<16x256xf32>, vector<256x256xf32>, vector<16x256xf32> -> vector<16x256xf32>
    %62 = arith.addf %57, %61 : vector<16x256xf32>
    %c2_65 = arith.constant 2 : index
    %c0_66 = arith.constant 0 : index
    %63 = vector.load %arg9[%c2_65, %c0_66] : memref<22x256xf32, #tpu.memory_space<vmem>>, vector<16x256xf32>
    %c2_67 = arith.constant 2 : index
    %c0_68 = arith.constant 0 : index
    %c0_69 = arith.constant 0 : index
    %64 = vector.load %arg6[%c2_67, %c0_68, %c0_69] : memref<7x256x256xf32, #tpu.memory_space<vmem>>, vector<1x256x256xf32>
    %65 = vector.shape_cast %64 : vector<1x256x256xf32> to vector<256x256xf32>
    %cst_70 = arith.constant dense<0.000000e+00> : vector<16x256xf32>
    %66 = tpu.matmul %63, %65, %cst_70 {dimension_numbers = #tpu.dot_dimension_numbers<[1], [0], [0], [1], [0, 0, 1, 1], [], []>} : vector<16x256xf32>, vector<256x256xf32>, vector<16x256xf32> -> vector<16x256xf32>
    %67 = arith.addf %62, %66 : vector<16x256xf32>
    %c3_71 = arith.constant 3 : index
    %c0_72 = arith.constant 0 : index
    %68 = vector.load %arg9[%c3_71, %c0_72] : memref<22x256xf32, #tpu.memory_space<vmem>>, vector<16x256xf32>
    %c3_73 = arith.constant 3 : index
    %c0_74 = arith.constant 0 : index
    %c0_75 = arith.constant 0 : index
    %69 = vector.load %arg6[%c3_73, %c0_74, %c0_75] : memref<7x256x256xf32, #tpu.memory_space<vmem>>, vector<1x256x256xf32>
    %70 = vector.shape_cast %69 : vector<1x256x256xf32> to vector<256x256xf32>
    %cst_76 = arith.constant dense<0.000000e+00> : vector<16x256xf32>
    %71 = tpu.matmul %68, %70, %cst_76 {dimension_numbers = #tpu.dot_dimension_numbers<[1], [0], [0], [1], [0, 0, 1, 1], [], []>} : vector<16x256xf32>, vector<256x256xf32>, vector<16x256xf32> -> vector<16x256xf32>
    %72 = arith.addf %67, %71 : vector<16x256xf32>
    %c4_77 = arith.constant 4 : index
    %c0_78 = arith.constant 0 : index
    %73 = vector.load %arg9[%c4_77, %c0_78] : memref<22x256xf32, #tpu.memory_space<vmem>>, vector<16x256xf32>
    %c4_79 = arith.constant 4 : index
    %c0_80 = arith.constant 0 : index
    %c0_81 = arith.constant 0 : index
    %74 = vector.load %arg6[%c4_79, %c0_80, %c0_81] : memref<7x256x256xf32, #tpu.memory_space<vmem>>, vector<1x256x256xf32>
    %75 = vector.shape_cast %74 : vector<1x256x256xf32> to vector<256x256xf32>
    %cst_82 = arith.constant dense<0.000000e+00> : vector<16x256xf32>
    %76 = tpu.matmul %73, %75, %cst_82 {dimension_numbers = #tpu.dot_dimension_numbers<[1], [0], [0], [1], [0, 0, 1, 1], [], []>} : vector<16x256xf32>, vector<256x256xf32>, vector<16x256xf32> -> vector<16x256xf32>
    %77 = arith.addf %72, %76 : vector<16x256xf32>
    %c5_83 = arith.constant 5 : index
    %c0_84 = arith.constant 0 : index
    %78 = vector.load %arg9[%c5_83, %c0_84] : memref<22x256xf32, #tpu.memory_space<vmem>>, vector<16x256xf32>
    %c5_85 = arith.constant 5 : index
    %c0_86 = arith.constant 0 : index
    %c0_87 = arith.constant 0 : index
    %79 = vector.load %arg6[%c5_85, %c0_86, %c0_87] : memref<7x256x256xf32, #tpu.memory_space<vmem>>, vector<1x256x256xf32>
    %80 = vector.shape_cast %79 : vector<1x256x256xf32> to vector<256x256xf32>
    %cst_88 = arith.constant dense<0.000000e+00> : vector<16x256xf32>
    %81 = tpu.matmul %78, %80, %cst_88 {dimension_numbers = #tpu.dot_dimension_numbers<[1], [0], [0], [1], [0, 0, 1, 1], [], []>} : vector<16x256xf32>, vector<256x256xf32>, vector<16x256xf32> -> vector<16x256xf32>
    %82 = arith.addf %77, %81 : vector<16x256xf32>
    %c6_89 = arith.constant 6 : index
    %c0_90 = arith.constant 0 : index
    %83 = vector.load %arg9[%c6_89, %c0_90] : memref<22x256xf32, #tpu.memory_space<vmem>>, vector<16x256xf32>
    %c6_91 = arith.constant 6 : index
    %c0_92 = arith.constant 0 : index
    %c0_93 = arith.constant 0 : index
    %84 = vector.load %arg6[%c6_91, %c0_92, %c0_93] : memref<7x256x256xf32, #tpu.memory_space<vmem>>, vector<1x256x256xf32>
    %85 = vector.shape_cast %84 : vector<1x256x256xf32> to vector<256x256xf32>
    %cst_94 = arith.constant dense<0.000000e+00> : vector<16x256xf32>
    %86 = tpu.matmul %83, %85, %cst_94 {dimension_numbers = #tpu.dot_dimension_numbers<[1], [0], [0], [1], [0, 0, 1, 1], [], []>} : vector<16x256xf32>, vector<256x256xf32>, vector<16x256xf32> -> vector<16x256xf32>
    %87 = arith.addf %82, %86 : vector<16x256xf32>
    %c0_95 = arith.constant 0 : index
    %c0_96 = arith.constant 0 : index
    %c0_97 = arith.constant 0 : index
    %88 = vector.load %arg3[%c0_95, %c0_96, %c0_97] : memref<1x16x256xf32, #tpu.memory_space<vmem>>, vector<1x16x256xf32>
    %89 = vector.shape_cast %88 : vector<1x16x256xf32> to vector<16x256xf32>
    %90 = arith.addf %87, %89 : vector<16x256xf32>
    %c0_98 = arith.constant 0 : index
    %c0_99 = arith.constant 0 : index
    %c0_100 = arith.constant 0 : index
    %91 = vector.load %arg8[%c0_98, %c0_99, %c0_100] : memref<1x16x256xf32, #tpu.memory_space<vmem>>, vector<1x16x256xf32>
    %92 = vector.shape_cast %91 : vector<1x16x256xf32> to vector<16x256xf32>
    %93 = vector.shape_cast %90 : vector<16x256xf32> to vector<1x16x256xf32>
    tpu.vector_store %arg8[%c0_98, %c0_99, %c0_100], %93 {strides = array<i32>} : memref<1x16x256xf32, #tpu.memory_space<vmem>>, vector<1x16x256xf32>,
    return
  }
  func.func @transform_0(%arg0: i32) -> (i32, i32, i32) {
    %c0_i32 = arith.constant 0 : i32
    %c0_i32_0 = arith.constant 0 : i32
    %c0_i32_1 = arith.constant 0 : i32
    return %arg0, %c0_i32, %c0_i32_0 : i32, i32, i32
  }
  func.func @transform_1(%arg0: i32) -> (i32, i32, i32) {
    %c0_i32 = arith.constant 0 : i32
    %c0_i32_0 = arith.constant 0 : i32
    %c0_i32_1 = arith.constant 0 : i32
    return %arg0, %c0_i32, %c0_i32_0 : i32, i32, i32
  }
  func.func @transform_2(%arg0: i32) -> (i32, i32, i32) {
    %c0_i32 = arith.constant 0 : i32
    %c0_i32_0 = arith.constant 0 : i32
    %c0_i32_1 = arith.constant 0 : i32
    return %arg0, %c0_i32, %c0_i32_0 : i32, i32, i32
  }
  func.func @transform_3(%arg0: i32) -> (i32, i32, i32) {
    %c0_i32 = arith.constant 0 : i32
    %c0_i32_0 = arith.constant 0 : i32
    %c0_i32_1 = arith.constant 0 : i32
    %c0_i32_2 = arith.constant 0 : i32
    return %c0_i32, %c0_i32_0, %c0_i32_1 : i32, i32, i32
  }
  func.func @transform_4(%arg0: i32) -> (i32, i32) {
    %c0_i32 = arith.constant 0 : i32
    %c0_i32_0 = arith.constant 0 : i32
    %c0_i32_1 = arith.constant 0 : i32
    return %c0_i32, %c0_i32_0 : i32, i32
  }
  func.func @transform_5(%arg0: i32) -> (i32, i32, i32) {
    %c0_i32 = arith.constant 0 : i32
    %c0_i32_0 = arith.constant 0 : i32
    %c0_i32_1 = arith.constant 0 : i32
    %c0_i32_2 = arith.constant 0 : i32
    return %c0_i32, %c0_i32_0, %c0_i32_1 : i32, i32, i32
  }
  func.func @transform_6(%arg0: i32) -> (i32, i32) {
    %c0_i32 = arith.constant 0 : i32
    %c0_i32_0 = arith.constant 0 : i32
    %c0_i32_1 = arith.constant 0 : i32
    return %c0_i32, %c0_i32_0 : i32, i32
  }
  func.func @transform_7(%arg0: i32) -> (i32, i32, i32) {
    %c0_i32 = arith.constant 0 : i32
    %c0_i32_0 = arith.constant 0 : i32
    %c0_i32_1 = arith.constant 0 : i32
    return %arg0, %c0_i32, %c0_i32_0 : i32, i32, i32
  }
}

</mosaic_0001>

<bundles_post_ra>
// kernel: tpu_custom_call.1
= control target key start
LH: loop header
LB: loop body
LE: loop exit
PB: predicated region body
PF: predicated region fallthrough
CT: control target
= control target key end

     0   :  { %s5018_s0 = inlined_call_operand.hbm [shape: f32[2,16,256], index: 0, kind: input, shape index: {}]   ;;  %s5019_s1 = inlined_call_operand.hbm [shape: f32[2,16,256], index: 1, kind: input, shape index: {}]   ;;  %s5020_s2 = inlined_call_operand.hbm [shape: f32[2,16,256], index: 2, kind: input, shape index: {}]   ;;  %s5021_s3 = inlined_call_operand.hbm [shape: f32[7,256,256], index: 3, kind: input, shape index: {}]   ;;  %s5022_s4 = inlined_call_operand.hbm [shape: f32[1,256], index: 4, kind: input, shape index: {}]   ;;  %s5023_s5 = inlined_call_operand.hbm [shape: f32[7,256,256], index: 5, kind: input, shape index: {}]   ;;  %s5024_s6 = inlined_call_operand.hbm [shape: f32[1,256], index: 6, kind: input, shape index: {}]   ;;  %s5025_s7 = inlined_call_operand.hbm [shape: f32[2,16,256], index: 7, kind: output, shape index: {}]  }
   0x1   :  { %5049 = sst [smem:[#allocation26_spill]] %s5019_s1 }
   0x2   :  { %5050 = sst [smem:[#allocation27_spill]] %s5021_s3 }
   0x3   :  { %5051 = sst [smem:[#allocation28_spill]] %s5023_s5 }
   0x4   :  { %5052 = sst [smem:[#allocation29_spill]] %s5025_s7 }
   0x5   :  { %12 = vsyncpa [#allocation4], 0 }
   0x6   :  { %14 = vsyncpa [#allocation4 + $0x1], 0 }
   0x7   :  { %15 = vsyncpa [#allocation7], 0 }
   0x8   :  { %17 = vsyncpa [#allocation7 + $0x1], 0 }
   0x9   :  { %18 = vsyncpa [#allocation10], 0 }
   0xa   :  { %19 = vsyncpa [#allocation13], 0 }
   0xb   :  { %20 = vsyncpa [#allocation5], 0 }
   0xc   :  { %22 = vsyncpa [#allocation5 + $0x1], 0  ;;  %s4449_s24 = smov 0   ;;  %s4451_s25 = smov 0  }
   0xd   :  { %s4453_s26 = smov 0   ;;  %s4455_s27 = smov 0  }
   0xe LB: > { %5053 = sst [smem:[#allocation21_spill]] %s4382_s24  ;;  %s4470_s28 = sadd.s32 4294967295, %s4394_s27   ;;  %s4394_s27 = sphi %s4455_s27, %s5090_s27   ;;  %s4390_s26 = sphi %s4453_s26, %s5094_s26   ;;  %s4386_s25 = sphi %s4451_s25, %s5093_s25   ;;  %s4382_s24 = sphi %s4449_s24, %s5092_s24  }
   0xf   : > { %5054 = sst [smem:[#allocation22_spill]] %s4394_s27  ;;  %s3024_s29 = sadd.s32 4294967294, %s4394_s27  }
  0x10   : > { %p48_p0 = scmp.ne.s32.totalorder %s4386_s25, %s4382_s24  ;;  %p5026_p1 = scmp.eq.s32.totalorder %s4470_s28, 0 }
  0x11   : > { %p214_p3 = scmp.eq.s32.totalorder %s3024_s29, 1  ;;  %p3025_p5 = scmp.ge.s32.totalorder %s4394_s27, 1 }
  0x12   : > { %p4479_p4 = por %p5026_p1, %p48_p0  ;;  %p221_p7 = scmp.lt.s32.totalorder %s4394_s27, 3 }
  0x13   : > { %p4484_p6 = por %p214_p3, %p48_p0  ;;  %s4396_s10 = smov [#allocation9]  }
  0x14   : > { %s5055_s30 = scalar_select %p4479_p4, 1, 0 }
  0x15   : > { %s5056_s8 = scalar_select %p4484_p6, 1, 0 }
  0x16   : > { %p4489_p8 = pnand %p3025_p5, %p221_p7  ;;  %s233_s11 = sshll.u32 %s4396_s10, 4  ;;  %s4493_s11 = int_to_ptr.vmem [resolvable:$true] %s233_s11 }
  0x17   : > { %5057 = sst [smem:[#allocation23_spill]] %s5056_s8  ;;  %s4397_s13 = smov [#allocation12]  }
  0x18   : > { %s5058_s9 = scalar_select %p4489_p8, 1, 0 }
  0x19   : > { %p4034_p9 = pneg %p4489_p8  ;;  %s257_s14 = sshll.u32 %s4397_s13, 4  ;;  %s4504_s14 = int_to_ptr.vmem [resolvable:$true] %s257_s14 }
  0x1a   : > { %s5060_s3 = sld [smem:[#allocation27_spill]] }
  0x1b   : > { %p4500_p11 = pnand %p4034_p9, %p5026_p1 }
  0x1d   : > { %s5059_s12 = scalar_select %p4500_p11, 1, 0 }
  0x1e   : > { %p4514_p13 = pneg %p4500_p11 }
  0x20   : > { %s4114_s17 = scalar_lea.hbm %s5060_s3, 57344 }
  0x21   : > { %p4115_p12 = scmp.ne.s32.totalorder %s5060_s3, %s4114_s17  ;;  %p4121_p5 = scmp.lt.u32.totalorder %s4114_s17, %s5060_s3 }
  0x22   : > { %s5061_s20 = scalar_select %p4514_p13, 1, 0 }
  0x23   : > { %p4117_p0 = pnand %p4514_p13, %p4115_p12 }
  0x25   : > { %p4118_p3 = pneg %p4117_p0 }
  0x27   : > { %p4123_p7 = pnand %p4121_p5, %p4118_p3 }
  0x29   : > { %4126 = shalt.err (!%p4123_p7)
}
  0x2a   : > { %s4127_s23 = scalar_lea.vmem %s4493_s11, 57344  ;;  %p4135_p2 = scmp.lt.s32.totalorder %s4493_s11, %s4493_s11 }
  0x2b   : > { %p4128_p9 = scmp.ne.s32.totalorder %s4493_s11, %s4127_s23  ;;  %p4136_p6 = scmp.lt.s32.totalorder %s4127_s23, %s4127_s23 }
  0x2d   : > { %p4130_p10 = pnand %p4128_p9, %p4514_p13  ;;  %p4137_p12 = por %p4136_p6, %p4135_p2 }
  0x2f   : > { %p4131_p1 = pneg %p4130_p10 }
  0x31   : > { %p4138_p0 = pnand %p4137_p12, %p4131_p1 }
  0x33   : > { %4141 = shalt.err (!%p4138_p0)
}
  0x34   : > { %s5028_s29 = smov 256   ;;  %s5030_s10 = smov 16  }
  0x35   : > { %4037 = dma.hbm_to_vmem [thread:$0]  (!%p4500_p11), %s5060_s3, 57344, %s4493_s11, [#allocation10], %s5028_s29, %s5028_s29, %s5030_s10  }
  0x36   : > { %s5062_s5 = sld [smem:[#allocation28_spill]] }
  0x3c   : > { %s4142_s18 = scalar_lea.hbm %s5062_s5, 57344 }
  0x3d   : > { %p4143_p1 = scmp.ne.s32.totalorder %s5062_s5, %s4142_s18  ;;  %p4149_p10 = scmp.lt.u32.totalorder %s4142_s18, %s5062_s5 }
  0x3f   : > { %p4145_p2 = pnand %p4143_p1, %p4514_p13 }
  0x41   : > { %p4146_p6 = pneg %p4145_p2 }
  0x43   : > { %p4151_p3 = pnand %p4149_p10, %p4146_p6 }
  0x45   : > { %4154 = shalt.err (!%p4151_p3)
}
  0x46   : > { %s4155_s11 = scalar_lea.vmem %s4504_s14, 57344  ;;  %p4163_p12 = scmp.lt.s32.totalorder %s4504_s14, %s4504_s14 }
  0x47   : > { %p4156_p5 = scmp.ne.s32.totalorder %s4504_s14, %s4155_s11  ;;  %p4164_p0 = scmp.lt.s32.totalorder %s4155_s11, %s4155_s11 }
  0x49   : > { %p4158_p7 = pnand %p4156_p5, %p4514_p13  ;;  %p4165_p1 = por %p4164_p0, %p4163_p12 }
  0x4b   : > { %p4159_p9 = pneg %p4158_p7 }
  0x4d   : > { %p4166_p2 = pnand %p4165_p1, %p4159_p9 }
  0x4f   : > { %4169 = shalt.err (!%p4166_p2)
}
  0x50   : > { %4043 = dma.hbm_to_vmem [thread:$0]  (!%p4500_p11), %s5062_s5, 57344, %s4504_s14, [#allocation13], %s5028_s29, %s5028_s29, %s5030_s10  }
  0x51   : > { %s4565_s16 = sadd.s32 1, %s4394_s27   ;;  %s35_s17 = sadd.s32 1, %s4390_s26 }
  0x52   : > { %5063 = sst [smem:[#allocation24_spill]] %s4565_s16  ;;  %s32_s18 = ssub.s32 %s4394_s27, %s4565_s16 }
  0x53   : > { %p42_p6 = scmp.ne.s32.totalorder %s4390_s26, %s4386_s25  ;;  %p33_p10 = scmp.eq.s32.totalorder %s32_s18, 0 }
  0x54   : > { %p43_p3 = scmp.eq.s32.totalorder %s4394_s27, 0  ;;  %p5064_p5 = scmp.eq.s32.totalorder %s4470_s28, 1 }
  0x55   : > { %p4065_p9 = scmp.lt.s32.totalorder %s4394_s27, 2  ;;  %s5027_s22 = sand.u32 1, %s4390_s26  }
  0x56   : > { %p4575_p7 = por %p5064_p5, %p42_p6  ;;  %p44_p12 = por %p43_p3, %p42_p6 }
  0x57   : > { %s4581_s21 = scalar_select %p33_p10, %s4390_s26, %s35_s17  }
  0x58   : > { %s5065_s19 = scalar_select %p4575_p7, 1, 0 }
  0x59   : > { %5066 = sst [smem:[#allocation25_spill]] %s4581_s21  ;;  %s4586_s14 = sshll.u32 %s5027_s22, 5 }
  0x5a   : > { %s4589_s23 = sshll.u32 %s4394_s27, 9  ;;  %p4591_p0 = pnand %p4065_p9, %p44_p12 }
  0x5b   : > { %s303_s13 = sand.u32 1, %s4394_s27   ;;  %s5068_s1 = sld [smem:[#allocation26_spill]] }
  0x5c   : > { %s5067_s11 = scalar_select %p4591_p0, 1, 0 }
  0x5d   : > { %s307_s22 = scalar_lea.vmem [#allocation6], %s4586_s14  ;;  %s4400_s10 = smov [#allocation11]  }
  0x5e   : > { %s314_s29 = sshll.u32 %s307_s22, 4  ;;  %s4605_s3 = sshll.u32 %s4400_s10, 4  ;;  %s4603_s29 = int_to_ptr.vmem [resolvable:$true] %s314_s29  ;;  %s248_s3 = int_to_ptr.vmem [resolvable:$true] %s4605_s3 }
  0x5f   : > { %s4607_s5 = scalar_lea.sflag [#allocation7], %s303_s13  ;;  %p4613_p2 = pneg %p4591_p0 }
  0x61   : > { %s4600_s17 = scalar_lea.hbm %s5068_s1, %s4589_s23  ;;  %s4175_s16 = scalar_lea.hbm %s5068_s1, 1024 }
  0x62   : > { %s4170_s21 = scalar_lea.hbm %s4600_s17, 512  ;;  %p4176_p3 = scmp.lt.u32.totalorder %s4600_s17, %s5068_s1 }
  0x63   : > { %p4171_p1 = scmp.ne.s32.totalorder %s4600_s17, %s4170_s21  ;;  %p4177_p5 = scmp.lt.u32.totalorder %s4175_s16, %s4170_s21 }
  0x64   : > { %s5069_s15 = scalar_select %p4613_p2, 1, 0 }
  0x65   : > { %p4173_p6 = pnand %p4613_p2, %p4171_p1  ;;  %p4178_p9 = por %p4177_p5, %p4176_p3 }
  0x66   : > { %p4179_p12 = scmp.lt.u32.totalorder %s4170_s21, %s4600_s17 }
  0x67   : > { %p4174_p10 = pneg %p4173_p6 }
  0x68   : > { %p4180_p7 = por %p4179_p12, %p4178_p9 }
  0x6a   : > { %p4181_p4 = pnand %p4180_p7, %p4174_p10 }
  0x6c   : > { %4184 = shalt.err (!%p4181_p4)
}
  0x6d   : > { %s4185_s13 = scalar_lea.vmem %s4603_s29, 512  ;;  %s4401_s18 = smov [#allocation6]  }
  0x6e   : > { %p4186_p1 = scmp.ne.s32.totalorder %s4603_s29, %s4185_s13  ;;  %s4190_s22 = sshll.u32 %s4401_s18, 4  ;;  %s4191_s22 = int_to_ptr.vmem [resolvable:$false] %s4190_s22 }
  0x6f   : > { %s4192_s27 = scalar_lea.vmem %s4191_s22, 1024  ;;  %p4193_p11 = scmp.lt.s32.totalorder %s4603_s29, %s4191_s22 }
  0x70   : > { %p4188_p6 = pnand %p4186_p1, %p4613_p2  ;;  %p4194_p13 = scmp.lt.s32.totalorder %s4192_s27, %s4185_s13 }
  0x72   : > { %p4189_p8 = pneg %p4188_p6  ;;  %p4195_p3 = por %p4194_p13, %p4193_p11 }
  0x74   : > { %p4196_p5 = pnand %p4195_p3, %p4189_p8 }
  0x76   : > { %4199 = shalt.err (!%p4196_p5)
}
  0x77   : > { %s5070_s16 = smov 16   ;;  %s5071_s21 = smov 256  }
  0x78   : > { %4053 = dma.hbm_to_vmem [thread:$0]  (!%p4591_p0), %s4600_s17, 512, %s4603_s29, %s4607_s5, %s5071_s21, %s5071_s21, %s5070_s16  }
  0x79   : > { %s4200_s22 = scalar_lea.hbm %s5022_s4, 32  ;;  %p5072_p8 = scmp.ne.s32.totalorder %s5061_s20, 0 }
  0x7a   : > { %p4201_p4 = scmp.ne.s32.totalorder %s5022_s4, %s4200_s22  ;;  %p4207_p7 = scmp.lt.u32.totalorder %s4200_s22, %s5022_s4 }
  0x7c   : > { %p4203_p11 = pnand %p4201_p4, %p5072_p8 }
  0x7e   : > { %p4204_p13 = pneg %p4203_p11 }
  0x80   : > { %p4209_p10 = pnand %p4207_p7, %p4204_p13 }
  0x82   : > { %4212 = shalt.err (!%p4209_p10)
}
  0x83   : > { %s4213_s24 = scalar_lea.vmem %s248_s3, 32  ;;  %p4221_p6 = scmp.lt.s32.totalorder %s248_s3, %s248_s3 }
  0x84   : > { %p4214_p9 = scmp.ne.s32.totalorder %s248_s3, %s4213_s24  ;;  %p4222_p3 = scmp.lt.s32.totalorder %s4213_s24, %s4213_s24 }
  0x86   : > { %p4216_p12 = pnand %p4214_p9, %p5072_p8  ;;  %p4223_p5 = por %p4222_p3, %p4221_p6 }
  0x88   : > { %p4217_p1 = pneg %p4216_p12 }
  0x8a   : > { %p4224_p0 = pnand %p4223_p5, %p4217_p1 }
  0x8c   : > { %4227 = shalt.err (!%p4224_p0)
}
  0x8d   : > { %p5073_p4 = scmp.ne.s32.totalorder %s5059_s12, 0  ;;  %s4402_s1 = smov [#allocation14]  }
  0x8e   : > { %s271_s8 = sshll.u32 %s4402_s1, 4  ;;  %s4228_s22 = scalar_lea.hbm %s5024_s6, 32  ;;  %s272_s8 = int_to_ptr.vmem [resolvable:$true] %s271_s8 }
  0x8f   : > { %4040 = dma.hbm_to_vmem [thread:$0]  (!%p5073_p4), %s5022_s4, 32, %s248_s3, [#allocation10]  }
  0x90   : > { %p4229_p11 = scmp.ne.s32.totalorder %s5024_s6, %s4228_s22  ;;  %p4235_p7 = scmp.lt.u32.totalorder %s4228_s22, %s5024_s6 }
  0x92   : > { %p4231_p0 = pnand %p4229_p11, %p5072_p8 }
  0x94   : > { %p4232_p13 = pneg %p4231_p0 }
  0x96   : > { %p4237_p10 = pnand %p4235_p7, %p4232_p13 }
  0x98   : > { %4240 = shalt.err (!%p4237_p10)
}
  0x99   : > { %s4241_s3 = scalar_lea.vmem %s272_s8, 32  ;;  %p4249_p6 = scmp.lt.s32.totalorder %s272_s8, %s272_s8 }
  0x9a   : > { %p4242_p9 = scmp.ne.s32.totalorder %s272_s8, %s4241_s3  ;;  %p4250_p3 = scmp.lt.s32.totalorder %s4241_s3, %s4241_s3 }
  0x9c   : > { %p4244_p12 = pnand %p4242_p9, %p5072_p8  ;;  %p4251_p5 = por %p4250_p3, %p4249_p6 }
  0x9e   : > { %p4245_p1 = pneg %p4244_p12 }
  0xa0   : > { %p4252_p2 = pnand %p4251_p5, %p4245_p1 }
  0xa2   : > { %4255 = shalt.err (!%p4252_p2)
}
  0xa3   : > { %4046 = dma.hbm_to_vmem [thread:$0]  (!%p5073_p4), %s5024_s6, 32, %s272_s8, [#allocation13]  }
  0xa4   : > { %s4681_s20 = scalar_lea.hbm %s5018_s0, %s4589_s23  ;;  %s286_s10 = scalar_lea.vmem [#allocation3], %s4586_s14 }
  0xa5   : > { %s293_s18 = sshll.u32 %s286_s10, 4  ;;  %s5074_s12 = sand.u32 1, %s4390_s26   ;;  %s4684_s18 = int_to_ptr.vmem [resolvable:$true] %s293_s18 }
  0xa6   : > { %s4688_s22 = scalar_lea.sflag [#allocation4], %s5074_s12  ;;  %s4256_s13 = scalar_lea.hbm %s4681_s20, 512 }
  0xa7   : > { %p4257_p2 = scmp.ne.s32.totalorder %s4681_s20, %s4256_s13  ;;  %p5075_p8 = scmp.ne.s32.totalorder %s5069_s15, 0 }
  0xa8   : > { %s4261_s24 = scalar_lea.hbm %s5018_s0, 1024  ;;  %p4262_p0 = scmp.lt.u32.totalorder %s4681_s20, %s5018_s0 }
  0xa9   : > { %p4259_p4 = pnand %p4257_p2, %p5075_p8  ;;  %p4263_p13 = scmp.lt.u32.totalorder %s4261_s24, %s4256_s13 }
  0xaa   : > { %p4265_p10 = scmp.lt.u32.totalorder %s4256_s13, %s4681_s20 }
  0xab   : > { %p4260_p11 = pneg %p4259_p4  ;;  %p4264_p7 = por %p4263_p13, %p4262_p0 }
  0xad   : > { %p4266_p9 = por %p4265_p10, %p4264_p7 }
  0xaf   : > { %p4267_p12 = pnand %p4266_p9, %p4260_p11 }
  0xb1   : > { %4270 = shalt.err (!%p4267_p12)
}
  0xb2   : > { %s4271_s17 = scalar_lea.vmem %s4684_s18, 512  ;;  %s4403_s7 = smov [#allocation3]  }
  0xb3   : > { %p4272_p1 = scmp.ne.s32.totalorder %s4684_s18, %s4271_s17  ;;  %s4276_s1 = sshll.u32 %s4403_s7, 4  ;;  %s4277_s1 = int_to_ptr.vmem [resolvable:$false] %s4276_s1 }
  0xb4   : > { %s4278_s10 = scalar_lea.vmem %s4277_s1, 1024  ;;  %p4279_p5 = scmp.lt.s32.totalorder %s4684_s18, %s4277_s1 }
  0xb5   : > { %p4274_p6 = pnand %p4272_p1, %p5075_p8  ;;  %p4280_p2 = scmp.lt.s32.totalorder %s4278_s10, %s4271_s17 }
  0xb7   : > { %p4275_p3 = pneg %p4274_p6  ;;  %p4281_p4 = por %p4280_p2, %p4279_p5 }
  0xb9   : > { %p4282_p0 = pnand %p4281_p4, %p4275_p3 }
  0xbb   : > { %4285 = shalt.err (!%p4282_p0)
}
  0xbc   : > { %p5076_p11 = scmp.ne.s32.totalorder %s5067_s11, 0  ;;  %s4719_s8 = scalar_lea.hbm %s5020_s2, %s4589_s23 }
  0xbd   : > { %s328_s27 = scalar_lea.vmem [#allocation8], %s4586_s14  ;;  %s4286_s3 = scalar_lea.hbm %s4719_s8, 512 }
  0xbe   : > { %4050 = dma.hbm_to_vmem [thread:$0]  (!%p5076_p11), %s4681_s20, 512, %s4684_s18, %s4688_s22, %s5071_s21, %s5071_s21, %s5070_s16  }
  0xbf   : > { %s335_s24 = sshll.u32 %s328_s27, 4  ;;  %p4287_p13 = scmp.ne.s32.totalorder %s4719_s8, %s4286_s3  ;;  %s4722_s24 = int_to_ptr.vmem [resolvable:$true] %s335_s24 }
  0xc0   : > { %s4291_s18 = scalar_lea.hbm %s5020_s2, 1024  ;;  %p4292_p9 = scmp.lt.u32.totalorder %s4719_s8, %s5020_s2 }
  0xc1   : > { %p4289_p7 = pnand %p4287_p13, %p5075_p8  ;;  %p4293_p12 = scmp.lt.u32.totalorder %s4291_s18, %s4286_s3 }
  0xc2   : > { %p4295_p6 = scmp.lt.u32.totalorder %s4286_s3, %s4719_s8 }
  0xc3   : > { %p4290_p10 = pneg %p4289_p7  ;;  %p4294_p1 = por %p4293_p12, %p4292_p9 }
  0xc5   : > { %p4296_p3 = por %p4295_p6, %p4294_p1 }
  0xc7   : > { %p4297_p5 = pnand %p4296_p3, %p4290_p10 }
  0xc9   : > { %4300 = shalt.err (!%p4297_p5)
}
  0xca   : > { %s4301_s14 = scalar_lea.vmem %s4722_s24, 512  ;;  %s4404_s17 = smov [#allocation8]  }
  0xcb   : > { %p4302_p2 = scmp.ne.s32.totalorder %s4722_s24, %s4301_s14  ;;  %s4306_s7 = sshll.u32 %s4404_s17, 4  ;;  %s4307_s7 = int_to_ptr.vmem [resolvable:$false] %s4306_s7 }
  0xcc   : > { %s4308_s1 = scalar_lea.vmem %s4307_s7, 1024  ;;  %p4309_p13 = scmp.lt.s32.totalorder %s4722_s24, %s4307_s7 }
  0xcd   : > { %p4304_p4 = pnand %p4302_p2, %p5075_p8  ;;  %p4310_p7 = scmp.lt.s32.totalorder %s4308_s1, %s4301_s14 }
  0xcf   : > { %p4305_p0 = pneg %p4304_p4  ;;  %p4311_p9 = por %p4310_p7, %p4309_p13 }
  0xd1   : > { %p4312_p12 = pnand %p4311_p9, %p4305_p0 }
  0xd3   : > { %4315 = shalt.err (!%p4312_p12)
}
  0xd4   : > { %4056 = dma.hbm_to_vmem [thread:$0]  (!%p5076_p11), %s4719_s8, 512, %s4722_s24, %s4607_s5, %s5071_s21, %s5071_s21, %s5070_s16  }
  0xd5   : > { %p5077_p8 = scmp.ne.s32.totalorder %s5058_s9, 0 }
  0xd6   : > { %s4752_s15 = sand.u32 (!%p5077_p8), 1, %s4386_s25   ;;  %p5078_p10 = scmp.ne.s32.totalorder (!%p5077_p8), %s5055_s30, 0 }
  0xd7   : > { %347 = sbr.rel (%p5077_p8) target bundleno = 1534 (0x5fe), region = 48  ;;  %s4755_s10 = sshll.u32 (!%p5077_p8), %s4752_s15, 5 }
  0xd8   : > { %s350_s11 = scalar_lea.sflag (!%p5077_p8), [#allocation4], %s4752_s15  ;;  %s4759_s12 = scalar_lea.vmem (!%p5077_p8), [#allocation3], %s4755_s10 }
  0xde   : > { %4361 = dma.done.wait (%p5078_p10), %s350_s11, 512  }
  0xdf   : > { %4363 = vsyncadd (%p5078_p10), %s350_s11, 4294966784  ;;  %s358_s5 = sand.u32 1, %s4470_s28   ;;  %s4767_s16 = scalar_lea.vmem [#allocation6], %s4755_s10 }
  0xe0   : > { %s359_s9 = scalar_lea.sflag [#allocation7], %s358_s5 }
  0xe1   : > { %4365 = dma.done.wait (%p5078_p10), %s359_s9, 1024  }
  0xe2   : > { %4367 = vsyncadd (%p5078_p10), %s359_s9, 4294966272  ;;  %s4774_s21 = scalar_lea.vmem [#allocation8], %s4755_s10  ;;  %p5079_p11 = scmp.eq.s32.totalorder %s4470_s28, 0 }
  0xe4   : > { %4369 = dma.done.wait (%p5079_p11), [#allocation10], 57376   ;;  %p5080_p1 = pmov %p5079_p11 }
  0xe6   : > { %4371 = vsyncadd (%p5080_p1), [#allocation10], 4294909920  ;;  %p5081_p6 = pmov %p5080_p1 }
  0xe7   : > { %p5082_p3 = pmov %p5080_p1 }
  0xe8   : > { %4373 = dma.done.wait (%p5081_p6), [#allocation13], 57376  }
  0xe9   : > { %4375 = vsyncadd (%p5082_p3), [#allocation13], 4294909920  ;;  %v4405_v0 = vmov 0.0   ;;  %v476_v1 = vld [vmem:[#allocation9 + $0x8] sm:$0xff]  ;;  %v478_v2 = vld [vmem:[#allocation9 + $0x18] sm:$0xff]  ;;  %vm440_vm0 = vcmask 1042432  }
  0xea   : > { %429 = vst [vmem:[#allocation2 + $0x8] sm:$0x7] %v4405_v0  ;;  %428 = vst [vmem:[#allocation2] sm:$0x7] %v4405_v0  ;;  %v475_v3 = vld [vmem:[#allocation9] sm:$0xff]  ;;  %v3058_v4 = vpack.c.bf16 %v478_v2, %v476_v1  ;;  %v477_v5 = vld [vmem:[#allocation9 + $0x10] sm:$0xff] }
  0xeb   : > { %430 = vst [vmem:[#allocation2 + $0x20] sm:$0x38] %v4405_v0  ;;  %431 = vst [vmem:[#allocation2 + $0x28] sm:$0x38] %v4405_v0  ;;  %v480_v6 = vld [vmem:[#allocation9 + $0x28] sm:$0xff]  ;;  %v482_v7 = vld [vmem:[#allocation9 + $0x38] sm:$0xff]  ;;  %v3060_v8 = vpack.c.bf16 %v477_v5, %v475_v3 }
  0xec   : > { %v3062_v9 = vpack.c.bf16 %v482_v7, %v480_v6  ;;  %v479_v10 = vld [vmem:[#allocation9 + $0x20] sm:$0xff]  ;;  %v481_v11 = vld [vmem:[#allocation9 + $0x30] sm:$0xff]  ;;  %v484_v12 = vld [vmem:[#allocation9 + $0x48] sm:$0xff]  ;;  %3059 = vmatprep.subr.bf16.mxu0 %v3058_v4  ;;  %vm697_vm1 = vcmask 1046528   ;;  %vm866_vm2 = vcmask 1045504   ;;  %vm1035_vm3 = vcmask 1044480  }
  0xed   : > { %v486_v13 = vld [vmem:[#allocation9 + $0x58] sm:$0xff]  ;;  %3061 = vmatpush1.bf16.msra.mxu0 %v3060_v8  ;;  %v3064_v14 = vpack.c.bf16 %v481_v11, %v479_v10  ;;  %v483_v16 = vld [vmem:[#allocation9 + $0x40] sm:$0xff]  ;;  %v485_v17 = vld [vmem:[#allocation9 + $0x50] sm:$0xff]  ;;  %vm1204_vm4 = vcmask 1043456   ;;  %vm1541_vm5 = vcmask 1041408   ;;  %s427_s30 = scalar_lea.vmem [#allocation15], %s4755_s10 }
  0xee   : > { %3063 = vmatprep.subr.bf16.mxu0 %v3062_v9  ;;  %v3066_v15 = vpack.c.bf16 %v486_v13, %v484_v12  ;;  %v488_v18 = vld [vmem:[#allocation9 + $0x68] sm:$0xff]  ;;  %v490_v19 = vld [vmem:[#allocation9 + $0x78] sm:$0xff]  ;;  %v3068_v20 = vpack.c.bf16 %v485_v17, %v483_v16  ;;  %v487_v22 = vld [vmem:[#allocation9 + $0x60] sm:$0xff]  ;;  %s2870_s13 = sshll.u32 %s427_s30, 4  ;;  %s3057_s8 = sshll.u32 %s4470_s28, 9  ;;  %s4969_s13 = int_to_ptr.vmem [resolvable:$true] %s2870_s13 }
  0xef   : > { %v3070_v21 = vpack.c.bf16 %v490_v19, %v488_v18  ;;  %v489_v23 = vld [vmem:[#allocation9 + $0x70] sm:$0xff]  ;;  %v492_v24 = vld [vmem:[#allocation9 + $0x88] sm:$0xff]  ;;  %v494_v25 = vld [vmem:[#allocation9 + $0x98] sm:$0xff]  ;;  %s5083_s3 = sld [smem:[#allocation29_spill]]  ;;  %s2857_s28 = scalar_lea.sflag [#allocation5], %s4752_s15 }
  0xf0   : > { %v3072_v26 = vpack.c.bf16 %v489_v23, %v487_v22  ;;  %v3074_v27 = vpack.c.bf16 %v494_v25, %v492_v24  ;;  %v491_v28 = vld [vmem:[#allocation9 + $0x80] sm:$0xff]  ;;  %v493_v29 = vld [vmem:[#allocation9 + $0x90] sm:$0xff]  ;;  %v496_v30 = vld [vmem:[#allocation9 + $0xa8] sm:$0xff]  ;;  %s4316_s20 = scalar_lea.vmem %s4969_s13, 512  ;;  %p5084_p2 = scmp.ne.s32.totalorder %s5065_s19, 0 }
  0xf1   : > { %3065 = vmatpush1.bf16.msra.mxu0 %v3064_v14  ;;  %v498_v31 = vld [vmem:[#allocation9 + $0xb8] sm:$0xff]  ;;  %v3076_v32 = vpack.c.bf16 %v493_v29, %v491_v28  ;;  %v495_v34 = vld [vmem:[#allocation9 + $0xa0] sm:$0xff]  ;;  %v497_v35 = vld [vmem:[#allocation9 + $0xb0] sm:$0xff]  ;;  %p4317_p5 = scmp.ne.s32.totalorder %s4969_s13, %s4316_s20  ;;  %s4406_s18 = smov [#allocation15]  }
  0xf2   : > { %3067 = vmatprep.subr.bf16.mxu0 %v3066_v15  ;;  %v3078_v33 = vpack.c.bf16 %v498_v31, %v496_v30  ;;  %v500_v36 = vld [vmem:[#allocation9 + $0xc8] sm:$0xff]  ;;  %v502_v37 = vld [vmem:[#allocation9 + $0xd8] sm:$0xff]  ;;  %v3080_v38 = vpack.c.bf16 %v497_v35, %v495_v34  ;;  %v499_v40 = vld [vmem:[#allocation9 + $0xc0] sm:$0xff]  ;;  %s4320_s22 = sshll.u32 %s4406_s18, 4  ;;  %s4321_s22 = int_to_ptr.vmem [resolvable:$false] %s4320_s22 }
  0xf3   : > { %v3082_v39 = vpack.c.bf16 %v502_v37, %v500_v36  ;;  %v501_v41 = vld [vmem:[#allocation9 + $0xd0] sm:$0xff]  ;;  %v4785_v42 = vld [vmem:[%s4759_s12 + $0x8] sm:$0xff]  ;;  %v506_v44 = vld [vmem:[#allocation9 + $0xf8] sm:$0xff]  ;;  %p4318_p4 = pnand %p4317_p5, %p5084_p2  ;;  %s4322_s23 = scalar_lea.vmem %s4321_s22, 1024 }
  0xf4   : > { %v504_v43 = vld [vmem:[#allocation9 + $0xe8] sm:$0xff]  ;;  %v442_v45 = vrot.slane %v4785_v42, 5  ;;  %v4789_v46 = vld [vmem:[%s4759_s12] sm:$0xff]  ;;  %v3084_v48 = vpack.c.bf16 %v501_v41, %v499_v40  ;;  %v505_v51 = vld [vmem:[#allocation9 + $0xf0] sm:$0xff]  ;;  %p4323_p13 = scmp.lt.s32.totalorder %s4969_s13, %s4321_s22  ;;  %p4324_p7 = scmp.lt.s32.totalorder %s4322_s23, %s4316_s20 }
  0xf5   : > { %3069 = vmatpush1.bf16.msra.mxu0 %v3068_v20  ;;  %v441_v47 = vrot.slane %v4789_v46, 5  ;;  %v3086_v49 = vpack.c.bf16 %v506_v44, %v504_v43  ;;  %v503_v50 = vld [vmem:[#allocation9 + $0xe0] sm:$0xff]  ;;  %v508_v52 = vld [vmem:[#allocation9 + $0x108] sm:$0xff]  ;;  %v510_v53 = vld [vmem:[#allocation9 + $0x118] sm:$0xff]  ;;  %s4974_s29 = scalar_lea.hbm %s5083_s3, %s3057_s8  ;;  %p4319_p0 = pneg %p4318_p4 }
  0xf6   : > { %3071 = vmatprep.subr.bf16.mxu0 %v3070_v21  ;;  %454 = vst [vmem:[#allocation2 + $0x8] sm:$0xf8] %v442_v45  ;;  %v3088_v54 = vpack.c.bf16 %v505_v51, %v503_v50  ;;  %v3090_v55 = vpack.c.bf16 %v510_v53, %v508_v52  ;;  %v507_v56 = vld [vmem:[#allocation9 + $0x100] sm:$0xff]  ;;  %v509_v57 = vld [vmem:[#allocation9 + $0x110] sm:$0xff]  ;;  %v512_v58 = vld [vmem:[#allocation9 + $0x128] sm:$0xff]  ;;  %p4325_p9 = por %p4324_p7, %p4323_p13 }
  0xf7   : > { %453 = vst [vmem:[#allocation2] sm:$0xf8] %v441_v47  ;;  %v514_v59 = vld [vmem:[#allocation9 + $0x138] sm:$0xff]  ;;  %v3092_v61 = vpack.c.bf16 %v509_v57, %v507_v56  ;;  %v511_v63 = vld [vmem:[#allocation9 + $0x120] sm:$0xff]  ;;  %v513_v0 = vld [vmem:[#allocation9 + $0x130] sm:$0xff] }
  0xf8   : > { %v3094_v62 = vpack.c.bf16 %v514_v59, %v512_v58  ;;  %v516_v1 = vld [vmem:[#allocation9 + $0x148] sm:$0xff]  ;;  %v518_v2 = vld [vmem:[#allocation9 + $0x158] sm:$0xff]  ;;  %v3096_v3 = vpack.c.bf16 %v513_v0, %v511_v63  ;;  %v515_v5 = vld [vmem:[#allocation9 + $0x140] sm:$0xff]  ;;  %p4326_p12 = pnand %p4325_p9, %p4319_p0 }
  0xf9   : > { %3073 = vmatpush1.bf16.msra.mxu0 %v3072_v26  ;;  %v3098_v4 = vpack.c.bf16 %v518_v2, %v516_v1  ;;  %v517_v6 = vld [vmem:[#allocation9 + $0x150] sm:$0xff]  ;;  %v520_v7 = vld [vmem:[#allocation9 + $0x168] sm:$0xff]  ;;  %v522_v8 = vld [vmem:[#allocation9 + $0x178] sm:$0xff] }
  0xfa   : > { %3075 = vmatprep.subr.bf16.mxu0 %v3074_v27  ;;  %v3100_v9 = vpack.c.bf16 %v517_v6, %v515_v5  ;;  %v3102_v10 = vpack.c.bf16 %v522_v8, %v520_v7  ;;  %v519_v11 = vld [vmem:[#allocation9 + $0x160] sm:$0xff]  ;;  %v521_v12 = vld [vmem:[#allocation9 + $0x170] sm:$0xff]  ;;  %v524_v13 = vld [vmem:[#allocation9 + $0x188] sm:$0xff] }
  0xfb   : > { %v526_v14 = vld [vmem:[#allocation9 + $0x198] sm:$0xff]  ;;  %v4798_v17 = vld [vmem:[%s4759_s12 + $0x10] sm:$0xff]  ;;  %v3104_v18 = vpack.c.bf16 %v521_v12, %v519_v11  ;;  %v523_v21 = vld [vmem:[#allocation9 + $0x180] sm:$0xff] }
  0xfc   : > { %v435_v15 = vld [vmem:[%s4759_s12 + $0x18] sm:$0xff]  ;;  %v443_v19 = vrot.slane %v4798_v17, 5  ;;  %v3106_v20 = vpack.c.bf16 %v526_v14, %v524_v13  ;;  %v525_v22 = vld [vmem:[#allocation9 + $0x190] sm:$0xff]  ;;  %v528_v23 = vld [vmem:[#allocation9 + $0x1a8] sm:$0xff] }
  0xfd   : > { %3077 = vmatpush1.bf16.msra.mxu0 %v3076_v32  ;;  %v472_v60 = vld [vmem:[#allocation2 + $0x8] sm:$0xff]  ;;  %v445_v16 = vrot.slane %v435_v15, 5  ;;  %v3108_v25 = vpack.c.bf16 %v525_v22, %v523_v21  ;;  %v527_v27 = vld [vmem:[#allocation9 + $0x1a0] sm:$0xff]  ;;  %v529_v28 = vld [vmem:[#allocation9 + $0x1b0] sm:$0xff] }
  0xfe   : > { %3079 = vmatprep.subr.bf16.mxu0 %v3078_v33  ;;  %603 = vmatprep.mubr.f32.mxu0 %v472_v60  ;;  %v530_v24 = vld [vmem:[#allocation9 + $0x1b8] sm:$0xff]  ;;  %457 = vst [vmem:[#allocation2 + $0x20] sm:$0x7] %v443_v19  ;;  %v532_v29 = vld [vmem:[#allocation9 + $0x1c8] sm:$0xff]  ;;  %v3112_v31 = vpack.c.bf16 %v529_v28, %v527_v27  ;;  %v531_v33 = vld [vmem:[#allocation9 + $0x1c0] sm:$0xff] }
  0xff   : > { %458 = vst [vmem:[#allocation2 + $0x28] sm:$0x7] %v445_v16  ;;  %v3110_v26 = vpack.c.bf16 %v530_v24, %v528_v23  ;;  %v534_v30 = vld [vmem:[#allocation9 + $0x1d8] sm:$0xff]  ;;  %v533_v34 = vld [vmem:[#allocation9 + $0x1d0] sm:$0xff]  ;;  %v536_v35 = vld [vmem:[#allocation9 + $0x1e8] sm:$0xff]  ;;  %v4804_v53 = vsel %vm440_vm0, %v442_v45, %v445_v16  ;;  %v4811_v45 = vsel %vm440_vm0, %v441_v47, %v443_v19 }
 0x100   : > { %v3114_v32 = vpack.c.bf16 %v534_v30, %v532_v29  ;;  %v538_v36 = vld [vmem:[#allocation9 + $0x1f8] sm:$0xff]  ;;  %v3116_v37 = vpack.c.bf16 %v533_v34, %v531_v33  ;;  %v537_v40 = vld [vmem:[#allocation9 + $0x1f0] sm:$0xff]  ;;  %v628_v41 = vld [vmem:[#allocation9 + $0x208] sm:$0xff] }
 0x101   : > { %3081 = vmatpush1.bf16.msra.mxu0 %v3080_v38  ;;  %v3118_v38 = vpack.c.bf16 %v538_v36, %v536_v35  ;;  %v630_v43 = vld [vmem:[#allocation9 + $0x218] sm:$0xff]  ;;  %v629_v50 = vld [vmem:[#allocation9 + $0x210] sm:$0xff]  ;;  %v632_v51 = vld [vmem:[#allocation9 + $0x228] sm:$0xff] }
 0x102   : > { %3083 = vmatprep.subr.bf16.mxu0 %v3082_v39  ;;  %v535_v39 = vld [vmem:[#allocation9 + $0x1e0] sm:$0xff]  ;;  %v634_v52 = vld [vmem:[#allocation9 + $0x238] sm:$0xff]  ;;  %v633_v59 = vld [vmem:[#allocation9 + $0x230] sm:$0xff] }
 0x103   : > { %v3120_v44 = vpack.c.bf16 %v537_v40, %v535_v39  ;;  %v3126_v57 = vpack.c.bf16 %v634_v52, %v632_v51  ;;  %v631_v58 = vld [vmem:[#allocation9 + $0x220] sm:$0xff]  ;;  %v638_v63 = vld [vmem:[#allocation9 + $0x258] sm:$0xff]  ;;  %v637_v2 = vld [vmem:[#allocation9 + $0x250] sm:$0xff] }
 0x104   : > { %v3128_v42 = vpack.c.bf16 %v633_v59, %v631_v58  ;;  %v635_v1 = vld [vmem:[#allocation9 + $0x240] sm:$0xff]  ;;  %v642_v5 = vld [vmem:[#allocation9 + $0x278] sm:$0xff]  ;;  %v641_v47 = vld [vmem:[#allocation9 + $0x270] sm:$0xff] }
 0x105   : > { %3085 = vmatpush1.bf16.msra.mxu0 %v3084_v48  ;;  %v3122_v48 = vpack.c.bf16 %v630_v43, %v628_v41  ;;  %v3132_v6 = vpack.c.bf16 %v637_v2, %v635_v1  ;;  %v639_v7 = vld [vmem:[#allocation9 + $0x260] sm:$0xff]  ;;  %v644_v8 = vld [vmem:[#allocation9 + $0x288] sm:$0xff]  ;;  %v645_v13 = vld [vmem:[#allocation9 + $0x290] sm:$0xff] }
 0x106   : > { %3087 = vmatprep.subr.bf16.mxu0 %v3086_v49  ;;  %v627_v49 = vld [vmem:[#allocation9 + $0x200] sm:$0xff]  ;;  %v648_v14 = vld [vmem:[#allocation9 + $0x2a8] sm:$0xff]  ;;  %v650_v15 = vld [vmem:[#allocation9 + $0x2b8] sm:$0xff] }
 0x107   : > { %v3124_v56 = vpack.c.bf16 %v629_v50, %v627_v49  ;;  %v643_v12 = vld [vmem:[#allocation9 + $0x280] sm:$0xff]  ;;  %v3142_v17 = vpack.c.bf16 %v650_v15, %v648_v14  ;;  %v649_v19 = vld [vmem:[#allocation9 + $0x2b0] sm:$0xff]  ;;  %v654_v21 = vld [vmem:[#allocation9 + $0x2d8] sm:$0xff] }
 0x108   : > { %v3140_v16 = vpack.c.bf16 %v645_v13, %v643_v12  ;;  %v651_v24 = vld [vmem:[#allocation9 + $0x2c0] sm:$0xff]  ;;  %v658_v27 = vld [vmem:[#allocation9 + $0x2f8] sm:$0xff]  ;;  %v677_v2 = vld [vmem:[#allocation9 + $0x390] sm:$0xff] }
 0x109   : > { %3089 = vmatpush1.bf16.msra.mxu0 %v3088_v54  ;;  %v621_v54 = vld [vmem:[#allocation2 + $0x8] sm:$0xfe]  ;;  %v655_v30 = vld [vmem:[#allocation9 + $0x2e0] sm:$0xff]  ;;  %v685_v12 = vld [vmem:[#allocation9 + $0x3d0] sm:$0xff] }
 0x10a   : > { %3091 = vmatprep.subr.bf16.mxu0 %v3090_v55  ;;  %v471_v55 = vld [vmem:[#allocation2] sm:$0xff]  ;;  %v701_v60 = vrot.slane %v621_v54, 1  ;;  %v662_v33 = vld [vmem:[#allocation9 + $0x318] sm:$0xff]  ;;  %v659_v36 = vld [vmem:[#allocation9 + $0x300] sm:$0xff] }
 0x10b   : > { %v666_v39 = vld [vmem:[#allocation9 + $0x338] sm:$0xff]  ;;  %v663_v43 = vld [vmem:[#allocation9 + $0x320] sm:$0xff]  ;;  %v669_v54 = vld [vmem:[#allocation9 + $0x350] sm:$0xff] }
 0x10c   : > { %v670_v49 = vld [vmem:[#allocation9 + $0x358] sm:$0xff]  ;;  %v667_v52 = vld [vmem:[#allocation9 + $0x340] sm:$0xff]  ;;  %v688_v13 = vld [vmem:[#allocation9 + $0x3e8] sm:$0xff] }
 0x10d   : > { %3093 = vmatpush1.bf16.msra.mxu0 %v3092_v61  ;;  %v702_v61 = vrot.slane %v4804_v53, 1  ;;  %v671_v59 = vld [vmem:[#allocation9 + $0x360] sm:$0xff]  ;;  %v690_v14 = vld [vmem:[#allocation9 + $0x3f8] sm:$0xff] }
 0x10e   : > { %3095 = vmatprep.subr.bf16.mxu0 %v3094_v62  ;;  %v636_v62 = vld [vmem:[#allocation9 + $0x248] sm:$0xff]  ;;  %v675_v1 = vld [vmem:[#allocation9 + $0x380] sm:$0xff] }
 0x10f   : > { %v3130_v0 = vpack.c.bf16 %v638_v63, %v636_v62  ;;  %v676_v62 = vld [vmem:[#allocation9 + $0x388] sm:$0xff]  ;;  %v678_v63 = vld [vmem:[#allocation9 + $0x398] sm:$0xff] }
 0x111   : > { %3097 = vmatpush1.bf16.msra.mxu0 %v3096_v3  ;;  %v703_v3 = vsel %vm697_vm1, %v701_v60, %v702_v61  ;;  %v673_v60 = vld [vmem:[#allocation9 + $0x370] sm:$0xff] }
 0x112   : > { %3099 = vmatprep.subr.bf16.mxu0 %v3098_v4  ;;  %v640_v4 = vld [vmem:[#allocation9 + $0x268] sm:$0xff] }
 0x113   : > { %v3134_v46 = vpack.c.bf16 %v642_v5, %v640_v4  ;;  %v682_v4 = vld [vmem:[#allocation9 + $0x3b8] sm:$0xff]  ;;  %v3172_v5 = vpack.c.bf16 %v677_v2, %v675_v1  ;;  %v814_v1 = vld [vmem:[#allocation9 + $0x480] sm:$0xff]  ;;  %v816_v2 = vld [vmem:[#allocation9 + $0x490] sm:$0xff] }
 0x115   : > { %3101 = vmatpush1.bf16.msra.mxu0 %v3100_v9  ;;  %v646_v9 = vld [vmem:[#allocation9 + $0x298] sm:$0xff] }
 0x116   : > { %3103 = vmatprep.subr.bf16.mxu0 %v3102_v10  ;;  %v3136_v10 = vpack.c.bf16 %v641_v47, %v639_v7  ;;  %v3138_v11 = vpack.c.bf16 %v646_v9, %v644_v8  ;;  %v681_v7 = vld [vmem:[#allocation9 + $0x3b0] sm:$0xff]  ;;  %v684_v47 = vld [vmem:[#allocation9 + $0x3c8] sm:$0xff]  ;;  %v686_v8 = vld [vmem:[#allocation9 + $0x3d8] sm:$0xff] }
 0x119   : > { %3105 = vmatpush1.bf16.msra.mxu0 %v3104_v18  ;;  %v647_v18 = vld [vmem:[#allocation9 + $0x2a0] sm:$0xff] }
 0x11a   : > { %3107 = vmatprep.subr.bf16.mxu0 %v3106_v20  ;;  %v652_v20 = vld [vmem:[#allocation9 + $0x2c8] sm:$0xff]  ;;  %v3144_v22 = vpack.c.bf16 %v649_v19, %v647_v18  ;;  %v689_v18 = vld [vmem:[#allocation9 + $0x3f0] sm:$0xff] }
 0x11b   : > { %v3146_v23 = vpack.c.bf16 %v654_v21, %v652_v20  ;;  %v620_v19 = vld [vmem:[#allocation2] sm:$0xfe]  ;;  %v799_v20 = vld [vmem:[#allocation9 + $0x408] sm:$0xff]  ;;  %v801_v21 = vld [vmem:[#allocation9 + $0x418] sm:$0xff] }
 0x11d   : > { %3109 = vmatpush1.bf16.msra.mxu0 %v3108_v25  ;;  %v653_v25 = vld [vmem:[#allocation9 + $0x2d0] sm:$0xff] }
 0x11e   : > { %3111 = vmatprep.subr.bf16.mxu0 %v3110_v26  ;;  %v656_v26 = vld [vmem:[#allocation9 + $0x2e8] sm:$0xff]  ;;  %v3148_v28 = vpack.c.bf16 %v653_v25, %v651_v24  ;;  %v698_v24 = vrot.slane %v620_v19, 1  ;;  %v699_v25 = vrot.slane %v4811_v45, 1 }
 0x11f   : > { %v3150_v29 = vpack.c.bf16 %v658_v27, %v656_v26  ;;  %v3186_v26 = vpack.c.bf16 %v801_v21, %v799_v20  ;;  %v798_v27 = vld [vmem:[#allocation9 + $0x400] sm:$0xff]  ;;  %v831_v19 = vld [vmem:[#allocation9 + $0x508] sm:$0xff]  ;;  %v833_v20 = vld [vmem:[#allocation9 + $0x518] sm:$0xff] }
 0x121   : > { %3113 = vmatpush1.bf16.msra.mxu0 %v3112_v31  ;;  %v657_v31 = vld [vmem:[#allocation9 + $0x2f0] sm:$0xff] }
 0x122   : > { %3115 = vmatprep.subr.bf16.mxu0 %v3114_v32  ;;  %v660_v32 = vld [vmem:[#allocation9 + $0x308] sm:$0xff]  ;;  %v3152_v34 = vpack.c.bf16 %v657_v31, %v655_v30  ;;  %v624_v30 = vld [vmem:[#allocation2 + $0x20] sm:$0x1] }
 0x123   : > { %v3154_v35 = vpack.c.bf16 %v662_v33, %v660_v32  ;;  %v803_v31 = vld [vmem:[#allocation9 + $0x428] sm:$0xff]  ;;  %v805_v32 = vld [vmem:[#allocation9 + $0x438] sm:$0xff] }
 0x124   : > { %v794_v33 = vld [vmem:[#allocation2 + $0x8] sm:$0xfc] }
 0x125   : > { %3117 = vmatpush1.bf16.msra.mxu0 %v3116_v37  ;;  %v661_v37 = vld [vmem:[#allocation9 + $0x310] sm:$0xff] }
 0x126   : > { %3119 = vmatprep.subr.bf16.mxu0 %v3118_v38  ;;  %v664_v38 = vld [vmem:[#allocation9 + $0x328] sm:$0xff]  ;;  %v3156_v40 = vpack.c.bf16 %v661_v37, %v659_v36  ;;  %v704_v36 = vrot.slane %v624_v30, 1  ;;  %v3190_v37 = vpack.c.bf16 %v805_v32, %v803_v31  ;;  %v836_v30 = vld [vmem:[#allocation9 + $0x530] sm:$0xff]  ;;  %v841_v32 = vld [vmem:[#allocation9 + $0x558] sm:$0xff] }
 0x127   : > { %v3158_v41 = vpack.c.bf16 %v666_v39, %v664_v38  ;;  %v802_v38 = vld [vmem:[#allocation9 + $0x420] sm:$0xff]  ;;  %v804_v39 = vld [vmem:[#allocation9 + $0x430] sm:$0xff]  ;;  %v839_v31 = vld [vmem:[#allocation9 + $0x548] sm:$0xff] }
 0x129   : > { %3121 = vmatpush1.bf16.msra.mxu0 %v3120_v44  ;;  %v665_v44 = vld [vmem:[#allocation9 + $0x330] sm:$0xff] }
 0x12a   : > { %3123 = vmatprep.subr.bf16.mxu0 %v3122_v48  ;;  %v668_v48 = vld [vmem:[#allocation9 + $0x348] sm:$0xff]  ;;  %v3160_v50 = vpack.c.bf16 %v665_v44, %v663_v43  ;;  %v871_v43 = vrot.slane %v4804_v53, 2 }
 0x12b   : > { %v3162_v51 = vpack.c.bf16 %v670_v49, %v668_v48  ;;  %v807_v44 = vld [vmem:[#allocation9 + $0x448] sm:$0xff]  ;;  %v809_v48 = vld [vmem:[#allocation9 + $0x458] sm:$0xff]  ;;  %v3192_v49 = vpack.c.bf16 %v804_v39, %v802_v38 }
 0x12c   : > { %604 = vmatmul.mubr.f32.vlgmr.msra.gmra.mrb[0].mxu0 %v471_v55  ;;  %v672_v55 = vld [vmem:[#allocation9 + $0x368] sm:$0xff]  ;;  %v845_v38 = vld [vmem:[#allocation9 + $0x578] sm:$0xff] }
 0x12d   : > { %3125 = vmatpush1.bf16.msra.mxu0 %v3124_v56  ;;  %609 = vmatprep.mubr.f32.mxu0 %v4804_v53  ;;  %v674_v56 = vld [vmem:[#allocation9 + $0x378] sm:$0xff] }
 0x12e   : > { %3127 = vmatprep.subr.bf16.mxu0 %v3126_v57  ;;  %v3164_v57 = vpack.c.bf16 %v669_v54, %v667_v52  ;;  %v3166_v58 = vpack.c.bf16 %v674_v56, %v672_v55  ;;  %v806_v52 = vld [vmem:[#allocation9 + $0x440] sm:$0xff]  ;;  %v808_v54 = vld [vmem:[#allocation9 + $0x450] sm:$0xff]  ;;  %v811_v55 = vld [vmem:[#allocation9 + $0x468] sm:$0xff] }
 0x12f   : > { %v813_v56 = vld [vmem:[#allocation9 + $0x478] sm:$0xff] }
 0x130   : > { %610 = vmatmul.mubr.f32.gmra.mrb[2].mxu0 %v4811_v45 }
 0x131   : > { %3129 = vmatpush1.bf16.msra.mxu0 %v3128_v42  ;;  %776 = vmatprep.mubr.f32.mxu0 %v703_v3  ;;  %v3168_v42 = vpack.c.bf16 %v673_v60, %v671_v59  ;;  %v680_v3 = vld [vmem:[#allocation9 + $0x3a8] sm:$0xff]  ;;  %v810_v59 = vld [vmem:[#allocation9 + $0x460] sm:$0xff]  ;;  %v812_v60 = vld [vmem:[#allocation9 + $0x470] sm:$0xff] }
 0x132   : > { %3131 = vmatprep.subr.bf16.mxu0 %v3130_v0  ;;  %v3170_v0 = vpack.c.bf16 %v678_v63, %v676_v62  ;;  %v815_v62 = vld [vmem:[#allocation9 + $0x488] sm:$0xff]  ;;  %v817_v63 = vld [vmem:[#allocation9 + $0x498] sm:$0xff] }
 0x135   : > { %3133 = vmatpush1.bf16.msra.mxu0 %v3132_v6  ;;  %v3174_v6 = vpack.c.bf16 %v682_v4, %v680_v3  ;;  %v819_v3 = vld [vmem:[#allocation9 + $0x4a8] sm:$0xff]  ;;  %v821_v4 = vld [vmem:[#allocation9 + $0x4b8] sm:$0xff] }
 0x136   : > { %3135 = vmatprep.subr.bf16.mxu0 %v3134_v46  ;;  %v679_v46 = vld [vmem:[#allocation9 + $0x3a0] sm:$0xff] }
 0x137   : > { %v3176_v9 = vpack.c.bf16 %v681_v7, %v679_v46  ;;  %v818_v46 = vld [vmem:[#allocation9 + $0x4a0] sm:$0xff]  ;;  %v820_v7 = vld [vmem:[#allocation9 + $0x4b0] sm:$0xff] }
 0x139   : > { %3137 = vmatpush1.bf16.msra.mxu0 %v3136_v10  ;;  %v3178_v10 = vpack.c.bf16 %v686_v8, %v684_v47  ;;  %v823_v47 = vld [vmem:[#allocation9 + $0x4c8] sm:$0xff]  ;;  %v825_v8 = vld [vmem:[#allocation9 + $0x4d8] sm:$0xff] }
 0x13a   : > { %3139 = vmatprep.subr.bf16.mxu0 %v3138_v11  ;;  %v683_v11 = vld [vmem:[#allocation9 + $0x3c0] sm:$0xff] }
 0x13b   : > { %v3180_v15 = vpack.c.bf16 %v685_v12, %v683_v11  ;;  %v822_v11 = vld [vmem:[#allocation9 + $0x4c0] sm:$0xff]  ;;  %v824_v12 = vld [vmem:[#allocation9 + $0x4d0] sm:$0xff] }
 0x13d   : > { %3141 = vmatpush1.bf16.msra.mxu0 %v3140_v16  ;;  %v3182_v16 = vpack.c.bf16 %v690_v14, %v688_v13  ;;  %v827_v13 = vld [vmem:[#allocation9 + $0x4e8] sm:$0xff]  ;;  %v829_v14 = vld [vmem:[#allocation9 + $0x4f8] sm:$0xff] }
 0x13e   : > { %3143 = vmatprep.subr.bf16.mxu0 %v3142_v17  ;;  %v687_v17 = vld [vmem:[#allocation9 + $0x3e0] sm:$0xff] }
 0x141   : > { %3145 = vmatpush1.bf16.msra.mxu0 %v3144_v22  ;;  %v625_v22 = vld [vmem:[#allocation2 + $0x28] sm:$0x1] }
 0x142   : > { %3147 = vmatprep.subr.bf16.mxu0 %v3146_v23  ;;  %v3184_v23 = vpack.c.bf16 %v689_v18, %v687_v17  ;;  %v826_v17 = vld [vmem:[#allocation9 + $0x4e0] sm:$0xff]  ;;  %v828_v18 = vld [vmem:[#allocation9 + $0x4f0] sm:$0xff] }
 0x143   : > { %v3216_v21 = vpack.c.bf16 %v828_v18, %v826_v17  ;;  %v795_v17 = vld [vmem:[#allocation2 + $0x20] sm:$0x3]  ;;  %v972_v18 = vld [vmem:[#allocation9 + $0x628] sm:$0xff] }
 0x145   : > { %3149 = vmatpush1.bf16.msra.mxu0 %v3148_v28  ;;  %v800_v28 = vld [vmem:[#allocation9 + $0x410] sm:$0xff] }
 0x146   : > { %3151 = vmatprep.subr.bf16.mxu0 %v3150_v29  ;;  %v706_v29 = vrot.slane %v625_v22, 1  ;;  %v3218_v22 = vpack.c.bf16 %v833_v20, %v831_v19  ;;  %v974_v19 = vld [vmem:[#allocation9 + $0x638] sm:$0xff] }
 0x147   : > { %v963_v20 = vld [vmem:[#allocation2 + $0x8] sm:$0xf8] }
 0x149   : > { %3153 = vmatpush1.bf16.msra.mxu0 %v3152_v34  ;;  %v700_v34 = vsel %vm697_vm1, %v698_v24, %v699_v25  ;;  %v832_v24 = vld [vmem:[#allocation9 + $0x510] sm:$0xff] }
 0x14a   : > { %3155 = vmatprep.subr.bf16.mxu0 %v3154_v35  ;;  %v3188_v35 = vpack.c.bf16 %v800_v28, %v798_v27 }
 0x14d   : > { %3157 = vmatpush1.bf16.msra.mxu0 %v3156_v40  ;;  %v707_v40 = vsel %vm697_vm1, %v702_v61, %v706_v29  ;;  %v834_v29 = vld [vmem:[#allocation9 + $0x520] sm:$0xff] }
 0x14e   : > { %3159 = vmatprep.subr.bf16.mxu0 %v3158_v41  ;;  %v870_v41 = vrot.slane %v794_v33, 2  ;;  %v3224_v33 = vpack.c.bf16 %v836_v30, %v834_v29  ;;  %v1040_v29 = vrot.slane %v4804_v53, 3  ;;  %v976_v30 = vld [vmem:[#allocation9 + $0x648] sm:$0xff] }
 0x150   : > { %v872_v61 = vsel %vm866_vm2, %v870_v41, %v871_v43  ;;  %v842_v41 = vld [vmem:[#allocation9 + $0x560] sm:$0xff] }
 0x151   : > { %3161 = vmatpush1.bf16.msra.mxu0 %v3160_v50  ;;  %v705_v50 = vsel %vm697_vm1, %v699_v25, %v704_v36  ;;  %v835_v25 = vld [vmem:[#allocation9 + $0x528] sm:$0xff]  ;;  %v840_v36 = vld [vmem:[#allocation9 + $0x550] sm:$0xff] }
 0x152   : > { %3163 = vmatprep.subr.bf16.mxu0 %v3162_v51  ;;  %v3194_v51 = vpack.c.bf16 %v809_v48, %v807_v44  ;;  %v844_v44 = vld [vmem:[#allocation9 + $0x570] sm:$0xff]  ;;  %v847_v48 = vld [vmem:[#allocation9 + $0x588] sm:$0xff] }
 0x155   : > { %3165 = vmatpush1.bf16.msra.mxu0 %v3164_v57  ;;  %v3196_v57 = vpack.c.bf16 %v808_v54, %v806_v52  ;;  %v846_v52 = vld [vmem:[#allocation9 + $0x580] sm:$0xff]  ;;  %v848_v54 = vld [vmem:[#allocation9 + $0x590] sm:$0xff] }
 0x156   : > { %3167 = vmatprep.subr.bf16.mxu0 %v3166_v58  ;;  %v3198_v58 = vpack.c.bf16 %v813_v56, %v811_v55  ;;  %v853_v55 = vld [vmem:[#allocation9 + $0x5b8] sm:$0xff]  ;;  %v3236_v56 = vpack.c.bf16 %v848_v54, %v846_v52  ;;  %v983_v52 = vld [vmem:[#allocation9 + $0x680] sm:$0xff]  ;;  %v985_v54 = vld [vmem:[#allocation9 + $0x690] sm:$0xff] }
 0x159   : > { %3169 = vmatpush1.bf16.msra.mxu0 %v3168_v42  ;;  %v3200_v42 = vpack.c.bf16 %v812_v60, %v810_v59  ;;  %v852_v59 = vld [vmem:[#allocation9 + $0x5b0] sm:$0xff]  ;;  %v855_v60 = vld [vmem:[#allocation9 + $0x5c8] sm:$0xff] }
 0x15a   : > { %3171 = vmatprep.subr.bf16.mxu0 %v3170_v0  ;;  %v3202_v0 = vpack.c.bf16 %v817_v63, %v815_v62  ;;  %v857_v62 = vld [vmem:[#allocation9 + $0x5d8] sm:$0xff] }
 0x15d   : > { %3173 = vmatpush1.bf16.msra.mxu0 %v3172_v5  ;;  %v3204_v5 = vpack.c.bf16 %v816_v2, %v814_v1  ;;  %v856_v1 = vld [vmem:[#allocation9 + $0x5d0] sm:$0xff]  ;;  %v859_v2 = vld [vmem:[#allocation9 + $0x5e8] sm:$0xff] }
 0x15e   : > { %3175 = vmatprep.subr.bf16.mxu0 %v3174_v6  ;;  %v3206_v6 = vpack.c.bf16 %v821_v4, %v819_v3  ;;  %v861_v3 = vld [vmem:[#allocation9 + $0x5f8] sm:$0xff] }
 0x161   : > { %3177 = vmatpush1.bf16.msra.mxu0 %v3176_v9  ;;  %v3208_v9 = vpack.c.bf16 %v820_v7, %v818_v46  ;;  %v860_v46 = vld [vmem:[#allocation9 + $0x5f0] sm:$0xff] }
 0x162   : > { %3179 = vmatprep.subr.bf16.mxu0 %v3178_v10  ;;  %v3210_v10 = vpack.c.bf16 %v825_v8, %v823_v47  ;;  %v793_v7 = vld [vmem:[#allocation2] sm:$0xfc]  ;;  %v968_v47 = vld [vmem:[#allocation9 + $0x608] sm:$0xff]  ;;  %v970_v8 = vld [vmem:[#allocation9 + $0x618] sm:$0xff] }
 0x165   : > { %3181 = vmatpush1.bf16.msra.mxu0 %v3180_v15  ;;  %v3212_v15 = vpack.c.bf16 %v824_v12, %v822_v11  ;;  %v867_v11 = vrot.slane %v793_v7, 2  ;;  %v868_v12 = vrot.slane %v4811_v45, 2  ;;  %v1000_v7 = vld [vmem:[#allocation9 + $0x708] sm:$0xff] }
 0x166   : > { %3183 = vmatprep.subr.bf16.mxu0 %v3182_v16  ;;  %v3214_v16 = vpack.c.bf16 %v829_v14, %v827_v13  ;;  %v3250_v13 = vpack.c.bf16 %v970_v8, %v968_v47  ;;  %v967_v14 = vld [vmem:[#allocation9 + $0x600] sm:$0xff]  ;;  %v1002_v47 = vld [vmem:[#allocation9 + $0x718] sm:$0xff] }
 0x169   : > { %3185 = vmatpush1.bf16.msra.mxu0 %v3184_v23  ;;  %v830_v23 = vld [vmem:[#allocation9 + $0x500] sm:$0xff] }
 0x16a   : > { %3187 = vmatprep.subr.bf16.mxu0 %v3186_v26  ;;  %v837_v26 = vld [vmem:[#allocation9 + $0x538] sm:$0xff]  ;;  %v3220_v27 = vpack.c.bf16 %v832_v24, %v830_v23  ;;  %v873_v23 = vrot.slane %v795_v17, 2  ;;  %v3254_v24 = vpack.c.bf16 %v974_v19, %v972_v18  ;;  %v1005_v17 = vld [vmem:[#allocation9 + $0x730] sm:$0xff]  ;;  %v1008_v18 = vld [vmem:[#allocation9 + $0x748] sm:$0xff] }
 0x16b   : > { %v3222_v28 = vpack.c.bf16 %v837_v26, %v835_v25  ;;  %v971_v25 = vld [vmem:[#allocation9 + $0x620] sm:$0xff]  ;;  %v973_v26 = vld [vmem:[#allocation9 + $0x630] sm:$0xff]  ;;  %v1010_v19 = vld [vmem:[#allocation9 + $0x758] sm:$0xff] }
 0x16c   : > { %777 = vmatmul.mubr.f32.vlgmr.msra.gmra.mrb[0].mxu0 %v700_v34  ;;  %v3226_v34 = vpack.c.bf16 %v841_v32, %v839_v31  ;;  %v978_v31 = vld [vmem:[#allocation9 + $0x658] sm:$0xff]  ;;  %v3256_v32 = vpack.c.bf16 %v973_v26, %v971_v25 }
 0x16d   : > { %3189 = vmatpush1.bf16.msra.mxu0 %v3188_v35  ;;  %782 = vmatprep.mubr.f32.mxu0 %v707_v40  ;;  %v838_v35 = vld [vmem:[#allocation9 + $0x540] sm:$0xff]  ;;  %v1014_v25 = vld [vmem:[#allocation9 + $0x778] sm:$0xff] }
 0x16e   : > { %3191 = vmatprep.subr.bf16.mxu0 %v3190_v37  ;;  %v843_v37 = vld [vmem:[#allocation9 + $0x568] sm:$0xff]  ;;  %v3228_v39 = vpack.c.bf16 %v840_v36, %v838_v35  ;;  %v975_v35 = vld [vmem:[#allocation9 + $0x640] sm:$0xff]  ;;  %v977_v36 = vld [vmem:[#allocation9 + $0x650] sm:$0xff] }
 0x16f   : > { %v3230_v40 = vpack.c.bf16 %v845_v38, %v843_v37  ;;  %v980_v37 = vld [vmem:[#allocation9 + $0x668] sm:$0xff]  ;;  %v982_v38 = vld [vmem:[#allocation9 + $0x678] sm:$0xff] }
 0x170   : > { %783 = vmatmul.mubr.f32.gmra.mrb[2].mxu0 %v705_v50  ;;  %v3232_v50 = vpack.c.bf16 %v844_v44, %v842_v41  ;;  %v979_v41 = vld [vmem:[#allocation9 + $0x660] sm:$0xff]  ;;  %v981_v44 = vld [vmem:[#allocation9 + $0x670] sm:$0xff] }
 0x171   : > { %3193 = vmatpush1.bf16.msra.mxu0 %v3192_v49  ;;  %945 = vmatprep.mubr.f32.mxu0 %v872_v61  ;;  %v849_v49 = vld [vmem:[#allocation9 + $0x598] sm:$0xff]  ;;  %v851_v61 = vld [vmem:[#allocation9 + $0x5a8] sm:$0xff] }
 0x172   : > { %3195 = vmatprep.subr.bf16.mxu0 %v3194_v51  ;;  %v3234_v51 = vpack.c.bf16 %v849_v49, %v847_v48  ;;  %v984_v48 = vld [vmem:[#allocation9 + $0x688] sm:$0xff]  ;;  %v986_v49 = vld [vmem:[#allocation9 + $0x698] sm:$0xff] }
 0x175   : > { %3197 = vmatpush1.bf16.msra.mxu0 %v3196_v57  ;;  %v3238_v57 = vpack.c.bf16 %v853_v55, %v851_v61  ;;  %v988_v61 = vld [vmem:[#allocation9 + $0x6a8] sm:$0xff]  ;;  %v990_v55 = vld [vmem:[#allocation9 + $0x6b8] sm:$0xff] }
 0x176   : > { %3199 = vmatprep.subr.bf16.mxu0 %v3198_v58  ;;  %v850_v58 = vld [vmem:[#allocation9 + $0x5a0] sm:$0xff] }
 0x177   : > { %v3240_v63 = vpack.c.bf16 %v852_v59, %v850_v58  ;;  %v987_v58 = vld [vmem:[#allocation9 + $0x6a0] sm:$0xff]  ;;  %v989_v59 = vld [vmem:[#allocation9 + $0x6b0] sm:$0xff] }
 0x179   : > { %3201 = vmatpush1.bf16.msra.mxu0 %v3200_v42  ;;  %v3242_v42 = vpack.c.bf16 %v857_v62, %v855_v60  ;;  %v992_v60 = vld [vmem:[#allocation9 + $0x6c8] sm:$0xff]  ;;  %v994_v62 = vld [vmem:[#allocation9 + $0x6d8] sm:$0xff] }
 0x17a   : > { %3203 = vmatprep.subr.bf16.mxu0 %v3202_v0  ;;  %v854_v0 = vld [vmem:[#allocation9 + $0x5c0] sm:$0xff] }
 0x17b   : > { %v3244_v4 = vpack.c.bf16 %v856_v1, %v854_v0  ;;  %v991_v0 = vld [vmem:[#allocation9 + $0x6c0] sm:$0xff]  ;;  %v993_v1 = vld [vmem:[#allocation9 + $0x6d0] sm:$0xff] }
 0x17d   : > { %3205 = vmatpush1.bf16.msra.mxu0 %v3204_v5  ;;  %v3246_v5 = vpack.c.bf16 %v861_v3, %v859_v2  ;;  %v996_v2 = vld [vmem:[#allocation9 + $0x6e8] sm:$0xff]  ;;  %v998_v3 = vld [vmem:[#allocation9 + $0x6f8] sm:$0xff] }
 0x17e   : > { %3207 = vmatprep.subr.bf16.mxu0 %v3206_v6  ;;  %v858_v6 = vld [vmem:[#allocation9 + $0x5e0] sm:$0xff] }
 0x181   : > { %3209 = vmatpush1.bf16.msra.mxu0 %v3208_v9  ;;  %v796_v9 = vld [vmem:[#allocation2 + $0x28] sm:$0x3] }
 0x182   : > { %3211 = vmatprep.subr.bf16.mxu0 %v3210_v10  ;;  %v3248_v10 = vpack.c.bf16 %v860_v46, %v858_v6  ;;  %v995_v6 = vld [vmem:[#allocation9 + $0x6e0] sm:$0xff]  ;;  %v997_v46 = vld [vmem:[#allocation9 + $0x6f0] sm:$0xff] }
 0x183   : > { %v3280_v8 = vpack.c.bf16 %v997_v46, %v995_v6  ;;  %v964_v6 = vld [vmem:[#allocation2 + $0x20] sm:$0x7]  ;;  %v1141_v46 = vld [vmem:[#allocation9 + $0x828] sm:$0xff] }
 0x185   : > { %3213 = vmatpush1.bf16.msra.mxu0 %v3212_v15  ;;  %v969_v15 = vld [vmem:[#allocation9 + $0x610] sm:$0xff] }
 0x186   : > { %3215 = vmatprep.subr.bf16.mxu0 %v3214_v16  ;;  %v875_v16 = vrot.slane %v796_v9, 2  ;;  %v3282_v9 = vpack.c.bf16 %v1002_v47, %v1000_v7  ;;  %v1143_v7 = vld [vmem:[#allocation9 + $0x838] sm:$0xff] }
 0x187   : > { %v1132_v47 = vld [vmem:[#allocation2 + $0x8] sm:$0xf0] }
 0x189   : > { %3217 = vmatpush1.bf16.msra.mxu0 %v3216_v21  ;;  %v869_v21 = vsel %vm866_vm2, %v867_v11, %v868_v12  ;;  %v1001_v11 = vld [vmem:[#allocation9 + $0x710] sm:$0xff] }
 0x18a   : > { %3219 = vmatprep.subr.bf16.mxu0 %v3218_v22  ;;  %v3252_v22 = vpack.c.bf16 %v969_v15, %v967_v14 }
 0x18d   : > { %3221 = vmatpush1.bf16.msra.mxu0 %v3220_v27  ;;  %v876_v27 = vsel %vm866_vm2, %v871_v43, %v875_v16  ;;  %v1003_v16 = vld [vmem:[#allocation9 + $0x720] sm:$0xff] }
 0x18e   : > { %3223 = vmatprep.subr.bf16.mxu0 %v3222_v28  ;;  %v1039_v28 = vrot.slane %v963_v20, 3  ;;  %v3288_v20 = vpack.c.bf16 %v1005_v17, %v1003_v16  ;;  %v1209_v16 = vrot.slane %v4804_v53, 4  ;;  %v1145_v17 = vld [vmem:[#allocation9 + $0x848] sm:$0xff] }
 0x190   : > { %v1041_v43 = vsel %vm1035_vm3, %v1039_v28, %v1040_v29  ;;  %v1011_v28 = vld [vmem:[#allocation9 + $0x760] sm:$0xff] }
 0x191   : > { %3225 = vmatpush1.bf16.msra.mxu0 %v3224_v33  ;;  %v874_v33 = vsel %vm866_vm2, %v868_v12, %v873_v23  ;;  %v1004_v12 = vld [vmem:[#allocation9 + $0x728] sm:$0xff]  ;;  %v1009_v23 = vld [vmem:[#allocation9 + $0x750] sm:$0xff] }
 0x192   : > { %3227 = vmatprep.subr.bf16.mxu0 %v3226_v34  ;;  %v3258_v34 = vpack.c.bf16 %v978_v31, %v976_v30  ;;  %v1013_v30 = vld [vmem:[#allocation9 + $0x770] sm:$0xff]  ;;  %v1016_v31 = vld [vmem:[#allocation9 + $0x788] sm:$0xff] }
 0x195   : > { %3229 = vmatpush1.bf16.msra.mxu0 %v3228_v39  ;;  %v3260_v39 = vpack.c.bf16 %v977_v36, %v975_v35  ;;  %v1015_v35 = vld [vmem:[#allocation9 + $0x780] sm:$0xff]  ;;  %v1017_v36 = vld [vmem:[#allocation9 + $0x790] sm:$0xff] }
 0x196   : > { %3231 = vmatprep.subr.bf16.mxu0 %v3230_v40  ;;  %v3262_v40 = vpack.c.bf16 %v982_v38, %v980_v37  ;;  %v1022_v37 = vld [vmem:[#allocation9 + $0x7b8] sm:$0xff]  ;;  %v3300_v38 = vpack.c.bf16 %v1017_v36, %v1015_v35  ;;  %v1152_v35 = vld [vmem:[#allocation9 + $0x880] sm:$0xff]  ;;  %v1154_v36 = vld [vmem:[#allocation9 + $0x890] sm:$0xff] }
 0x199   : > { %3233 = vmatpush1.bf16.msra.mxu0 %v3232_v50  ;;  %v3264_v50 = vpack.c.bf16 %v981_v44, %v979_v41  ;;  %v1021_v41 = vld [vmem:[#allocation9 + $0x7b0] sm:$0xff]  ;;  %v1024_v44 = vld [vmem:[#allocation9 + $0x7c8] sm:$0xff] }
 0x19a   : > { %3235 = vmatprep.subr.bf16.mxu0 %v3234_v51  ;;  %v3266_v51 = vpack.c.bf16 %v986_v49, %v984_v48  ;;  %v1026_v48 = vld [vmem:[#allocation9 + $0x7d8] sm:$0xff] }
 0x19d   : > { %3237 = vmatpush1.bf16.msra.mxu0 %v3236_v56  ;;  %v3268_v56 = vpack.c.bf16 %v985_v54, %v983_v52  ;;  %v1025_v52 = vld [vmem:[#allocation9 + $0x7d0] sm:$0xff]  ;;  %v1028_v54 = vld [vmem:[#allocation9 + $0x7e8] sm:$0xff] }
 0x19e   : > { %3239 = vmatprep.subr.bf16.mxu0 %v3238_v57  ;;  %v3270_v57 = vpack.c.bf16 %v990_v55, %v988_v61  ;;  %v1030_v61 = vld [vmem:[#allocation9 + $0x7f8] sm:$0xff] }
 0x1a1   : > { %3241 = vmatpush1.bf16.msra.mxu0 %v3240_v63  ;;  %v3272_v63 = vpack.c.bf16 %v989_v59, %v987_v58  ;;  %v1029_v58 = vld [vmem:[#allocation9 + $0x7f0] sm:$0xff] }
 0x1a2   : > { %3243 = vmatprep.subr.bf16.mxu0 %v3242_v42  ;;  %v3274_v42 = vpack.c.bf16 %v994_v62, %v992_v60  ;;  %v962_v59 = vld [vmem:[#allocation2] sm:$0xf8]  ;;  %v1137_v60 = vld [vmem:[#allocation9 + $0x808] sm:$0xff]  ;;  %v1139_v62 = vld [vmem:[#allocation9 + $0x818] sm:$0xff] }
 0x1a5   : > { %3245 = vmatpush1.bf16.msra.mxu0 %v3244_v4  ;;  %v3276_v4 = vpack.c.bf16 %v993_v1, %v991_v0  ;;  %v1036_v0 = vrot.slane %v962_v59, 3  ;;  %v1037_v1 = vrot.slane %v4811_v45, 3  ;;  %v1169_v59 = vld [vmem:[#allocation9 + $0x908] sm:$0xff] }
 0x1a6   : > { %3247 = vmatprep.subr.bf16.mxu0 %v3246_v5  ;;  %v3278_v5 = vpack.c.bf16 %v998_v3, %v996_v2  ;;  %v3314_v2 = vpack.c.bf16 %v1139_v62, %v1137_v60  ;;  %v1136_v3 = vld [vmem:[#allocation9 + $0x800] sm:$0xff]  ;;  %v1171_v60 = vld [vmem:[#allocation9 + $0x918] sm:$0xff] }
 0x1a9   : > { %3249 = vmatpush1.bf16.msra.mxu0 %v3248_v10  ;;  %v999_v10 = vld [vmem:[#allocation9 + $0x700] sm:$0xff] }
 0x1aa   : > { %3251 = vmatprep.subr.bf16.mxu0 %v3250_v13  ;;  %v1006_v13 = vld [vmem:[#allocation9 + $0x738] sm:$0xff]  ;;  %v3284_v14 = vpack.c.bf16 %v1001_v11, %v999_v10  ;;  %v1042_v10 = vrot.slane %v964_v6, 3  ;;  %v3318_v11 = vpack.c.bf16 %v1143_v7, %v1141_v46  ;;  %v1174_v6 = vld [vmem:[#allocation9 + $0x930] sm:$0xff]  ;;  %v1177_v46 = vld [vmem:[#allocation9 + $0x948] sm:$0xff] }
 0x1ab   : > { %v3286_v15 = vpack.c.bf16 %v1006_v13, %v1004_v12  ;;  %v1140_v12 = vld [vmem:[#allocation9 + $0x820] sm:$0xff]  ;;  %v1142_v13 = vld [vmem:[#allocation9 + $0x830] sm:$0xff]  ;;  %v1179_v7 = vld [vmem:[#allocation9 + $0x958] sm:$0xff] }
 0x1ac   : > { %946 = vmatmul.mubr.f32.vlgmr.msra.gmra.mrb[0].mxu0 %v869_v21  ;;  %v3290_v21 = vpack.c.bf16 %v1010_v19, %v1008_v18  ;;  %v1147_v18 = vld [vmem:[#allocation9 + $0x858] sm:$0xff]  ;;  %v3320_v19 = vpack.c.bf16 %v1142_v13, %v1140_v12 }
 0x1ad   : > { %3253 = vmatpush1.bf16.msra.mxu0 %v3252_v22  ;;  %951 = vmatprep.mubr.f32.mxu0 %v876_v27  ;;  %v1007_v22 = vld [vmem:[#allocation9 + $0x740] sm:$0xff]  ;;  %v1183_v12 = vld [vmem:[#allocation9 + $0x978] sm:$0xff] }
 0x1ae   : > { %3255 = vmatprep.subr.bf16.mxu0 %v3254_v24  ;;  %v1012_v24 = vld [vmem:[#allocation9 + $0x768] sm:$0xff]  ;;  %v3292_v26 = vpack.c.bf16 %v1009_v23, %v1007_v22  ;;  %v1144_v22 = vld [vmem:[#allocation9 + $0x840] sm:$0xff]  ;;  %v1146_v23 = vld [vmem:[#allocation9 + $0x850] sm:$0xff] }
 0x1af   : > { %v3294_v27 = vpack.c.bf16 %v1014_v25, %v1012_v24  ;;  %v1149_v24 = vld [vmem:[#allocation9 + $0x868] sm:$0xff]  ;;  %v1151_v25 = vld [vmem:[#allocation9 + $0x878] sm:$0xff] }
 0x1b0   : > { %952 = vmatmul.mubr.f32.gmra.mrb[2].mxu0 %v874_v33  ;;  %v3296_v33 = vpack.c.bf16 %v1013_v30, %v1011_v28  ;;  %v1148_v28 = vld [vmem:[#allocation9 + $0x860] sm:$0xff]  ;;  %v1150_v30 = vld [vmem:[#allocation9 + $0x870] sm:$0xff] }
 0x1b1   : > { %3257 = vmatpush1.bf16.msra.mxu0 %v3256_v32  ;;  %1114 = vmatprep.mubr.f32.mxu0 %v1041_v43  ;;  %v1018_v32 = vld [vmem:[#allocation9 + $0x798] sm:$0xff]  ;;  %v1020_v43 = vld [vmem:[#allocation9 + $0x7a8] sm:$0xff] }
 0x1b2   : > { %3259 = vmatprep.subr.bf16.mxu0 %v3258_v34  ;;  %v3298_v34 = vpack.c.bf16 %v1018_v32, %v1016_v31  ;;  %v1153_v31 = vld [vmem:[#allocation9 + $0x888] sm:$0xff]  ;;  %v1155_v32 = vld [vmem:[#allocation9 + $0x898] sm:$0xff] }
 0x1b5   : > { %3261 = vmatpush1.bf16.msra.mxu0 %v3260_v39  ;;  %v3302_v39 = vpack.c.bf16 %v1022_v37, %v1020_v43  ;;  %v1157_v43 = vld [vmem:[#allocation9 + $0x8a8] sm:$0xff]  ;;  %v1159_v37 = vld [vmem:[#allocation9 + $0x8b8] sm:$0xff] }
 0x1b6   : > { %3263 = vmatprep.subr.bf16.mxu0 %v3262_v40  ;;  %v1019_v40 = vld [vmem:[#allocation9 + $0x7a0] sm:$0xff] }
 0x1b7   : > { %v3304_v49 = vpack.c.bf16 %v1021_v41, %v1019_v40  ;;  %v1156_v40 = vld [vmem:[#allocation9 + $0x8a0] sm:$0xff]  ;;  %v1158_v41 = vld [vmem:[#allocation9 + $0x8b0] sm:$0xff] }
 0x1b9   : > { %3265 = vmatpush1.bf16.msra.mxu0 %v3264_v50  ;;  %v3306_v50 = vpack.c.bf16 %v1026_v48, %v1024_v44  ;;  %v1161_v44 = vld [vmem:[#allocation9 + $0x8c8] sm:$0xff]  ;;  %v1163_v48 = vld [vmem:[#allocation9 + $0x8d8] sm:$0xff] }
 0x1ba   : > { %3267 = vmatprep.subr.bf16.mxu0 %v3266_v51  ;;  %v1023_v51 = vld [vmem:[#allocation9 + $0x7c0] sm:$0xff] }
 0x1bb   : > { %v3308_v55 = vpack.c.bf16 %v1025_v52, %v1023_v51  ;;  %v1160_v51 = vld [vmem:[#allocation9 + $0x8c0] sm:$0xff]  ;;  %v1162_v52 = vld [vmem:[#allocation9 + $0x8d0] sm:$0xff] }
 0x1bd   : > { %3269 = vmatpush1.bf16.msra.mxu0 %v3268_v56  ;;  %v3310_v56 = vpack.c.bf16 %v1030_v61, %v1028_v54  ;;  %v1165_v54 = vld [vmem:[#allocation9 + $0x8e8] sm:$0xff]  ;;  %v1167_v61 = vld [vmem:[#allocation9 + $0x8f8] sm:$0xff] }
 0x1be   : > { %3271 = vmatprep.subr.bf16.mxu0 %v3270_v57  ;;  %v1027_v57 = vld [vmem:[#allocation9 + $0x7e0] sm:$0xff] }
 0x1c1   : > { %3273 = vmatpush1.bf16.msra.mxu0 %v3272_v63  ;;  %v965_v63 = vld [vmem:[#allocation2 + $0x28] sm:$0x7] }
 0x1c2   : > { %3275 = vmatprep.subr.bf16.mxu0 %v3274_v42  ;;  %v3312_v42 = vpack.c.bf16 %v1029_v58, %v1027_v57  ;;  %v1164_v57 = vld [vmem:[#allocation9 + $0x8e0] sm:$0xff]  ;;  %v1166_v58 = vld [vmem:[#allocation9 + $0x8f0] sm:$0xff] }
 0x1c3   : > { %v3344_v62 = vpack.c.bf16 %v1166_v58, %v1164_v57  ;;  %v1133_v57 = vld [vmem:[#allocation2 + $0x20] sm:$0xf]  ;;  %v1310_v58 = vld [vmem:[#allocation9 + $0xa28] sm:$0xff] }
 0x1c5   : > { %3277 = vmatpush1.bf16.msra.mxu0 %v3276_v4  ;;  %v1138_v4 = vld [vmem:[#allocation9 + $0x810] sm:$0xff] }
 0x1c6   : > { %3279 = vmatprep.subr.bf16.mxu0 %v3278_v5  ;;  %v1044_v5 = vrot.slane %v965_v63, 3  ;;  %v3346_v63 = vpack.c.bf16 %v1171_v60, %v1169_v59  ;;  %v1312_v59 = vld [vmem:[#allocation9 + $0xa38] sm:$0xff] }
 0x1c7   : > { %v1301_v60 = vld [vmem:[#allocation2 + $0x8] sm:$0xe0] }
 0x1c9   : > { %3281 = vmatpush1.bf16.msra.mxu0 %v3280_v8  ;;  %v1038_v8 = vsel %vm1035_vm3, %v1036_v0, %v1037_v1  ;;  %v1170_v0 = vld [vmem:[#allocation9 + $0x910] sm:$0xff] }
 0x1ca   : > { %3283 = vmatprep.subr.bf16.mxu0 %v3282_v9  ;;  %v3316_v9 = vpack.c.bf16 %v1138_v4, %v1136_v3 }
 0x1cd   : > { %3285 = vmatpush1.bf16.msra.mxu0 %v3284_v14  ;;  %v1045_v14 = vsel %vm1035_vm3, %v1040_v29, %v1044_v5  ;;  %v1172_v5 = vld [vmem:[#allocation9 + $0x920] sm:$0xff] }
 0x1ce   : > { %3287 = vmatprep.subr.bf16.mxu0 %v3286_v15  ;;  %v1208_v15 = vrot.slane %v1132_v47, 4  ;;  %v3352_v47 = vpack.c.bf16 %v1174_v6, %v1172_v5  ;;  %v1377_v5 = vrot.slane %v4804_v53, 5  ;;  %v1314_v6 = vld [vmem:[#allocation9 + $0xa48] sm:$0xff] }
 0x1d0   : > { %v1210_v29 = vsel %vm1204_vm4, %v1208_v15, %v1209_v16  ;;  %v1180_v15 = vld [vmem:[#allocation9 + $0x960] sm:$0xff] }
 0x1d1   : > { %3289 = vmatpush1.bf16.msra.mxu0 %v3288_v20  ;;  %v1043_v20 = vsel %vm1035_vm3, %v1037_v1, %v1042_v10  ;;  %v1173_v1 = vld [vmem:[#allocation9 + $0x928] sm:$0xff]  ;;  %v1178_v10 = vld [vmem:[#allocation9 + $0x950] sm:$0xff] }
 0x1d2   : > { %3291 = vmatprep.subr.bf16.mxu0 %v3290_v21  ;;  %v3322_v21 = vpack.c.bf16 %v1147_v18, %v1145_v17  ;;  %v1182_v17 = vld [vmem:[#allocation9 + $0x970] sm:$0xff]  ;;  %v1185_v18 = vld [vmem:[#allocation9 + $0x988] sm:$0xff] }
 0x1d5   : > { %3293 = vmatpush1.bf16.msra.mxu0 %v3292_v26  ;;  %v3324_v26 = vpack.c.bf16 %v1146_v23, %v1144_v22  ;;  %v1184_v22 = vld [vmem:[#allocation9 + $0x980] sm:$0xff]  ;;  %v1186_v23 = vld [vmem:[#allocation9 + $0x990] sm:$0xff] }
 0x1d6   : > { %3295 = vmatprep.subr.bf16.mxu0 %v3294_v27  ;;  %v3326_v27 = vpack.c.bf16 %v1151_v25, %v1149_v24  ;;  %v1191_v24 = vld [vmem:[#allocation9 + $0x9b8] sm:$0xff]  ;;  %v3364_v25 = vpack.c.bf16 %v1186_v23, %v1184_v22  ;;  %v1692_v22 = vld [vmem:[#allocation12 + $0x28] sm:$0xff] }
 0x1d7   : > { %v1694_v23 = vld [vmem:[#allocation12 + $0x38] sm:$0xff] }
 0x1d9   : > { %3297 = vmatpush1.bf16.msra.mxu0 %v3296_v33  ;;  %v3328_v33 = vpack.c.bf16 %v1150_v30, %v1148_v28  ;;  %v1190_v28 = vld [vmem:[#allocation9 + $0x9b0] sm:$0xff]  ;;  %v1193_v30 = vld [vmem:[#allocation9 + $0x9c8] sm:$0xff] }
 0x1da   : > { %3299 = vmatprep.subr.bf16.mxu0 %v3298_v34  ;;  %v3330_v34 = vpack.c.bf16 %v1155_v32, %v1153_v31  ;;  %v1195_v31 = vld [vmem:[#allocation9 + $0x9d8] sm:$0xff] }
 0x1dd   : > { %3301 = vmatpush1.bf16.msra.mxu0 %v3300_v38  ;;  %v3332_v38 = vpack.c.bf16 %v1154_v36, %v1152_v35  ;;  %v1194_v35 = vld [vmem:[#allocation9 + $0x9d0] sm:$0xff]  ;;  %v1197_v36 = vld [vmem:[#allocation9 + $0x9e8] sm:$0xff] }
 0x1de   : > { %3303 = vmatprep.subr.bf16.mxu0 %v3302_v39  ;;  %v3334_v39 = vpack.c.bf16 %v1159_v37, %v1157_v43  ;;  %v1199_v43 = vld [vmem:[#allocation9 + $0x9f8] sm:$0xff] }
 0x1e1   : > { %3305 = vmatpush1.bf16.msra.mxu0 %v3304_v49  ;;  %v3336_v49 = vpack.c.bf16 %v1158_v41, %v1156_v40  ;;  %v1198_v40 = vld [vmem:[#allocation9 + $0x9f0] sm:$0xff] }
 0x1e2   : > { %3307 = vmatprep.subr.bf16.mxu0 %v3306_v50  ;;  %v3338_v50 = vpack.c.bf16 %v1163_v48, %v1161_v44  ;;  %v1131_v41 = vld [vmem:[#allocation2] sm:$0xf0]  ;;  %v1306_v44 = vld [vmem:[#allocation9 + $0xa08] sm:$0xff]  ;;  %v1308_v48 = vld [vmem:[#allocation9 + $0xa18] sm:$0xff] }
 0x1e5   : > { %3309 = vmatpush1.bf16.msra.mxu0 %v3308_v55  ;;  %v3340_v55 = vpack.c.bf16 %v1162_v52, %v1160_v51  ;;  %v1205_v51 = vrot.slane %v1131_v41, 4  ;;  %v1206_v52 = vrot.slane %v4811_v45, 4  ;;  %v1702_v41 = vld [vmem:[#allocation12 + $0x78] sm:$0xff] }
 0x1e6   : > { %3311 = vmatprep.subr.bf16.mxu0 %v3310_v56  ;;  %v3342_v56 = vpack.c.bf16 %v1167_v61, %v1165_v54  ;;  %v3378_v54 = vpack.c.bf16 %v1308_v48, %v1306_v44  ;;  %v1305_v61 = vld [vmem:[#allocation9 + $0xa00] sm:$0xff]  ;;  %v1326_v44 = vld [vmem:[#allocation9 + $0xaa8] sm:$0xff]  ;;  %v1328_v48 = vld [vmem:[#allocation9 + $0xab8] sm:$0xff] }
 0x1e9   : > { %3313 = vmatpush1.bf16.msra.mxu0 %v3312_v42  ;;  %v1168_v42 = vld [vmem:[#allocation9 + $0x900] sm:$0xff] }
 0x1ea   : > { %3315 = vmatprep.subr.bf16.mxu0 %v3314_v2  ;;  %v1175_v2 = vld [vmem:[#allocation9 + $0x938] sm:$0xff]  ;;  %v3348_v3 = vpack.c.bf16 %v1170_v0, %v1168_v42  ;;  %v1211_v42 = vrot.slane %v1133_v57, 4  ;;  %v3382_v0 = vpack.c.bf16 %v1312_v59, %v1310_v58  ;;  %v1704_v57 = vld [vmem:[#allocation12 + $0x88] sm:$0xff] }
 0x1eb   : > { %v3350_v4 = vpack.c.bf16 %v1175_v2, %v1173_v1  ;;  %v1309_v1 = vld [vmem:[#allocation9 + $0xa20] sm:$0xff]  ;;  %v1311_v2 = vld [vmem:[#allocation9 + $0xa30] sm:$0xff]  ;;  %v1330_v59 = vld [vmem:[#allocation9 + $0xac8] sm:$0xff] }
 0x1ec   : > { %1115 = vmatmul.mubr.f32.vlgmr.msra.gmra.mrb[0].mxu0 %v1038_v8  ;;  %v3354_v8 = vpack.c.bf16 %v1179_v7, %v1177_v46  ;;  %v1316_v46 = vld [vmem:[#allocation9 + $0xa58] sm:$0xff]  ;;  %v3384_v7 = vpack.c.bf16 %v1311_v2, %v1309_v1  ;;  %v1703_v1 = vld [vmem:[#allocation12 + $0x80] sm:$0xff] }
 0x1ed   : > { %3317 = vmatpush1.bf16.msra.mxu0 %v3316_v9  ;;  %1120 = vmatprep.mubr.f32.mxu0 %v1045_v14  ;;  %v1176_v9 = vld [vmem:[#allocation9 + $0x940] sm:$0xff]  ;;  %v1705_v2 = vld [vmem:[#allocation12 + $0x90] sm:$0xff] }
 0x1ee   : > { %3319 = vmatprep.subr.bf16.mxu0 %v3318_v11  ;;  %v1181_v11 = vld [vmem:[#allocation9 + $0x968] sm:$0xff]  ;;  %v3356_v13 = vpack.c.bf16 %v1178_v10, %v1176_v9  ;;  %v1313_v9 = vld [vmem:[#allocation9 + $0xa40] sm:$0xff]  ;;  %v1315_v10 = vld [vmem:[#allocation9 + $0xa50] sm:$0xff] }
 0x1ef   : > { %v3358_v14 = vpack.c.bf16 %v1183_v12, %v1181_v11  ;;  %v1320_v12 = vld [vmem:[#allocation9 + $0xa78] sm:$0xff] }
 0x1f0   : > { %1121 = vmatmul.mubr.f32.gmra.mrb[2].mxu0 %v1043_v20  ;;  %v3360_v20 = vpack.c.bf16 %v1182_v17, %v1180_v15  ;;  %v1688_v15 = vld [vmem:[#allocation12 + $0x8] sm:$0xff]  ;;  %v1690_v17 = vld [vmem:[#allocation12 + $0x18] sm:$0xff] }
 0x1f1   : > { %3321 = vmatpush1.bf16.msra.mxu0 %v3320_v19  ;;  %1283 = vmatprep.mubr.f32.mxu0 %v1210_v29  ;;  %v1187_v19 = vld [vmem:[#allocation9 + $0x998] sm:$0xff]  ;;  %v1189_v29 = vld [vmem:[#allocation9 + $0x9a8] sm:$0xff] }
 0x1f2   : > { %3323 = vmatprep.subr.bf16.mxu0 %v3322_v21  ;;  %v3362_v21 = vpack.c.bf16 %v1187_v19, %v1185_v18  ;;  %v1687_v18 = vld [vmem:[#allocation12] sm:$0xff]  ;;  %v3388_v19 = vpack.c.bf16 %v1315_v10, %v1313_v9  ;;  %v1706_v58 = vld [vmem:[#allocation12 + $0x98] sm:$0xff] }
 0x1f3   : > { %v1333_v10 = vld [vmem:[#allocation9 + $0xae0] sm:$0xff] }
 0x1f5   : > { %3325 = vmatpush1.bf16.msra.mxu0 %v3324_v26  ;;  %v3366_v26 = vpack.c.bf16 %v1191_v24, %v1189_v29 }
 0x1f6   : > { %3327 = vmatprep.subr.bf16.mxu0 %v3326_v27  ;;  %v1188_v27 = vld [vmem:[#allocation9 + $0x9a0] sm:$0xff] }
 0x1f7   : > { %v3368_v32 = vpack.c.bf16 %v1190_v28, %v1188_v27  ;;  %v1693_v27 = vld [vmem:[#allocation12 + $0x30] sm:$0xff]  ;;  %v1696_v28 = vld [vmem:[#allocation12 + $0x48] sm:$0xff] }
 0x1f9   : > { %3329 = vmatpush1.bf16.msra.mxu0 %v3328_v33  ;;  %v3370_v33 = vpack.c.bf16 %v1195_v31, %v1193_v30  ;;  %v1322_v30 = vld [vmem:[#allocation9 + $0xa88] sm:$0xff]  ;;  %v1324_v31 = vld [vmem:[#allocation9 + $0xa98] sm:$0xff] }
 0x1fa   : > { %3331 = vmatprep.subr.bf16.mxu0 %v3330_v34  ;;  %v1192_v34 = vld [vmem:[#allocation9 + $0x9c0] sm:$0xff] }
 0x1fb   : > { %v3372_v37 = vpack.c.bf16 %v1194_v35, %v1192_v34  ;;  %v1321_v35 = vld [vmem:[#allocation9 + $0xa80] sm:$0xff] }
 0x1fd   : > { %3333 = vmatpush1.bf16.msra.mxu0 %v3332_v38  ;;  %v3374_v38 = vpack.c.bf16 %v1199_v43, %v1197_v36  ;;  %v1695_v43 = vld [vmem:[#allocation12 + $0x40] sm:$0xff] }
 0x1fe   : > { %3335 = vmatprep.subr.bf16.mxu0 %v3334_v39  ;;  %v1196_v39 = vld [vmem:[#allocation9 + $0x9e0] sm:$0xff] }
 0x201   : > { %3337 = vmatpush1.bf16.msra.mxu0 %v3336_v49  ;;  %v1134_v49 = vld [vmem:[#allocation2 + $0x28] sm:$0xf] }
 0x202   : > { %3339 = vmatprep.subr.bf16.mxu0 %v3338_v50  ;;  %v3376_v50 = vpack.c.bf16 %v1198_v40, %v1196_v39  ;;  %v1323_v39 = vld [vmem:[#allocation9 + $0xa90] sm:$0xff] }
 0x203   : > { %v1700_v40 = vld [vmem:[#allocation12 + $0x68] sm:$0xff] }
 0x205   : > { %3341 = vmatpush1.bf16.msra.mxu0 %v3340_v55  ;;  %v1307_v55 = vld [vmem:[#allocation9 + $0xa10] sm:$0xff] }
 0x206   : > { %3343 = vmatprep.subr.bf16.mxu0 %v3342_v56  ;;  %v1213_v56 = vrot.slane %v1134_v49, 4 }
 0x209   : > { %3345 = vmatpush1.bf16.msra.mxu0 %v3344_v62  ;;  %v1207_v62 = vsel %vm1204_vm4, %v1205_v51, %v1206_v52  ;;  %v1325_v51 = vld [vmem:[#allocation9 + $0xaa0] sm:$0xff] }
 0x20a   : > { %3347 = vmatprep.subr.bf16.mxu0 %v3346_v63  ;;  %v3380_v63 = vpack.c.bf16 %v1307_v55, %v1305_v61  ;;  %v1701_v61 = vld [vmem:[#allocation12 + $0x70] sm:$0xff]  ;;  %v3398_v55 = vpack.c.bf16 %v1328_v48, %v1326_v44 }
 0x20b   : > { %v1348_v44 = vld [vmem:[#allocation9 + $0xb58] sm:$0xff] }
 0x20d   : > { %3349 = vmatpush1.bf16.msra.mxu0 %v3348_v3  ;;  %v1214_v3 = vsel %vm1204_vm4, %v1209_v16, %v1213_v56  ;;  %v1318_v16 = vld [vmem:[#allocation9 + $0xa68] sm:$0xff]  ;;  %v1327_v56 = vld [vmem:[#allocation9 + $0xab0] sm:$0xff] }
 0x20e   : > { %3351 = vmatprep.subr.bf16.mxu0 %v3350_v4  ;;  %v1376_v4 = vrot.slane %v1301_v60, 5  ;;  %v3390_v29 = vpack.c.bf16 %v1320_v12, %v1318_v16  ;;  %v1332_v60 = vld [vmem:[#allocation9 + $0xad8] sm:$0xff]  ;;  %v1707_v16 = vld [vmem:[#allocation12 + $0xa0] sm:$0xff] }
 0x20f   : > { %v1709_v12 = vld [vmem:[#allocation12 + $0xb0] sm:$0xff] }
 0x210   : > { %v1378_v11 = vsel %vm440_vm0, %v1376_v4, %v1377_v5  ;;  %v1331_v4 = vld [vmem:[#allocation9 + $0xad0] sm:$0xff] }
 0x211   : > { %3353 = vmatpush1.bf16.msra.mxu0 %v3352_v47  ;;  %v1212_v47 = vsel %vm1204_vm4, %v1206_v52, %v1211_v42  ;;  %v3518_v52 = vpack.c.bf16 %v1702_v41, %v1700_v40  ;;  %v1329_v42 = vld [vmem:[#allocation9 + $0xac0] sm:$0xff]  ;;  %v1346_v41 = vld [vmem:[#allocation9 + $0xb48] sm:$0xff] }
 0x212   : > { %3355 = vmatprep.subr.bf16.mxu0 %v3354_v8  ;;  %v3386_v8 = vpack.c.bf16 %v1316_v46, %v1314_v6  ;;  %v1708_v6 = vld [vmem:[#allocation12 + $0xa8] sm:$0xff]  ;;  %v1710_v46 = vld [vmem:[#allocation12 + $0xb8] sm:$0xff]  ;;  %v3404_v9 = vpack.c.bf16 %v1331_v4, %v1329_v42 }
 0x213   : > { %v1722_v40 = vld [vmem:[#allocation12 + $0x118] sm:$0xff]  ;;  %v1728_v4 = vld [vmem:[#allocation12 + $0x148] sm:$0xff] }
 0x215   : > { %3357 = vmatpush1.bf16.msra.mxu0 %v3356_v13  ;;  %v1317_v13 = vld [vmem:[#allocation9 + $0xa60] sm:$0xff] }
 0x216   : > { %3359 = vmatprep.subr.bf16.mxu0 %v3358_v14  ;;  %v1319_v14 = vld [vmem:[#allocation9 + $0xa70] sm:$0xff] }
 0x217   : > { %v3392_v34 = vpack.c.bf16 %v1319_v14, %v1317_v13  ;;  %v1335_v14 = vld [vmem:[#allocation9 + $0xaf0] sm:$0xff] }
 0x219   : > { %3361 = vmatpush1.bf16.msra.mxu0 %v3360_v20  ;;  %v3506_v20 = vpack.c.bf16 %v1690_v17, %v1688_v15  ;;  %v1712_v15 = vld [vmem:[#allocation12 + $0xc8] sm:$0xff]  ;;  %v1714_v17 = vld [vmem:[#allocation12 + $0xd8] sm:$0xff] }
 0x21a   : > { %3363 = vmatprep.subr.bf16.mxu0 %v3362_v21  ;;  %v1689_v21 = vld [vmem:[#allocation12 + $0x10] sm:$0xff] }
 0x21b   : > { %v3508_v24 = vpack.c.bf16 %v1689_v21, %v1687_v18  ;;  %3507 = vmatprep.subr.bf16.mxu1 %v3506_v20  ;;  %v1338_v18 = vld [vmem:[#allocation9 + $0xb08] sm:$0xff]  ;;  %v3528_v20 = vpack.c.bf16 %v1709_v12, %v1707_v16  ;;  %v3408_v21 = vpack.c.bf16 %v1335_v14, %v1333_v10  ;;  %v1729_v16 = vld [vmem:[#allocation12 + $0x150] sm:$0xff] }
 0x21c   : > { %v1732_v14 = vld [vmem:[#allocation12 + $0x168] sm:$0xff] }
 0x21d   : > { %3365 = vmatpush1.bf16.msra.mxu0 %v3364_v25  ;;  %v3510_v25 = vpack.c.bf16 %v1694_v23, %v1692_v22  ;;  %3509 = vmatpush1.bf16.msra.mxu1 %v3508_v24  ;;  %v1337_v22 = vld [vmem:[#allocation9 + $0xb00] sm:$0xff]  ;;  %v3530_v23 = vpack.c.bf16 %v1714_v17, %v1712_v15  ;;  %v1713_v24 = vld [vmem:[#allocation12 + $0xd0] sm:$0xff]  ;;  %v1358_v17 = vld [vmem:[#allocation9 + $0xba8] sm:$0xff] }
 0x21e   : > { %3367 = vmatprep.subr.bf16.mxu0 %v3366_v26  ;;  %v1691_v26 = vld [vmem:[#allocation12 + $0x20] sm:$0xff]  ;;  %v1734_v15 = vld [vmem:[#allocation12 + $0x178] sm:$0xff] }
 0x21f   : > { %3511 = vmatprep.subr.bf16.mxu1 %v3510_v25 }
 0x221   : > { %3369 = vmatpush1.bf16.msra.mxu0 %v3368_v32  ;;  %v1698_v32 = vld [vmem:[#allocation12 + $0x58] sm:$0xff] }
 0x222   : > { %3371 = vmatprep.subr.bf16.mxu0 %v3370_v33  ;;  %v3512_v33 = vpack.c.bf16 %v1693_v27, %v1691_v26  ;;  %v3514_v36 = vpack.c.bf16 %v1698_v32, %v1696_v28  ;;  %v1339_v26 = vld [vmem:[#allocation9 + $0xb10] sm:$0xff]  ;;  %v1718_v28 = vld [vmem:[#allocation12 + $0xf8] sm:$0xff] }
 0x223   : > { %v1716_v27 = vld [vmem:[#allocation12 + $0xe8] sm:$0xff] }
 0x224   : > { %3513 = vmatpush1.bf16.msra.mxu1 %v3512_v33  ;;  %v3412_v33 = vpack.c.bf16 %v1339_v26, %v1337_v22  ;;  %v1731_v22 = vld [vmem:[#allocation12 + $0x160] sm:$0xff] }
 0x225   : > { %3373 = vmatpush1.bf16.msra.mxu0 %v3372_v37  ;;  %v1697_v37 = vld [vmem:[#allocation12 + $0x50] sm:$0xff]  ;;  %3515 = vmatprep.subr.bf16.mxu1 %v3514_v36  ;;  %v1715_v36 = vld [vmem:[#allocation12 + $0xe0] sm:$0xff] }
 0x226   : > { %3375 = vmatprep.subr.bf16.mxu0 %v3374_v38  ;;  %v3394_v38 = vpack.c.bf16 %v1324_v31, %v1322_v30  ;;  %v3516_v49 = vpack.c.bf16 %v1697_v37, %v1695_v43  ;;  %v1342_v30 = vld [vmem:[#allocation9 + $0xb28] sm:$0xff]  ;;  %v1344_v31 = vld [vmem:[#allocation9 + $0xb38] sm:$0xff] }
 0x227   : > { %v1717_v43 = vld [vmem:[#allocation12 + $0xf0] sm:$0xff]  ;;  %v3414_v37 = vpack.c.bf16 %v1344_v31, %v1342_v30  ;;  %v1362_v26 = vld [vmem:[#allocation9 + $0xbc8] sm:$0xff] }
 0x228   : > { %3517 = vmatpush1.bf16.msra.mxu1 %v3516_v49  ;;  %v3536_v48 = vpack.c.bf16 %v1717_v43, %v1715_v36 }
 0x229   : > { %3377 = vmatpush1.bf16.msra.mxu0 %v3376_v50  ;;  %v3396_v50 = vpack.c.bf16 %v1323_v39, %v1321_v35  ;;  %3519 = vmatprep.subr.bf16.mxu1 %v3518_v52  ;;  %v3534_v35 = vpack.c.bf16 %v1718_v28, %v1716_v27  ;;  %v1720_v39 = vld [vmem:[#allocation12 + $0x108] sm:$0xff]  ;;  %v1719_v52 = vld [vmem:[#allocation12 + $0x100] sm:$0xff]  ;;  %v1364_v27 = vld [vmem:[#allocation9 + $0xbd8] sm:$0xff] }
 0x22a   : > { %3379 = vmatprep.subr.bf16.mxu0 %v3378_v54  ;;  %v1699_v54 = vld [vmem:[#allocation12 + $0x60] sm:$0xff]  ;;  %v3434_v31 = vpack.c.bf16 %v1364_v27, %v1362_v26  ;;  %v1495_v26 = vld [vmem:[#allocation9 + $0xcb0] sm:$0xff] }
 0x22b   : > { %v1498_v27 = vld [vmem:[#allocation9 + $0xcc8] sm:$0xff] }
 0x22c   : > { %1284 = vmatmul.mubr.f32.vlgmr.msra.gmra.mrb[0].mxu0 %v1207_v62  ;;  %v3520_v62 = vpack.c.bf16 %v1701_v61, %v1699_v54  ;;  %v1721_v54 = vld [vmem:[#allocation12 + $0x110] sm:$0xff]  ;;  %v3418_v61 = vpack.c.bf16 %v1348_v44, %v1346_v41 }
 0x22d   : > { %3381 = vmatpush1.bf16.msra.mxu0 %v3380_v63  ;;  %1289 = vmatprep.mubr.f32.mxu0 %v1214_v3  ;;  %v3400_v63 = vpack.c.bf16 %v1327_v56, %v1325_v51  ;;  %v3402_v3 = vpack.c.bf16 %v1332_v60, %v1330_v59  ;;  %v3538_v51 = vpack.c.bf16 %v1722_v40, %v1720_v39  ;;  %v1724_v56 = vld [vmem:[#allocation12 + $0x128] sm:$0xff]  ;;  %v1352_v59 = vld [vmem:[#allocation9 + $0xb78] sm:$0xff]  ;;  %v1300_v39 = vld [vmem:[#allocation2] sm:$0xe0] }
 0x22e   : > { %3383 = vmatprep.subr.bf16.mxu0 %v3382_v0  ;;  %v3522_v0 = vpack.c.bf16 %v1706_v58, %v1704_v57  ;;  %3521 = vmatpush1.bf16.msra.mxu1 %v3520_v62  ;;  %v1726_v57 = vld [vmem:[#allocation12 + $0x138] sm:$0xff]  ;;  %v1350_v58 = vld [vmem:[#allocation9 + $0xb68] sm:$0xff]  ;;  %v3540_v60 = vpack.c.bf16 %v1721_v54, %v1719_v52  ;;  %v1475_v54 = vld [vmem:[#allocation9 + $0xc10] sm:$0xff] }
 0x22f   : > { %v3542_v42 = vpack.c.bf16 %v1726_v57, %v1724_v56  ;;  %v1474_v40 = vld [vmem:[#allocation9 + $0xc08] sm:$0xff]  ;;  %v1476_v41 = vld [vmem:[#allocation9 + $0xc18] sm:$0xff]  ;;  %v1473_v52 = vld [vmem:[#allocation9 + $0xc00] sm:$0xff] }
 0x230   : > { %1290 = vmatmul.mubr.f32.gmra.mrb[2].mxu0 %v1212_v47  ;;  %v1336_v47 = vld [vmem:[#allocation9 + $0xaf8] sm:$0xff]  ;;  %3523 = vmatprep.subr.bf16.mxu1 %v3522_v0  ;;  %v1723_v0 = vld [vmem:[#allocation12 + $0x120] sm:$0xff] }
 0x231   : > { %3385 = vmatpush1.bf16.msra.mxu0 %v3384_v7  ;;  %1451 = vmatprep.mubr.f32.mxu0 %v1378_v11  ;;  %v1334_v7 = vld [vmem:[#allocation9 + $0xae8] sm:$0xff]  ;;  %v3526_v11 = vpack.c.bf16 %v1710_v46, %v1708_v6  ;;  %v1730_v6 = vld [vmem:[#allocation12 + $0x158] sm:$0xff] }
 0x232   : > { %3387 = vmatprep.subr.bf16.mxu0 %v3386_v8  ;;  %v3524_v8 = vpack.c.bf16 %v1705_v2, %v1703_v1  ;;  %v3406_v13 = vpack.c.bf16 %v1336_v47, %v1334_v7  ;;  %v1725_v1 = vld [vmem:[#allocation12 + $0x130] sm:$0xff]  ;;  %v3422_v2 = vpack.c.bf16 %v1352_v59, %v1350_v58  ;;  %v1354_v46 = vld [vmem:[#allocation9 + $0xb88] sm:$0xff]  ;;  %v3546_v10 = vpack.c.bf16 %v1730_v6, %v1728_v4  ;;  %v1469_v58 = vld [vmem:[#allocation2 + $0x8] sm:$0xc0] }
 0x233   : > { %v1356_v7 = vld [vmem:[#allocation9 + $0xb98] sm:$0xff]  ;;  %v3544_v47 = vpack.c.bf16 %v1725_v1, %v1723_v0  ;;  %v1478_v56 = vld [vmem:[#allocation9 + $0xc28] sm:$0xff]  ;;  %v1479_v0 = vld [vmem:[#allocation9 + $0xc30] sm:$0xff] }
 0x234   : > { %3525 = vmatpush1.bf16.msra.mxu1 %v3524_v8  ;;  %v3426_v12 = vpack.c.bf16 %v1356_v7, %v1354_v46  ;;  %v1303_v44 = vld [vmem:[#allocation2 + $0x28] sm:$0x1f]  ;;  %v1482_v4 = vld [vmem:[#allocation9 + $0xc48] sm:$0xff] }
 0x235   : > { %3389 = vmatpush1.bf16.msra.mxu0 %v3388_v19  ;;  %v1340_v19 = vld [vmem:[#allocation9 + $0xb18] sm:$0xff]  ;;  %3527 = vmatprep.subr.bf16.mxu1 %v3526_v11  ;;  %v1727_v11 = vld [vmem:[#allocation12 + $0x140] sm:$0xff] }
 0x236   : > { %3391 = vmatprep.subr.bf16.mxu0 %v3390_v29  ;;  %v1711_v29 = vld [vmem:[#allocation12 + $0xc0] sm:$0xff]  ;;  %v3410_v25 = vpack.c.bf16 %v1340_v19, %v1338_v18  ;;  %v1360_v18 = vld [vmem:[#allocation9 + $0xbb8] sm:$0xff]  ;;  %v3548_v19 = vpack.c.bf16 %v1729_v16, %v1727_v11 }
 0x237   : > { %v3532_v32 = vpack.c.bf16 %v1713_v24, %v1711_v29  ;;  %v3430_v29 = vpack.c.bf16 %v1360_v18, %v1358_v17  ;;  %v1357_v24 = vld [vmem:[#allocation9 + $0xba0] sm:$0xff]  ;;  %v1480_v57 = vld [vmem:[#allocation9 + $0xc38] sm:$0xff] }
 0x238   : > { %3529 = vmatpush1.bf16.msra.mxu1 %v3528_v20  ;;  %v1484_v6 = vld [vmem:[#allocation9 + $0xc58] sm:$0xff] }
 0x239   : > { %3393 = vmatpush1.bf16.msra.mxu0 %v3392_v34  ;;  %v1341_v34 = vld [vmem:[#allocation9 + $0xb20] sm:$0xff]  ;;  %3531 = vmatprep.subr.bf16.mxu1 %v3530_v23  ;;  %v1733_v23 = vld [vmem:[#allocation12 + $0x170] sm:$0xff] }
 0x23a   : > { %3395 = vmatprep.subr.bf16.mxu0 %v3394_v38  ;;  %v1343_v38 = vld [vmem:[#allocation9 + $0xb30] sm:$0xff]  ;;  %v3552_v28 = vpack.c.bf16 %v1733_v23, %v1731_v22  ;;  %v1488_v11 = vld [vmem:[#allocation9 + $0xc78] sm:$0xff]  ;;  %v1494_v22 = vld [vmem:[#allocation9 + $0xca8] sm:$0xff] }
 0x23b   : > { %v3416_v49 = vpack.c.bf16 %v1343_v38, %v1341_v34  ;;  %v1366_v34 = vld [vmem:[#allocation9 + $0xbe8] sm:$0xff]  ;;  %v1367_v38 = vld [vmem:[#allocation9 + $0xbf0] sm:$0xff]  ;;  %v1492_v17 = vld [vmem:[#allocation9 + $0xc98] sm:$0xff] }
 0x23c   : > { %3533 = vmatpush1.bf16.msra.mxu1 %v3532_v32  ;;  %v1361_v32 = vld [vmem:[#allocation9 + $0xbc0] sm:$0xff]  ;;  %v1496_v23 = vld [vmem:[#allocation9 + $0xcb8] sm:$0xff] }
 0x23d   : > { %3397 = vmatpush1.bf16.msra.mxu0 %v3396_v50  ;;  %v1345_v50 = vld [vmem:[#allocation9 + $0xb40] sm:$0xff]  ;;  %3535 = vmatprep.subr.bf16.mxu1 %v3534_v35  ;;  %v1368_v35 = vld [vmem:[#allocation9 + $0xbf8] sm:$0xff] }
 0x23e   : > { %3399 = vmatprep.subr.bf16.mxu0 %v3398_v55  ;;  %v1347_v55 = vld [vmem:[#allocation9 + $0xb50] sm:$0xff]  ;;  %v3438_v43 = vpack.c.bf16 %v1368_v35, %v1366_v34  ;;  %v1502_v34 = vld [vmem:[#allocation9 + $0xce8] sm:$0xff]  ;;  %v1504_v35 = vld [vmem:[#allocation9 + $0xcf8] sm:$0xff] }
 0x23f   : > { %v3420_v62 = vpack.c.bf16 %v1347_v55, %v1345_v50  ;;  %v1374_v50 = vrot.slane %v4811_v45, 5  ;;  %v1302_v55 = vld [vmem:[#allocation2 + $0x20] sm:$0x1f] }
 0x240   : > { %3537 = vmatpush1.bf16.msra.mxu1 %v3536_v48 }
 0x241   : > { %3401 = vmatpush1.bf16.msra.mxu0 %v3400_v63  ;;  %v1349_v63 = vld [vmem:[#allocation9 + $0xb60] sm:$0xff]  ;;  %3539 = vmatprep.subr.bf16.mxu1 %v3538_v51  ;;  %v3442_v51 = vpack.c.bf16 %v1476_v41, %v1474_v40  ;;  %v1508_v40 = vld [vmem:[#allocation9 + $0xd18] sm:$0xff] }
 0x242   : > { %3403 = vmatprep.subr.bf16.mxu0 %v3402_v3  ;;  %v1351_v3 = vld [vmem:[#allocation9 + $0xb70] sm:$0xff] }
 0x243   : > { %v3424_v8 = vpack.c.bf16 %v1351_v3, %v1349_v63  ;;  %v3446_v63 = vpack.c.bf16 %v1480_v57, %v1478_v56  ;;  %v1546_v3 = vrot.slane %v4804_v53, 6  ;;  %v1514_v56 = vld [vmem:[#allocation9 + $0xd48] sm:$0xff]  ;;  %v1516_v57 = vld [vmem:[#allocation9 + $0xd58] sm:$0xff] }
 0x244   : > { %3541 = vmatpush1.bf16.msra.mxu1 %v3540_v60  ;;  %v3444_v60 = vpack.c.bf16 %v1475_v54, %v1473_v52  ;;  %v1741_v53 = vld [vmem:[#allocation12 + $0x1b0] sm:$0xff] }
 0x245   : > { %3405 = vmatpush1.bf16.msra.mxu0 %v3404_v9  ;;  %v1353_v9 = vld [vmem:[#allocation9 + $0xb80] sm:$0xff]  ;;  %3543 = vmatprep.subr.bf16.mxu1 %v3542_v42 }
 0x246   : > { %3407 = vmatprep.subr.bf16.mxu0 %v3406_v13  ;;  %v1355_v13 = vld [vmem:[#allocation9 + $0xb90] sm:$0xff]  ;;  %v1477_v42 = vld [vmem:[#allocation9 + $0xc20] sm:$0xff] }
 0x247   : > { %v3428_v20 = vpack.c.bf16 %v1355_v13, %v1353_v9  ;;  %v3448_v46 = vpack.c.bf16 %v1479_v0, %v1477_v42  ;;  %v1483_v9 = vld [vmem:[#allocation9 + $0xc50] sm:$0xff]  ;;  %v1485_v13 = vld [vmem:[#allocation9 + $0xc60] sm:$0xff]  ;;  %v1520_v42 = vld [vmem:[#allocation9 + $0xd78] sm:$0xff] }
 0x248   : > { %3545 = vmatpush1.bf16.msra.mxu1 %v3544_v47  ;;  %v3450_v47 = vpack.c.bf16 %v1484_v6, %v1482_v4  ;;  %v1519_v4 = vld [vmem:[#allocation9 + $0xd70] sm:$0xff]  ;;  %v1522_v6 = vld [vmem:[#allocation9 + $0xd88] sm:$0xff] }
 0x249   : > { %3409 = vmatpush1.bf16.msra.mxu0 %v3408_v21  ;;  %3547 = vmatprep.subr.bf16.mxu1 %v3546_v10  ;;  %v3550_v21 = vpack.c.bf16 %v1734_v15, %v1732_v14  ;;  %v1486_v10 = vld [vmem:[#allocation9 + $0xc68] sm:$0xff]  ;;  %v1487_v14 = vld [vmem:[#allocation9 + $0xc70] sm:$0xff] }
 0x24a   : > { %3411 = vmatprep.subr.bf16.mxu0 %v3410_v25  ;;  %v1359_v25 = vld [vmem:[#allocation9 + $0xbb0] sm:$0xff]  ;;  %v1490_v15 = vld [vmem:[#allocation9 + $0xc88] sm:$0xff]  ;;  %v3456_v18 = vpack.c.bf16 %v1487_v14, %v1485_v13 }
 0x24b   : > { %v3432_v30 = vpack.c.bf16 %v1359_v25, %v1357_v24  ;;  %v3462_v24 = vpack.c.bf16 %v1496_v23, %v1494_v22  ;;  %v1493_v25 = vld [vmem:[#allocation9 + $0xca0] sm:$0xff]  ;;  %v1527_v13 = vld [vmem:[#allocation9 + $0xdb0] sm:$0xff]  ;;  %v1530_v14 = vld [vmem:[#allocation9 + $0xdc8] sm:$0xff] }
 0x24c   : > { %3549 = vmatpush1.bf16.msra.mxu1 %v3548_v19  ;;  %v3458_v19 = vpack.c.bf16 %v1492_v17, %v1490_v15  ;;  %v1532_v15 = vld [vmem:[#allocation9 + $0xdd8] sm:$0xff] }
 0x24d   : > { %3413 = vmatpush1.bf16.msra.mxu0 %v3412_v33  ;;  %3551 = vmatprep.subr.bf16.mxu1 %v3550_v21  ;;  %v1363_v33 = vld [vmem:[#allocation9 + $0xbd0] sm:$0xff]  ;;  %v1536_v22 = vld [vmem:[#allocation9 + $0xdf8] sm:$0xff] }
 0x24e   : > { %3415 = vmatprep.subr.bf16.mxu0 %v3414_v37  ;;  %v3436_v36 = vpack.c.bf16 %v1363_v33, %v1361_v32  ;;  %v1365_v37 = vld [vmem:[#allocation9 + $0xbe0] sm:$0xff]  ;;  %v1491_v21 = vld [vmem:[#allocation9 + $0xc90] sm:$0xff] }
 0x24f   : > { %v3440_v48 = vpack.c.bf16 %v1367_v38, %v1365_v37  ;;  %v1497_v32 = vld [vmem:[#allocation9 + $0xcc0] sm:$0xff]  ;;  %v1499_v33 = vld [vmem:[#allocation9 + $0xcd0] sm:$0xff] }
 0x250   : > { %3553 = vmatpush1.bf16.msra.mxu1 %v3552_v28  ;;  %v1500_v28 = vld [vmem:[#allocation9 + $0xcd8] sm:$0xff]  ;;  %v1501_v37 = vld [vmem:[#allocation9 + $0xce0] sm:$0xff]  ;;  %v1503_v38 = vld [vmem:[#allocation9 + $0xcf0] sm:$0xff] }
 0x251   : > { %3417 = vmatpush1.bf16.msra.mxu0 %v3416_v49  ;;  %v1373_v49 = vrot.slane %v1300_v39, 5  ;;  %v1506_v39 = vld [vmem:[#allocation9 + $0xd08] sm:$0xff]  ;;  %v3472_v41 = vpack.c.bf16 %v1503_v38, %v1501_v37  ;;  %v1738_v38 = vld [vmem:[#allocation12 + $0x198] sm:$0xff] }
 0x252   : > { %3419 = vmatprep.subr.bf16.mxu0 %v3418_v61  ;;  %v1381_v61 = vrot.slane %v1303_v44, 5  ;;  %v3474_v44 = vpack.c.bf16 %v1508_v40, %v1506_v39  ;;  %v1736_v37 = vld [vmem:[#allocation12 + $0x188] sm:$0xff]  ;;  %v1737_v40 = vld [vmem:[#allocation12 + $0x190] sm:$0xff] }
 0x253   : > { %v1375_v59 = vsel %vm440_vm0, %v1373_v49, %v1374_v50  ;;  %v1507_v49 = vld [vmem:[#allocation9 + $0xd10] sm:$0xff]  ;;  %v3554_v39 = vpack.c.bf16 %v1738_v38, %v1736_v37  ;;  %v1843_v38 = vld [vmem:[#allocation12 + $0x220] sm:$0xff] }
 0x254   : > { %v1382_v1 = vsel %vm440_vm0, %v1377_v5, %v1381_v61  ;;  %v1509_v61 = vld [vmem:[#allocation9 + $0xd20] sm:$0xff] }
 0x255   : > { %3421 = vmatpush1.bf16.msra.mxu0 %v3420_v62  ;;  %v1379_v62 = vrot.slane %v1302_v55, 5  ;;  %v1511_v55 = vld [vmem:[#allocation9 + $0xd30] sm:$0xff]  ;;  %3555 = vmatprep.subr.bf16.mxu1 %v3554_v39 }
 0x256   : > { %3423 = vmatprep.subr.bf16.mxu0 %v3422_v2  ;;  %v1545_v2 = vrot.slane %v1469_v58, 6  ;;  %v3480_v58 = vpack.c.bf16 %v1511_v55, %v1509_v61  ;;  %v1743_v61 = vld [vmem:[#allocation12 + $0x1c0] sm:$0xff]  ;;  %v1745_v55 = vld [vmem:[#allocation12 + $0x1d0] sm:$0xff] }
 0x257   : > { %v1380_v7 = vsel %vm440_vm0, %v1374_v50, %v1379_v62  ;;  %v1510_v50 = vld [vmem:[#allocation9 + $0xd28] sm:$0xff]  ;;  %v1515_v62 = vld [vmem:[#allocation9 + $0xd50] sm:$0xff] }
 0x258   : > { %v1547_v5 = vsel %vm1541_vm5, %v1545_v2, %v1546_v3  ;;  %v1517_v2 = vld [vmem:[#allocation9 + $0xd60] sm:$0xff] }
 0x259   : > { %3425 = vmatpush1.bf16.msra.mxu0 %v3424_v8  ;;  %v1481_v8 = vld [vmem:[#allocation9 + $0xc40] sm:$0xff] }
 0x25a   : > { %3427 = vmatprep.subr.bf16.mxu0 %v3426_v12  ;;  %v3452_v16 = vpack.c.bf16 %v1483_v9, %v1481_v8  ;;  %v3454_v12 = vpack.c.bf16 %v1488_v11, %v1486_v10  ;;  %v1521_v8 = vld [vmem:[#allocation9 + $0xd80] sm:$0xff]  ;;  %v1523_v9 = vld [vmem:[#allocation9 + $0xd90] sm:$0xff]  ;;  %v1528_v10 = vld [vmem:[#allocation9 + $0xdb8] sm:$0xff] }
 0x25b   : > { %v3492_v11 = vpack.c.bf16 %v1523_v9, %v1521_v8 }
 0x25d   : > { %3429 = vmatpush1.bf16.msra.mxu0 %v3428_v20  ;;  %v1489_v20 = vld [vmem:[#allocation9 + $0xc80] sm:$0xff] }
 0x25e   : > { %3431 = vmatprep.subr.bf16.mxu0 %v3430_v29  ;;  %v3460_v29 = vpack.c.bf16 %v1491_v21, %v1489_v20  ;;  %v1531_v20 = vld [vmem:[#allocation9 + $0xdd0] sm:$0xff]  ;;  %v1534_v21 = vld [vmem:[#allocation9 + $0xde8] sm:$0xff] }
 0x261   : > { %3433 = vmatpush1.bf16.msra.mxu0 %v3432_v30  ;;  %v3464_v30 = vpack.c.bf16 %v1495_v26, %v1493_v25  ;;  %v1535_v25 = vld [vmem:[#allocation9 + $0xdf0] sm:$0xff] }
 0x262   : > { %3435 = vmatprep.subr.bf16.mxu0 %v3434_v31  ;;  %v3466_v31 = vpack.c.bf16 %v1500_v28, %v1498_v27  ;;  %v1468_v26 = vld [vmem:[#allocation2] sm:$0xc0]  ;;  %v1471_v27 = vld [vmem:[#allocation2 + $0x28] sm:$0x3f] }
 0x265   : > { %3437 = vmatpush1.bf16.msra.mxu0 %v3436_v36  ;;  %v3468_v36 = vpack.c.bf16 %v1499_v33, %v1497_v32  ;;  %v1550_v32 = vrot.slane %v1471_v27, 6  ;;  %v1470_v33 = vld [vmem:[#allocation2 + $0x20] sm:$0x3f] }
 0x266   : > { %3439 = vmatprep.subr.bf16.mxu0 %v3438_v43  ;;  %v3470_v43 = vpack.c.bf16 %v1504_v35, %v1502_v34  ;;  %v1548_v35 = vrot.slane %v1470_v33, 6  ;;  %v1839_v33 = vld [vmem:[#allocation12 + $0x200] sm:$0xff] }
 0x269   : > { %3441 = vmatpush1.bf16.msra.mxu0 %v3440_v48  ;;  %v1505_v48 = vld [vmem:[#allocation9 + $0xd00] sm:$0xff] }
 0x26a   : > { %3443 = vmatprep.subr.bf16.mxu0 %v3442_v51  ;;  %v1512_v51 = vld [vmem:[#allocation9 + $0xd38] sm:$0xff]  ;;  %v3476_v52 = vpack.c.bf16 %v1507_v49, %v1505_v48 }
 0x26b   : > { %v3478_v54 = vpack.c.bf16 %v1512_v51, %v1510_v50  ;;  %v1742_v48 = vld [vmem:[#allocation12 + $0x1b8] sm:$0xff]  ;;  %v1739_v50 = vld [vmem:[#allocation12 + $0x1a0] sm:$0xff] }
 0x26c   : > { %1452 = vmatmul.mubr.f32.vlgmr.msra.gmra.mrb[0].mxu0 %v1375_v59  ;;  %v3482_v59 = vpack.c.bf16 %v1516_v57, %v1514_v56  ;;  %v3560_v51 = vpack.c.bf16 %v1741_v53, %v1739_v50  ;;  %v3564_v56 = vpack.c.bf16 %v1745_v55, %v1743_v61  ;;  %v1748_v57 = vld [vmem:[#allocation12 + $0x1e8] sm:$0xff]  ;;  %v1854_v55 = vld [vmem:[#allocation12 + $0x278] sm:$0xff] }
 0x26d   : > { %3445 = vmatpush1.bf16.msra.mxu0 %v3444_v60  ;;  %1457 = vmatprep.mubr.f32.mxu0 %v1382_v1  ;;  %v1513_v60 = vld [vmem:[#allocation9 + $0xd40] sm:$0xff]  ;;  %v1852_v61 = vld [vmem:[#allocation12 + $0x268] sm:$0xff] }
 0x26e   : > { %3447 = vmatprep.subr.bf16.mxu0 %v3446_v63  ;;  %v1518_v63 = vld [vmem:[#allocation9 + $0xd68] sm:$0xff]  ;;  %v3484_v0 = vpack.c.bf16 %v1515_v62, %v1513_v60  ;;  %v1749_v62 = vld [vmem:[#allocation12 + $0x1f0] sm:$0xff] }
 0x26f   : > { %v3486_v1 = vpack.c.bf16 %v1520_v42, %v1518_v63  ;;  %v1747_v60 = vld [vmem:[#allocation12 + $0x1e0] sm:$0xff]  ;;  %v1840_v42 = vld [vmem:[#allocation12 + $0x208] sm:$0xff] }
 0x270   : > { %1458 = vmatmul.mubr.f32.gmra.mrb[2].mxu0 %v1380_v7  ;;  %v3488_v7 = vpack.c.bf16 %v1519_v4, %v1517_v2  ;;  %v3568_v63 = vpack.c.bf16 %v1749_v62, %v1747_v60  ;;  %v461_v2 = vlaneseq  ;;  %v1853_v60 = vld [vmem:[#allocation12 + $0x270] sm:$0xff]  ;;  %v1856_v62 = vld [vmem:[#allocation12 + $0x288] sm:$0xff] }
 0x271   : > { %3449 = vmatpush1.bf16.msra.mxu0 %v3448_v46  ;;  %1620 = vmatprep.mubr.f32.mxu0 %v1547_v5  ;;  %v1524_v46 = vld [vmem:[#allocation9 + $0xd98] sm:$0xff]  ;;  %v1526_v5 = vld [vmem:[#allocation9 + $0xda8] sm:$0xff] }
 0x272   : > { %3451 = vmatprep.subr.bf16.mxu0 %v3450_v47  ;;  %v3490_v47 = vpack.c.bf16 %v1524_v46, %v1522_v6  ;;  %v4873_v4 = vshrl.u32 %v461_v2, 7  ;;  %v459_v46 = vld [vmem:[#allocation11] sm:$0x3]  ;;  %v1857_v2 = vld [vmem:[#allocation12 + $0x290] sm:$0xff] }
 0x274   : > { %v463_v6 = vsub.s32 0, %v4873_v4 }
 0x275   : > { %3453 = vmatpush1.bf16.msra.mxu0 %v3452_v16  ;;  %v3494_v16 = vpack.c.bf16 %v1528_v10, %v1526_v5  ;;  %v1637_v5 = vld [vmem:[%s4767_s16] sm:$0xff] }
 0x276   : > { %3455 = vmatprep.subr.bf16.mxu0 %v3454_v12  ;;  %v1525_v12 = vld [vmem:[#allocation9 + $0xda0] sm:$0xff] }
 0x277   : > { %v3496_v17 = vpack.c.bf16 %v1527_v13, %v1525_v12 }
 0x279   : > { %3457 = vmatpush1.bf16.msra.mxu0 %v3456_v18  ;;  %v3498_v18 = vpack.c.bf16 %v1532_v15, %v1530_v14 }
 0x27a   : > { %3459 = vmatprep.subr.bf16.mxu0 %v3458_v19  ;;  %v1529_v19 = vld [vmem:[#allocation9 + $0xdc0] sm:$0xff] }
 0x27b   : > { %v3500_v23 = vpack.c.bf16 %v1531_v20, %v1529_v19 }
 0x27d   : > { %3461 = vmatpush1.bf16.msra.mxu0 %v3460_v29  ;;  %v3502_v29 = vpack.c.bf16 %v1536_v22, %v1534_v21  ;;  %v1640_v21 = vld [vmem:[%s4767_s16 + $0x18] sm:$0xff] }
 0x27e   : > { %3463 = vmatprep.subr.bf16.mxu0 %v3462_v24  ;;  %v1533_v24 = vld [vmem:[#allocation9 + $0xde0] sm:$0xff] }
 0x27f   : > { %v3504_v28 = vpack.c.bf16 %v1535_v25, %v1533_v24 }
 0x281   : > { %3465 = vmatpush1.bf16.msra.mxu0 %v3464_v30  ;;  %v1542_v30 = vrot.slane %v1468_v26, 6 }
 0x282   : > { %3467 = vmatprep.subr.bf16.mxu0 %v3466_v31  ;;  %v1543_v31 = vrot.slane %v4811_v45, 6  ;;  %v1735_v45 = vld [vmem:[#allocation12 + $0x180] sm:$0xff] }
 0x284   : > { %v1544_v34 = vsel %vm1541_vm5, %v1542_v30, %v1543_v31 }
 0x285   : > { %3469 = vmatpush1.bf16.msra.mxu0 %v3468_v36  ;;  %v1551_v36 = vsel %vm1541_vm5, %v1546_v3, %v1550_v32  ;;  %v1744_v3 = vld [vmem:[#allocation12 + $0x1c8] sm:$0xff] }
 0x286   : > { %3471 = vmatprep.subr.bf16.mxu0 %v3470_v43  ;;  %v1549_v43 = vsel %vm1541_vm5, %v1543_v31, %v1548_v35 }
 0x289   : > { %3473 = vmatpush1.bf16.msra.mxu0 %v3472_v41  ;;  %v3556_v41 = vpack.c.bf16 %v1737_v40, %v1735_v45  ;;  %v1845_v40 = vld [vmem:[#allocation12 + $0x230] sm:$0xff] }
 0x28a   : > { %3475 = vmatprep.subr.bf16.mxu0 %v3474_v44  ;;  %v1740_v44 = vld [vmem:[#allocation12 + $0x1a8] sm:$0xff]  ;;  %v3576_v53 = vpack.c.bf16 %v1845_v40, %v1843_v38  ;;  %v1881_v40 = vld [vmem:[#allocation12 + $0x350] sm:$0xff] }
 0x28b   : > { %3557 = vmatpush1.bf16.msra.mxu1 %v3556_v41  ;;  %v3558_v49 = vpack.c.bf16 %v1742_v48, %v1740_v44  ;;  %v1848_v48 = vld [vmem:[#allocation12 + $0x248] sm:$0xff] }
 0x28d   : > { %3477 = vmatpush1.bf16.msra.mxu0 %v3476_v52  ;;  %3559 = vmatprep.subr.bf16.mxu1 %v3558_v49  ;;  %v1746_v52 = vld [vmem:[#allocation12 + $0x1d8] sm:$0xff] }
 0x28e   : > { %3479 = vmatprep.subr.bf16.mxu0 %v3478_v54  ;;  %v3562_v54 = vpack.c.bf16 %v1746_v52, %v1744_v3  ;;  %v1850_v49 = vld [vmem:[#allocation12 + $0x258] sm:$0xff]  ;;  %v1847_v52 = vld [vmem:[#allocation12 + $0x240] sm:$0xff] }
 0x28f   : > { %3561 = vmatpush1.bf16.msra.mxu1 %v3560_v51  ;;  %v3578_v51 = vpack.c.bf16 %v1850_v49, %v1848_v48 }
 0x290   : > { %3563 = vmatprep.subr.bf16.mxu1 %v3562_v54  ;;  %v1849_v54 = vld [vmem:[#allocation12 + $0x250] sm:$0xff] }
 0x291   : > { %3481 = vmatpush1.bf16.msra.mxu0 %v3480_v58  ;;  %v1750_v58 = vld [vmem:[#allocation12 + $0x1f8] sm:$0xff] }
 0x292   : > { %3483 = vmatprep.subr.bf16.mxu0 %v3482_v59  ;;  %v3566_v59 = vpack.c.bf16 %v1750_v58, %v1748_v57  ;;  %v3580_v57 = vpack.c.bf16 %v1849_v54, %v1847_v52  ;;  %v3582_v58 = vpack.c.bf16 %v1854_v55, %v1852_v61  ;;  %v1890_v52 = vld [vmem:[#allocation12 + $0x398] sm:$0xff]  ;;  %v1887_v55 = vld [vmem:[#allocation12 + $0x380] sm:$0xff] }
 0x293   : > { %3565 = vmatpush1.bf16.msra.mxu1 %v3564_v56 }
 0x294   : > { %3567 = vmatprep.subr.bf16.mxu1 %v3566_v59  ;;  %v1851_v59 = vld [vmem:[#allocation12 + $0x260] sm:$0xff] }
 0x295   : > { %3485 = vmatpush1.bf16.msra.mxu0 %v3484_v0  ;;  %v1842_v0 = vld [vmem:[#allocation12 + $0x218] sm:$0xff] }
 0x296   : > { %3487 = vmatprep.subr.bf16.mxu0 %v3486_v1  ;;  %v3570_v1 = vpack.c.bf16 %v1842_v0, %v1840_v42  ;;  %v3584_v42 = vpack.c.bf16 %v1853_v60, %v1851_v59 }
 0x297   : > { %3569 = vmatpush1.bf16.msra.mxu1 %v3568_v63  ;;  %v1858_v63 = vld [vmem:[#allocation12 + $0x298] sm:$0xff] }
 0x298   : > { %3571 = vmatprep.subr.bf16.mxu1 %v3570_v1  ;;  %v3586_v0 = vpack.c.bf16 %v1858_v63, %v1856_v62  ;;  %v1855_v1 = vld [vmem:[#allocation12 + $0x280] sm:$0xff]  ;;  %v1893_v63 = vld [vmem:[#allocation12 + $0x3b0] sm:$0xff] }
 0x299   : > { %3489 = vmatpush1.bf16.msra.mxu0 %v3488_v7  ;;  %v467_v7 = vsub.s32 1, %v4873_v4  ;;  %v1891_v62 = vld [vmem:[#allocation12 + $0x3a0] sm:$0xff] }
 0x29a   : > { %3491 = vmatprep.subr.bf16.mxu0 %v3490_v47  ;;  %v464_v47 = vrot.slane %v459_v46, %v463_v6 }
 0x29b   : > { %v468_v8 = vrot.slane %v459_v46, %v467_v7  ;;  %v1860_v46 = vld [vmem:[#allocation12 + $0x2a8] sm:$0xff] }
 0x29d   : > { %3493 = vmatpush1.bf16.msra.mxu0 %v3492_v11 }
 0x29e   : > { %3495 = vmatprep.subr.bf16.mxu0 %v3494_v16  ;;  %v1638_v16 = vld [vmem:[%s4767_s16 + $0x8] sm:$0xff] }
 0x2a1   : > { %3497 = vmatpush1.bf16.msra.mxu0 %v3496_v17  ;;  %v1639_v17 = vld [vmem:[%s4767_s16 + $0x10] sm:$0xff] }
 0x2a2   : > { %3499 = vmatprep.subr.bf16.mxu0 %v3498_v18 }
 0x2a5   : > { %3501 = vmatpush1.bf16.msra.mxu0 %v3500_v23 }
 0x2a6   : > { %3503 = vmatprep.subr.bf16.mxu0 %v3502_v29 }
 0x2a9   : > { %3505 = vmatpush1.bf16.msra.mxu0 %v3504_v28 }
 0x2ac   : > { %1621 = vmatmul.mubr.f32.vlgmr.msra.gmra.mrb[0].mxu0 %v1544_v34  ;;  %v1841_v34 = vld [vmem:[#allocation12 + $0x210] sm:$0xff] }
 0x2ad   : > { %1626 = vmatprep.mubr.f32.mxu0 %v1551_v36  ;;  %v1844_v36 = vld [vmem:[#allocation12 + $0x228] sm:$0xff]  ;;  %v3572_v37 = vpack.c.bf16 %v1841_v34, %v1839_v33  ;;  %v1875_v34 = vld [vmem:[#allocation12 + $0x320] sm:$0xff] }
 0x2b0   : > { %1627 = vmatmul.mubr.f32.gmra.mrb[2].mxu0 %v1549_v43  ;;  %v1846_v43 = vld [vmem:[#allocation12 + $0x238] sm:$0xff] }
 0x2b1   : > { %v3574_v45 = vpack.c.bf16 %v1846_v43, %v1844_v36  ;;  %v1877_v36 = vld [vmem:[#allocation12 + $0x330] sm:$0xff]  ;;  %v1880_v43 = vld [vmem:[#allocation12 + $0x348] sm:$0xff] }
 0x2b2   : > { %v3608_v38 = vpack.c.bf16 %v1877_v36, %v1875_v34  ;;  %v2018_v36 = vld [vmem:[#allocation12 + $0x448] sm:$0xff] }
 0x37f   : > { %v1622_v9 = vpop.f32.mrb[0].mxu0 }
 0x380   : > { %v3954_v10 = vadd.f32 %v1622_v9, %v464_v47  ;;  %v1624_v11 = vpop.f32.mrb[1].mxu0 }
 0x381   : > { %v3955_v12 = vadd.f32 %v1624_v11, %v468_v8  ;;  %v1864_v11 = vld [vmem:[#allocation12 + $0x2c8] sm:$0xff] }
 0x382   : > { %v1641_v13 = vadd.f32 %v3954_v10, %v1637_v5  ;;  %v1859_v5 = vld [vmem:[#allocation12 + $0x2a0] sm:$0xff]  ;;  %v1861_v10 = vld [vmem:[#allocation12 + $0x2b0] sm:$0xff] }
 0x383   : > { %v1642_v14 = vadd.f32 %v3955_v12, %v1638_v16  ;;  %v1628_v15 = vpop.f32.mrb[2].mxu0  ;;  %v1866_v16 = vld [vmem:[#allocation12 + $0x2d8] sm:$0xff]  ;;  %v3592_v12 = vpack.c.bf16 %v1861_v10, %v1859_v5 }
 0x384   : > { %v1645_v18 = vmax.f32 %v1641_v13, 0.0  ;;  %v3956_v19 = vadd.f32 %v1628_v15, %v464_v47  ;;  %v1630_v20 = vpop.f32.mrb[3].mxu0  ;;  %v1862_v47 = vld [vmem:[#allocation12 + $0x2b8] sm:$0xff]  ;;  %v3594_v13 = vpack.c.bf16 %v1866_v16, %v1864_v11  ;;  %v1865_v15 = vld [vmem:[#allocation12 + $0x2d0] sm:$0xff]  ;;  %v1899_v11 = vld [vmem:[#allocation12 + $0x3e0] sm:$0xff] }
 0x385   : > { %v1646_v22 = vmax.f32 %v1642_v14, 0.0  ;;  %v3957_v23 = vadd.f32 %v1630_v20, %v468_v8  ;;  %v3588_v8 = vpack.c.bf16 %v1857_v2, %v1855_v1  ;;  %v3590_v9 = vpack.c.bf16 %v1862_v47, %v1860_v46  ;;  %v1863_v14 = vld [vmem:[#allocation12 + $0x2c0] sm:$0xff]  ;;  %v1897_v47 = vld [vmem:[#allocation12 + $0x3d0] sm:$0xff] }
 0x386   : > { %v1653_v29 = vrot.slane %v1645_v18, 5  ;;  %v1643_v24 = vadd.f32 %v3956_v19, %v1639_v17  ;;  %v1868_v17 = vld [vmem:[#allocation12 + $0x2e8] sm:$0xff]  ;;  %v1870_v18 = vld [vmem:[#allocation12 + $0x2f8] sm:$0xff]  ;;  %v3596_v19 = vpack.c.bf16 %v1865_v15, %v1863_v14  ;;  %v3624_v1 = vpack.c.bf16 %v1893_v63, %v1891_v62  ;;  %v1895_v46 = vld [vmem:[#allocation12 + $0x3c0] sm:$0xff] }
 0x387   : > { %v1654_v25 = vrot.slane %v1646_v22, 5  ;;  %v1644_v26 = vadd.f32 %v3957_v23, %v1640_v21  ;;  %v3598_v20 = vpack.c.bf16 %v1870_v18, %v1868_v17  ;;  %v1867_v21 = vld [vmem:[#allocation12 + $0x2e0] sm:$0xff]  ;;  %v1869_v22 = vld [vmem:[#allocation12 + $0x2f0] sm:$0xff]  ;;  %v1872_v23 = vld [vmem:[#allocation12 + $0x308] sm:$0xff]  ;;  %v3628_v5 = vpack.c.bf16 %v1897_v47, %v1895_v46 }
 0x388   : > { %1665 = vst [vmem:[#allocation2] sm:$0xf8] %v1653_v29  ;;  %v1647_v27 = vmax.f32 %v1643_v24, 0.0  ;;  %v3600_v24 = vpack.c.bf16 %v1869_v22, %v1867_v21  ;;  %v1901_v16 = vld [vmem:[#allocation12 + $0x3f0] sm:$0xff]  ;;  %v2014_v22 = vld [vmem:[#allocation12 + $0x428] sm:$0xff]  ;;  %v2032_v62 = vld [vmem:[#allocation12 + $0x4b8] sm:$0xff] }
 0x389   : > { %1666 = vst [vmem:[#allocation2 + $0x8] sm:$0xf8] %v1654_v25  ;;  %v1648_v28 = vmax.f32 %v1644_v26, 0.0  ;;  %v1871_v26 = vld [vmem:[#allocation12 + $0x300] sm:$0xff]  ;;  %v3632_v15 = vpack.c.bf16 %v1901_v16, %v1899_v11  ;;  %v2036_v46 = vld [vmem:[#allocation12 + $0x4d8] sm:$0xff] }
 0x38a   : > { %v1655_v30 = vrot.slane %v1647_v27, 5  ;;  %v1873_v27 = vld [vmem:[#allocation12 + $0x310] sm:$0xff]  ;;  %v2040_v11 = vld [vmem:[#allocation12 + $0x4f8] sm:$0xff] }
 0x38b   : > { %v1657_v31 = vrot.slane %v1648_v28, 5  ;;  %v1876_v28 = vld [vmem:[#allocation12 + $0x328] sm:$0xff] }
 0x38c   : > { %v4886_v32 = vsel %vm440_vm0, %v1653_v29, %v1655_v30  ;;  %1669 = vst [vmem:[#allocation2 + $0x20] sm:$0x7] %v1655_v30  ;;  %v1874_v29 = vld [vmem:[#allocation12 + $0x318] sm:$0xff] }
 0x38d   : > { %1667 = vst [vmem:[#allocation2 + $0x10] sm:$0xff] %v4886_v32  ;;  %v4890_v35 = vsel %vm440_vm0, %v1654_v25, %v1657_v31  ;;  %1670 = vst [vmem:[#allocation2 + $0x28] sm:$0x7] %v1657_v31  ;;  %v3602_v25 = vpack.c.bf16 %v1874_v29, %v1872_v23  ;;  %v1878_v30 = vld [vmem:[#allocation12 + $0x338] sm:$0xff]  ;;  %v3604_v31 = vpack.c.bf16 %v1873_v27, %v1871_v26 }
 0x38e   : > { %1668 = vst [vmem:[#allocation2 + $0x18] sm:$0xff] %v4890_v35  ;;  %v1913_v3 = vrot.slane %v4890_v35, 1  ;;  %v3606_v33 = vpack.c.bf16 %v1878_v30, %v1876_v28  ;;  %v2016_v23 = vld [vmem:[#allocation12 + $0x438] sm:$0xff]  ;;  %v2013_v30 = vld [vmem:[#allocation12 + $0x420] sm:$0xff] }
 0x38f   : > { %v1683_v44 = vld [vmem:[#allocation2] sm:$0xff]  ;;  %v3638_v28 = vpack.c.bf16 %v2016_v23, %v2014_v22  ;;  %v2048_v23 = vld [vmem:[#allocation12 + $0x538] sm:$0xff] }
 0x390   : > { %v1684_v39 = vld [vmem:[#allocation2 + $0x8] sm:$0xff]  ;;  %v1832_v14 = vld [vmem:[#allocation2] sm:$0xfe] }
 0x391   : > { %v1833_v41 = vld [vmem:[#allocation2 + $0x8] sm:$0xfe]  ;;  %1815 = vmatprep.mubr.f32.mxu1 %v1684_v39  ;;  %v1909_v21 = vrot.slane %v1832_v14, 1  ;;  %v2046_v22 = vld [vmem:[#allocation12 + $0x528] sm:$0xff] }
 0x392   : > { %1816 = vmatmul.mubr.f32.vlgmr.msra.gmra.mrb[0].mxu1 %v1683_v44  ;;  %v1912_v50 = vrot.slane %v1833_v41, 1  ;;  %v1884_v41 = vld [vmem:[#allocation12 + $0x368] sm:$0xff]  ;;  %v1886_v44 = vld [vmem:[#allocation12 + $0x378] sm:$0xff]  ;;  %v2039_v14 = vld [vmem:[#allocation12 + $0x4f0] sm:$0xff] }
 0x393   : > { %3573 = vmatpush1.bf16.msra.mxu1 %v3572_v37  ;;  %1821 = vmatprep.mubr.f32.mxu1 %v4890_v35  ;;  %v1882_v37 = vld [vmem:[#allocation12 + $0x358] sm:$0xff]  ;;  %v3614_v49 = vpack.c.bf16 %v1886_v44, %v1884_v41  ;;  %v2017_v41 = vld [vmem:[#allocation12 + $0x440] sm:$0xff]  ;;  %v2019_v44 = vld [vmem:[#allocation12 + $0x450] sm:$0xff] }
 0x394   : > { %3575 = vmatprep.subr.bf16.mxu1 %v3574_v45  ;;  %v1914_v56 = vsel %vm697_vm1, %v1912_v50, %v1913_v3  ;;  %v3610_v39 = vpack.c.bf16 %v1882_v37, %v1880_v43  ;;  %v1879_v45 = vld [vmem:[#allocation12 + $0x340] sm:$0xff]  ;;  %v1837_v17 = vld [vmem:[#allocation2 + $0x28] sm:$0x1]  ;;  %v2005_v27 = vld [vmem:[#allocation2 + $0x8] sm:$0xfc] }
 0x395   : > { %v3612_v48 = vpack.c.bf16 %v1881_v40, %v1879_v45  ;;  %v1883_v50 = vld [vmem:[#allocation12 + $0x360] sm:$0xff]  ;;  %v1917_v29 = vrot.slane %v1837_v17, 1  ;;  %v2020_v43 = vld [vmem:[#allocation12 + $0x458] sm:$0xff]  ;;  %v2081_v45 = vrot.slane %v4890_v35, 2 }
 0x396   : > { %1822 = vmatmul.mubr.f32.gmra.mrb[2].mxu1 %v4886_v32  ;;  %v3642_v40 = vpack.c.bf16 %v2020_v43, %v2018_v36  ;;  %v2044_v17 = vld [vmem:[#allocation12 + $0x518] sm:$0xff]  ;;  %v2054_v36 = vld [vmem:[#allocation12 + $0x568] sm:$0xff] }
 0x397   : > { %3577 = vmatpush1.bf16.msra.mxu1 %v3576_v53  ;;  %1987 = vmatprep.mubr.f32.mxu1 %v1914_v56  ;;  %v1885_v53 = vld [vmem:[#allocation12 + $0x370] sm:$0xff]  ;;  %v1918_v37 = vsel %vm697_vm1, %v1913_v3, %v1917_v29  ;;  %v3644_v3 = vpack.c.bf16 %v2019_v44, %v2017_v41  ;;  %v2056_v43 = vld [vmem:[#allocation12 + $0x578] sm:$0xff]  ;;  %v2058_v41 = vld [vmem:[#allocation12 + $0x588] sm:$0xff] }
 0x398   : > { %3579 = vmatprep.subr.bf16.mxu1 %v3578_v51  ;;  %v1888_v51 = vld [vmem:[#allocation12 + $0x388] sm:$0xff]  ;;  %v3616_v54 = vpack.c.bf16 %v1885_v53, %v1883_v50  ;;  %v1889_v56 = vld [vmem:[#allocation12 + $0x390] sm:$0xff]  ;;  %v2024_v50 = vld [vmem:[#allocation12 + $0x478] sm:$0xff] }
 0x399   : > { %v3618_v61 = vpack.c.bf16 %v1890_v52, %v1888_v51  ;;  %v3620_v59 = vpack.c.bf16 %v1889_v56, %v1887_v55  ;;  %v2021_v52 = vld [vmem:[#allocation12 + $0x460] sm:$0xff]  ;;  %v2028_v55 = vld [vmem:[#allocation12 + $0x498] sm:$0xff] }
 0x39a   : > { %v2060_v44 = vld [vmem:[#allocation12 + $0x598] sm:$0xff] }
 0x39b   : > { %3581 = vmatpush1.bf16.msra.mxu1 %v3580_v57  ;;  %v1892_v57 = vld [vmem:[#allocation12 + $0x3a8] sm:$0xff] }
 0x39c   : > { %3583 = vmatprep.subr.bf16.mxu1 %v3582_v58  ;;  %v1894_v58 = vld [vmem:[#allocation12 + $0x3b8] sm:$0xff] }
 0x39d   : > { %v3622_v60 = vpack.c.bf16 %v1894_v58, %v1892_v57  ;;  %v2025_v58 = vld [vmem:[#allocation12 + $0x480] sm:$0xff] }
 0x39f   : > { %3585 = vmatpush1.bf16.msra.mxu1 %v3584_v42  ;;  %v1896_v42 = vld [vmem:[#allocation12 + $0x3c8] sm:$0xff] }
 0x3a0   : > { %3587 = vmatprep.subr.bf16.mxu1 %v3586_v0  ;;  %v1898_v0 = vld [vmem:[#allocation12 + $0x3d8] sm:$0xff] }
 0x3a1   : > { %v3626_v2 = vpack.c.bf16 %v1898_v0, %v1896_v42  ;;  %v2029_v0 = vld [vmem:[#allocation12 + $0x4a0] sm:$0xff] }
 0x3a3   : > { %3589 = vmatpush1.bf16.msra.mxu1 %v3588_v8  ;;  %v1900_v8 = vld [vmem:[#allocation12 + $0x3e8] sm:$0xff] }
 0x3a4   : > { %3591 = vmatprep.subr.bf16.mxu1 %v3590_v9  ;;  %v1902_v9 = vld [vmem:[#allocation12 + $0x3f8] sm:$0xff] }
 0x3a5   : > { %v3630_v10 = vpack.c.bf16 %v1902_v9, %v1900_v8  ;;  %v2033_v9 = vld [vmem:[#allocation12 + $0x4c0] sm:$0xff] }
 0x3a7   : > { %3593 = vmatpush1.bf16.msra.mxu1 %v3592_v12  ;;  %v2010_v12 = vld [vmem:[#allocation12 + $0x408] sm:$0xff] }
 0x3a8   : > { %3595 = vmatprep.subr.bf16.mxu1 %v3594_v13  ;;  %v2012_v13 = vld [vmem:[#allocation12 + $0x418] sm:$0xff] }
 0x3a9   : > { %v3634_v18 = vpack.c.bf16 %v2012_v13, %v2010_v12  ;;  %v2037_v13 = vld [vmem:[#allocation12 + $0x4e0] sm:$0xff] }
 0x3ab   : > { %3597 = vmatpush1.bf16.msra.mxu1 %v3596_v19  ;;  %v2009_v19 = vld [vmem:[#allocation12 + $0x400] sm:$0xff] }
 0x3ac   : > { %3599 = vmatprep.subr.bf16.mxu1 %v3598_v20  ;;  %v2011_v20 = vld [vmem:[#allocation12 + $0x410] sm:$0xff] }
 0x3ad   : > { %v3636_v26 = vpack.c.bf16 %v2011_v20, %v2009_v19  ;;  %v2041_v20 = vld [vmem:[#allocation12 + $0x500] sm:$0xff] }
 0x3af   : > { %3601 = vmatpush1.bf16.msra.mxu1 %v3600_v24  ;;  %v1836_v24 = vld [vmem:[#allocation2 + $0x20] sm:$0x1] }
 0x3b0   : > { %3603 = vmatprep.subr.bf16.mxu1 %v3602_v25  ;;  %v1910_v25 = vrot.slane %v4886_v32, 1  ;;  %v1915_v34 = vrot.slane %v1836_v24, 1  ;;  %v3670_v24 = vpack.c.bf16 %v2048_v23, %v2046_v22  ;;  %v2181_v23 = vld [vmem:[#allocation12 + $0x620] sm:$0xff] }
 0x3b3   : > { %3605 = vmatpush1.bf16.msra.mxu1 %v3604_v31  ;;  %v2015_v31 = vld [vmem:[#allocation12 + $0x430] sm:$0xff] }
 0x3b4   : > { %3607 = vmatprep.subr.bf16.mxu1 %v3606_v33  ;;  %v1911_v33 = vsel %vm697_vm1, %v1909_v21, %v1910_v25  ;;  %v2043_v21 = vld [vmem:[#allocation12 + $0x510] sm:$0xff] }
 0x3b5   : > { %v3668_v29 = vpack.c.bf16 %v2043_v21, %v2041_v20  ;;  %v2173_v21 = vld [vmem:[#allocation2 + $0x8] sm:$0xf8] }
 0x3b7   : > { %3609 = vmatpush1.bf16.msra.mxu1 %v3608_v38  ;;  %v2080_v38 = vrot.slane %v2005_v27, 2  ;;  %v2050_v27 = vld [vmem:[#allocation12 + $0x548] sm:$0xff] }
 0x3b8   : > { %3611 = vmatprep.subr.bf16.mxu1 %v3610_v39  ;;  %v3640_v39 = vpack.c.bf16 %v2015_v31, %v2013_v30 }
 0x3b9   : > { %v2082_v53 = vsel %vm866_vm2, %v2080_v38, %v2081_v45  ;;  %v3678_v38 = vpack.c.bf16 %v2056_v43, %v2054_v36  ;;  %v2185_v36 = vld [vmem:[#allocation12 + $0x640] sm:$0xff]  ;;  %v2187_v43 = vld [vmem:[#allocation12 + $0x650] sm:$0xff] }
 0x3bb   : > { %3613 = vmatpush1.bf16.msra.mxu1 %v3612_v48  ;;  %v1916_v48 = vsel %vm697_vm1, %v1910_v25, %v1915_v34  ;;  %v2045_v25 = vld [vmem:[#allocation12 + $0x520] sm:$0xff]  ;;  %v2051_v34 = vld [vmem:[#allocation12 + $0x550] sm:$0xff] }
 0x3bc   : > { %3615 = vmatprep.subr.bf16.mxu1 %v3614_v49  ;;  %v2022_v49 = vld [vmem:[#allocation12 + $0x468] sm:$0xff] }
 0x3bd   : > { %v3646_v51 = vpack.c.bf16 %v2024_v50, %v2022_v49  ;;  %v3682_v49 = vpack.c.bf16 %v2060_v44, %v2058_v41  ;;  %v2057_v50 = vld [vmem:[#allocation12 + $0x580] sm:$0xff] }
 0x3be   : > { %v2189_v44 = vld [vmem:[#allocation12 + $0x660] sm:$0xff] }
 0x3bf   : > { %3617 = vmatpush1.bf16.msra.mxu1 %v3616_v54  ;;  %v2023_v54 = vld [vmem:[#allocation12 + $0x470] sm:$0xff] }
 0x3c0   : > { %3619 = vmatprep.subr.bf16.mxu1 %v3618_v61  ;;  %v2026_v61 = vld [vmem:[#allocation12 + $0x488] sm:$0xff]  ;;  %v3648_v56 = vpack.c.bf16 %v2023_v54, %v2021_v52 }
 0x3c1   : > { %v3650_v57 = vpack.c.bf16 %v2028_v55, %v2026_v61  ;;  %v2061_v61 = vld [vmem:[#allocation12 + $0x5a0] sm:$0xff]  ;;  %v2063_v55 = vld [vmem:[#allocation12 + $0x5b0] sm:$0xff] }
 0x3c3   : > { %3621 = vmatpush1.bf16.msra.mxu1 %v3620_v59  ;;  %v2027_v59 = vld [vmem:[#allocation12 + $0x490] sm:$0xff] }
 0x3c4   : > { %3623 = vmatprep.subr.bf16.mxu1 %v3622_v60  ;;  %v2030_v60 = vld [vmem:[#allocation12 + $0x4a8] sm:$0xff]  ;;  %v3652_v63 = vpack.c.bf16 %v2027_v59, %v2025_v58  ;;  %v3688_v58 = vpack.c.bf16 %v2063_v55, %v2061_v61  ;;  %v2200_v61 = vld [vmem:[#allocation12 + $0x6b8] sm:$0xff] }
 0x3c5   : > { %v3654_v42 = vpack.c.bf16 %v2032_v62, %v2030_v60  ;;  %v2065_v60 = vld [vmem:[#allocation12 + $0x5c0] sm:$0xff]  ;;  %v2067_v62 = vld [vmem:[#allocation12 + $0x5d0] sm:$0xff] }
 0x3c7   : > { %3625 = vmatpush1.bf16.msra.mxu1 %v3624_v1  ;;  %v2031_v1 = vld [vmem:[#allocation12 + $0x4b0] sm:$0xff] }
 0x3c8   : > { %3627 = vmatprep.subr.bf16.mxu1 %v3626_v2  ;;  %v2034_v2 = vld [vmem:[#allocation12 + $0x4c8] sm:$0xff]  ;;  %v3656_v47 = vpack.c.bf16 %v2031_v1, %v2029_v0  ;;  %v3692_v0 = vpack.c.bf16 %v2067_v62, %v2065_v60  ;;  %v2204_v60 = vld [vmem:[#allocation12 + $0x6d8] sm:$0xff] }
 0x3c9   : > { %v3658_v8 = vpack.c.bf16 %v2036_v46, %v2034_v2  ;;  %v2069_v2 = vld [vmem:[#allocation12 + $0x5e0] sm:$0xff]  ;;  %v2071_v46 = vld [vmem:[#allocation12 + $0x5f0] sm:$0xff] }
 0x3cb   : > { %3629 = vmatpush1.bf16.msra.mxu1 %v3628_v5  ;;  %v2035_v5 = vld [vmem:[#allocation12 + $0x4d0] sm:$0xff] }
 0x3cc   : > { %3631 = vmatprep.subr.bf16.mxu1 %v3630_v10  ;;  %v2038_v10 = vld [vmem:[#allocation12 + $0x4e8] sm:$0xff]  ;;  %v3660_v16 = vpack.c.bf16 %v2035_v5, %v2033_v9  ;;  %v2004_v9 = vld [vmem:[#allocation2] sm:$0xfc]  ;;  %v3696_v5 = vpack.c.bf16 %v2071_v46, %v2069_v2  ;;  %v2208_v2 = vld [vmem:[#allocation12 + $0x6f8] sm:$0xff] }
 0x3cd   : > { %v3662_v12 = vpack.c.bf16 %v2040_v11, %v2038_v10  ;;  %v2007_v10 = vld [vmem:[#allocation2 + $0x28] sm:$0x3] }
 0x3cf   : > { %3633 = vmatpush1.bf16.msra.mxu1 %v3632_v15  ;;  %v2042_v15 = vld [vmem:[#allocation12 + $0x508] sm:$0xff] }
 0x3d0   : > { %3635 = vmatprep.subr.bf16.mxu1 %v3634_v18  ;;  %v3664_v18 = vpack.c.bf16 %v2039_v14, %v2037_v13  ;;  %v3666_v19 = vpack.c.bf16 %v2044_v17, %v2042_v15  ;;  %v2077_v13 = vrot.slane %v2004_v9, 2  ;;  %v2182_v14 = vld [vmem:[#allocation12 + $0x628] sm:$0xff]  ;;  %v2184_v15 = vld [vmem:[#allocation12 + $0x638] sm:$0xff]  ;;  %v2085_v17 = vrot.slane %v2007_v10, 2  ;;  %v2207_v9 = vld [vmem:[#allocation12 + $0x6f0] sm:$0xff] }
 0x3d1   : > { %v3702_v22 = vpack.c.bf16 %v2184_v15, %v2182_v14  ;;  %v2212_v10 = vld [vmem:[#allocation12 + $0x718] sm:$0xff]  ;;  %v2214_v14 = vld [vmem:[#allocation12 + $0x728] sm:$0xff] }
 0x3d2   : > { %1988 = vmatmul.mubr.f32.vlgmr.msra.gmra.mrb[0].mxu1 %v1911_v33  ;;  %v2049_v33 = vld [vmem:[#allocation12 + $0x540] sm:$0xff]  ;;  %v2216_v15 = vld [vmem:[#allocation12 + $0x738] sm:$0xff] }
 0x3d3   : > { %1993 = vmatprep.mubr.f32.mxu1 %v1918_v37  ;;  %3637 = vmatpush1.bf16.msra.mxu1 %v3636_v26  ;;  %v2047_v26 = vld [vmem:[#allocation12 + $0x530] sm:$0xff]  ;;  %v3676_v37 = vpack.c.bf16 %v2051_v34, %v2049_v33  ;;  %v2249_v33 = vrot.slane %v4890_v35, 3 }
 0x3d4   : > { %3639 = vmatprep.subr.bf16.mxu1 %v3638_v28  ;;  %v2052_v28 = vld [vmem:[#allocation12 + $0x558] sm:$0xff]  ;;  %v3672_v30 = vpack.c.bf16 %v2047_v26, %v2045_v25  ;;  %v2186_v26 = vld [vmem:[#allocation12 + $0x648] sm:$0xff] }
 0x3d5   : > { %v3674_v31 = vpack.c.bf16 %v2052_v28, %v2050_v27  ;;  %v2188_v27 = vld [vmem:[#allocation12 + $0x658] sm:$0xff]  ;;  %v2086_v28 = vsel %vm866_vm2, %v2081_v45, %v2085_v17  ;;  %v3708_v45 = vpack.c.bf16 %v2187_v43, %v2185_v36  ;;  %v2226_v36 = vld [vmem:[#allocation12 + $0x788] sm:$0xff] }
 0x3d6   : > { %1994 = vmatmul.mubr.f32.gmra.mrb[2].mxu1 %v1916_v48  ;;  %v3706_v34 = vpack.c.bf16 %v2188_v27, %v2186_v26  ;;  %v2222_v26 = vld [vmem:[#allocation12 + $0x768] sm:$0xff]  ;;  %v2224_v27 = vld [vmem:[#allocation12 + $0x778] sm:$0xff] }
 0x3d7   : > { %3641 = vmatpush1.bf16.msra.mxu1 %v3640_v39  ;;  %2155 = vmatprep.mubr.f32.mxu1 %v2082_v53  ;;  %v2053_v39 = vld [vmem:[#allocation12 + $0x560] sm:$0xff]  ;;  %v2059_v53 = vld [vmem:[#allocation12 + $0x590] sm:$0xff]  ;;  %v2228_v43 = vld [vmem:[#allocation12 + $0x798] sm:$0xff] }
 0x3d8   : > { %3643 = vmatprep.subr.bf16.mxu1 %v3642_v40  ;;  %v2055_v40 = vld [vmem:[#allocation12 + $0x570] sm:$0xff]  ;;  %v3684_v52 = vpack.c.bf16 %v2059_v53, %v2057_v50  ;;  %v2196_v50 = vld [vmem:[#allocation12 + $0x698] sm:$0xff] }
 0x3d9   : > { %v3680_v48 = vpack.c.bf16 %v2055_v40, %v2053_v39  ;;  %v2192_v39 = vld [vmem:[#allocation12 + $0x678] sm:$0xff] }
 0x3db   : > { %3645 = vmatpush1.bf16.msra.mxu1 %v3644_v3  ;;  %v2062_v3 = vld [vmem:[#allocation12 + $0x5a8] sm:$0xff] }
 0x3dc   : > { %3647 = vmatprep.subr.bf16.mxu1 %v3646_v51  ;;  %v2064_v51 = vld [vmem:[#allocation12 + $0x5b8] sm:$0xff] }
 0x3dd   : > { %v3686_v54 = vpack.c.bf16 %v2064_v51, %v2062_v3  ;;  %v2193_v51 = vld [vmem:[#allocation12 + $0x680] sm:$0xff] }
 0x3df   : > { %3649 = vmatpush1.bf16.msra.mxu1 %v3648_v56  ;;  %v2066_v56 = vld [vmem:[#allocation12 + $0x5c8] sm:$0xff] }
 0x3e0   : > { %3651 = vmatprep.subr.bf16.mxu1 %v3650_v57  ;;  %v2068_v57 = vld [vmem:[#allocation12 + $0x5d8] sm:$0xff] }
 0x3e1   : > { %v3690_v59 = vpack.c.bf16 %v2068_v57, %v2066_v56  ;;  %v2197_v57 = vld [vmem:[#allocation12 + $0x6a0] sm:$0xff] }
 0x3e3   : > { %3653 = vmatpush1.bf16.msra.mxu1 %v3652_v63  ;;  %v2070_v63 = vld [vmem:[#allocation12 + $0x5e8] sm:$0xff] }
 0x3e4   : > { %3655 = vmatprep.subr.bf16.mxu1 %v3654_v42  ;;  %v2072_v42 = vld [vmem:[#allocation12 + $0x5f8] sm:$0xff] }
 0x3e5   : > { %v3694_v1 = vpack.c.bf16 %v2072_v42, %v2070_v63  ;;  %v2201_v42 = vld [vmem:[#allocation12 + $0x6c0] sm:$0xff] }
 0x3e7   : > { %3657 = vmatpush1.bf16.msra.mxu1 %v3656_v47  ;;  %v2178_v47 = vld [vmem:[#allocation12 + $0x608] sm:$0xff] }
 0x3e8   : > { %3659 = vmatprep.subr.bf16.mxu1 %v3658_v8  ;;  %v2180_v8 = vld [vmem:[#allocation12 + $0x618] sm:$0xff] }
 0x3e9   : > { %v3698_v11 = vpack.c.bf16 %v2180_v8, %v2178_v47  ;;  %v2205_v8 = vld [vmem:[#allocation12 + $0x6e0] sm:$0xff] }
 0x3eb   : > { %3661 = vmatpush1.bf16.msra.mxu1 %v3660_v16  ;;  %v2177_v16 = vld [vmem:[#allocation12 + $0x600] sm:$0xff] }
 0x3ec   : > { %3663 = vmatprep.subr.bf16.mxu1 %v3662_v12  ;;  %v2179_v12 = vld [vmem:[#allocation12 + $0x610] sm:$0xff] }
 0x3ed   : > { %v3700_v20 = vpack.c.bf16 %v2179_v12, %v2177_v16  ;;  %v2209_v12 = vld [vmem:[#allocation12 + $0x700] sm:$0xff] }
 0x3ef   : > { %3665 = vmatpush1.bf16.msra.mxu1 %v3664_v18  ;;  %v2006_v18 = vld [vmem:[#allocation2 + $0x20] sm:$0x3] }
 0x3f0   : > { %3667 = vmatprep.subr.bf16.mxu1 %v3666_v19  ;;  %v2078_v19 = vrot.slane %v4886_v32, 2  ;;  %v2083_v25 = vrot.slane %v2006_v18, 2  ;;  %v3734_v18 = vpack.c.bf16 %v2216_v15, %v2214_v14  ;;  %v2349_v15 = vld [vmem:[#allocation12 + $0x820] sm:$0xff] }
 0x3f3   : > { %3669 = vmatpush1.bf16.msra.mxu1 %v3668_v29  ;;  %v2183_v29 = vld [vmem:[#allocation12 + $0x630] sm:$0xff] }
 0x3f4   : > { %3671 = vmatprep.subr.bf16.mxu1 %v3670_v24  ;;  %v2079_v24 = vsel %vm866_vm2, %v2077_v13, %v2078_v19  ;;  %v2211_v13 = vld [vmem:[#allocation12 + $0x710] sm:$0xff] }
 0x3f5   : > { %v3732_v17 = vpack.c.bf16 %v2211_v13, %v2209_v12  ;;  %v2341_v13 = vld [vmem:[#allocation2 + $0x8] sm:$0xf0] }
 0x3f7   : > { %3673 = vmatpush1.bf16.msra.mxu1 %v3672_v30  ;;  %v2248_v30 = vrot.slane %v2173_v21, 3  ;;  %v2218_v21 = vld [vmem:[#allocation12 + $0x748] sm:$0xff] }
 0x3f8   : > { %3675 = vmatprep.subr.bf16.mxu1 %v3674_v31  ;;  %v3704_v31 = vpack.c.bf16 %v2183_v29, %v2181_v23 }
 0x3f9   : > { %v2250_v40 = vsel %vm1035_vm3, %v2248_v30, %v2249_v33  ;;  %v3742_v30 = vpack.c.bf16 %v2224_v27, %v2222_v26  ;;  %v2355_v26 = vld [vmem:[#allocation12 + $0x850] sm:$0xff] }
 0x3fb   : > { %3677 = vmatpush1.bf16.msra.mxu1 %v3676_v37  ;;  %v2084_v37 = vsel %vm866_vm2, %v2078_v19, %v2083_v25  ;;  %v2213_v19 = vld [vmem:[#allocation12 + $0x720] sm:$0xff]  ;;  %v2219_v25 = vld [vmem:[#allocation12 + $0x750] sm:$0xff] }
 0x3fc   : > { %3679 = vmatprep.subr.bf16.mxu1 %v3678_v38  ;;  %v2190_v38 = vld [vmem:[#allocation12 + $0x668] sm:$0xff] }
 0x3fd   : > { %v3710_v41 = vpack.c.bf16 %v2192_v39, %v2190_v38  ;;  %v3746_v38 = vpack.c.bf16 %v2228_v43, %v2226_v36  ;;  %v2225_v39 = vld [vmem:[#allocation12 + $0x780] sm:$0xff]  ;;  %v2359_v43 = vld [vmem:[#allocation12 + $0x870] sm:$0xff] }
 0x3fe   : > { %v2357_v36 = vld [vmem:[#allocation12 + $0x860] sm:$0xff] }
 0x3ff   : > { %3681 = vmatpush1.bf16.msra.mxu1 %v3680_v48  ;;  %v2191_v48 = vld [vmem:[#allocation12 + $0x670] sm:$0xff] }
 0x400   : > { %3683 = vmatprep.subr.bf16.mxu1 %v3682_v49  ;;  %v2194_v49 = vld [vmem:[#allocation12 + $0x688] sm:$0xff]  ;;  %v3712_v53 = vpack.c.bf16 %v2191_v48, %v2189_v44 }
 0x401   : > { %v3714_v3 = vpack.c.bf16 %v2196_v50, %v2194_v49  ;;  %v2229_v49 = vld [vmem:[#allocation12 + $0x7a0] sm:$0xff]  ;;  %v2231_v50 = vld [vmem:[#allocation12 + $0x7b0] sm:$0xff] }
 0x403   : > { %3685 = vmatpush1.bf16.msra.mxu1 %v3684_v52  ;;  %v2195_v52 = vld [vmem:[#allocation12 + $0x690] sm:$0xff] }
 0x404   : > { %3687 = vmatprep.subr.bf16.mxu1 %v3686_v54  ;;  %v2198_v54 = vld [vmem:[#allocation12 + $0x6a8] sm:$0xff]  ;;  %v3716_v55 = vpack.c.bf16 %v2195_v52, %v2193_v51  ;;  %v3752_v51 = vpack.c.bf16 %v2231_v50, %v2229_v49 }
 0x405   : > { %v3718_v56 = vpack.c.bf16 %v2200_v61, %v2198_v54  ;;  %v2233_v54 = vld [vmem:[#allocation12 + $0x7c0] sm:$0xff]  ;;  %v2235_v61 = vld [vmem:[#allocation12 + $0x7d0] sm:$0xff] }
 0x407   : > { %3689 = vmatpush1.bf16.msra.mxu1 %v3688_v58  ;;  %v2199_v58 = vld [vmem:[#allocation12 + $0x6b0] sm:$0xff] }
 0x408   : > { %3691 = vmatprep.subr.bf16.mxu1 %v3690_v59  ;;  %v2202_v59 = vld [vmem:[#allocation12 + $0x6c8] sm:$0xff]  ;;  %v3720_v62 = vpack.c.bf16 %v2199_v58, %v2197_v57  ;;  %v3756_v57 = vpack.c.bf16 %v2235_v61, %v2233_v54 }
 0x409   : > { %v3722_v63 = vpack.c.bf16 %v2204_v60, %v2202_v59  ;;  %v2237_v59 = vld [vmem:[#allocation12 + $0x7e0] sm:$0xff]  ;;  %v2239_v60 = vld [vmem:[#allocation12 + $0x7f0] sm:$0xff] }
 0x40b   : > { %3693 = vmatpush1.bf16.msra.mxu1 %v3692_v0  ;;  %v2203_v0 = vld [vmem:[#allocation12 + $0x6d0] sm:$0xff] }
 0x40c   : > { %3695 = vmatprep.subr.bf16.mxu1 %v3694_v1  ;;  %v2206_v1 = vld [vmem:[#allocation12 + $0x6e8] sm:$0xff]  ;;  %v3724_v46 = vpack.c.bf16 %v2203_v0, %v2201_v42  ;;  %v2172_v42 = vld [vmem:[#allocation2] sm:$0xf8]  ;;  %v3760_v0 = vpack.c.bf16 %v2239_v60, %v2237_v59 }
 0x40d   : > { %v3726_v47 = vpack.c.bf16 %v2208_v2, %v2206_v1  ;;  %v2175_v1 = vld [vmem:[#allocation2 + $0x28] sm:$0x7] }
 0x40f   : > { %3697 = vmatpush1.bf16.msra.mxu1 %v3696_v5  ;;  %v2210_v5 = vld [vmem:[#allocation12 + $0x708] sm:$0xff] }
 0x410   : > { %3699 = vmatprep.subr.bf16.mxu1 %v3698_v11  ;;  %v3728_v11 = vpack.c.bf16 %v2207_v9, %v2205_v8  ;;  %v3730_v16 = vpack.c.bf16 %v2212_v10, %v2210_v5  ;;  %v2245_v8 = vrot.slane %v2172_v42, 3  ;;  %v2350_v9 = vld [vmem:[#allocation12 + $0x828] sm:$0xff]  ;;  %v2352_v5 = vld [vmem:[#allocation12 + $0x838] sm:$0xff]  ;;  %v2253_v10 = vrot.slane %v2175_v1, 3 }
 0x411   : > { %v3766_v14 = vpack.c.bf16 %v2352_v5, %v2350_v9  ;;  %v2378_v42 = vld [vmem:[#allocation12 + $0x908] sm:$0xff]  ;;  %v2384_v9 = vld [vmem:[#allocation12 + $0x938] sm:$0xff] }
 0x412   : > { %2156 = vmatmul.mubr.f32.vlgmr.msra.gmra.mrb[0].mxu1 %v2079_v24  ;;  %v2217_v24 = vld [vmem:[#allocation12 + $0x740] sm:$0xff] }
 0x413   : > { %2161 = vmatprep.mubr.f32.mxu1 %v2086_v28  ;;  %3701 = vmatpush1.bf16.msra.mxu1 %v3700_v20  ;;  %v2215_v20 = vld [vmem:[#allocation12 + $0x730] sm:$0xff]  ;;  %v3740_v28 = vpack.c.bf16 %v2219_v25, %v2217_v24  ;;  %v2353_v25 = vld [vmem:[#allocation12 + $0x840] sm:$0xff] }
 0x414   : > { %3703 = vmatprep.subr.bf16.mxu1 %v3702_v22  ;;  %v2220_v22 = vld [vmem:[#allocation12 + $0x758] sm:$0xff]  ;;  %v3736_v23 = vpack.c.bf16 %v2215_v20, %v2213_v19  ;;  %v2354_v20 = vld [vmem:[#allocation12 + $0x848] sm:$0xff] }
 0x415   : > { %v3738_v29 = vpack.c.bf16 %v2220_v22, %v2218_v21  ;;  %v2356_v21 = vld [vmem:[#allocation12 + $0x858] sm:$0xff]  ;;  %v2254_v22 = vsel %vm1035_vm3, %v2249_v33, %v2253_v10  ;;  %v3772_v33 = vpack.c.bf16 %v2355_v26, %v2353_v25 }
 0x416   : > { %2162 = vmatmul.mubr.f32.gmra.mrb[2].mxu1 %v2084_v37  ;;  %v3770_v24 = vpack.c.bf16 %v2356_v21, %v2354_v20  ;;  %v2392_v20 = vld [vmem:[#allocation12 + $0x978] sm:$0xff] }
 0x417   : > { %3705 = vmatpush1.bf16.msra.mxu1 %v3704_v31  ;;  %2323 = vmatprep.mubr.f32.mxu1 %v2250_v40  ;;  %v2221_v31 = vld [vmem:[#allocation12 + $0x760] sm:$0xff]  ;;  %v2227_v40 = vld [vmem:[#allocation12 + $0x790] sm:$0xff]  ;;  %v2396_v25 = vld [vmem:[#allocation12 + $0x998] sm:$0xff] }
 0x418   : > { %3707 = vmatprep.subr.bf16.mxu1 %v3706_v34  ;;  %v2223_v34 = vld [vmem:[#allocation12 + $0x770] sm:$0xff]  ;;  %v3748_v44 = vpack.c.bf16 %v2227_v40, %v2225_v39  ;;  %v3776_v39 = vpack.c.bf16 %v2359_v43, %v2357_v36  ;;  %v2397_v43 = vld [vmem:[#allocation12 + $0x9a0] sm:$0xff] }
 0x419   : > { %v3744_v37 = vpack.c.bf16 %v2223_v34, %v2221_v31 }
 0x41b   : > { %3709 = vmatpush1.bf16.msra.mxu1 %v3708_v45  ;;  %v2230_v45 = vld [vmem:[#allocation12 + $0x7a8] sm:$0xff] }
 0x41c   : > { %3711 = vmatprep.subr.bf16.mxu1 %v3710_v41  ;;  %v2232_v41 = vld [vmem:[#allocation12 + $0x7b8] sm:$0xff] }
 0x41d   : > { %v3750_v48 = vpack.c.bf16 %v2232_v41, %v2230_v45  ;;  %v2361_v45 = vld [vmem:[#allocation12 + $0x880] sm:$0xff]  ;;  %v2363_v41 = vld [vmem:[#allocation12 + $0x890] sm:$0xff] }
 0x41e   : > { %v3780_v49 = vpack.c.bf16 %v2363_v41, %v2361_v45  ;;  %v2401_v41 = vld [vmem:[#allocation12 + $0x9c0] sm:$0xff] }
 0x41f   : > { %3713 = vmatpush1.bf16.msra.mxu1 %v3712_v53  ;;  %v2234_v53 = vld [vmem:[#allocation12 + $0x7c8] sm:$0xff] }
 0x420   : > { %3715 = vmatprep.subr.bf16.mxu1 %v3714_v3  ;;  %v2236_v3 = vld [vmem:[#allocation12 + $0x7d8] sm:$0xff] }
 0x421   : > { %v3754_v52 = vpack.c.bf16 %v2236_v3, %v2234_v53  ;;  %v2365_v53 = vld [vmem:[#allocation12 + $0x8a0] sm:$0xff]  ;;  %v2367_v3 = vld [vmem:[#allocation12 + $0x8b0] sm:$0xff] }
 0x422   : > { %v3784_v54 = vpack.c.bf16 %v2367_v3, %v2365_v53  ;;  %v2405_v3 = vld [vmem:[#allocation12 + $0x9e0] sm:$0xff] }
 0x423   : > { %3717 = vmatpush1.bf16.msra.mxu1 %v3716_v55  ;;  %v2238_v55 = vld [vmem:[#allocation12 + $0x7e8] sm:$0xff] }
 0x424   : > { %3719 = vmatprep.subr.bf16.mxu1 %v3718_v56  ;;  %v2240_v56 = vld [vmem:[#allocation12 + $0x7f8] sm:$0xff] }
 0x425   : > { %v3758_v58 = vpack.c.bf16 %v2240_v56, %v2238_v55  ;;  %v2369_v55 = vld [vmem:[#allocation12 + $0x8c0] sm:$0xff]  ;;  %v2371_v56 = vld [vmem:[#allocation12 + $0x8d0] sm:$0xff] }
 0x426   : > { %v3788_v59 = vpack.c.bf16 %v2371_v56, %v2369_v55  ;;  %v2343_v56 = vld [vmem:[#allocation2 + $0x28] sm:$0xf] }
 0x427   : > { %3721 = vmatpush1.bf16.msra.mxu1 %v3720_v62  ;;  %v2346_v62 = vld [vmem:[#allocation12 + $0x808] sm:$0xff] }
 0x428   : > { %3723 = vmatprep.subr.bf16.mxu1 %v3722_v63  ;;  %v2348_v63 = vld [vmem:[#allocation12 + $0x818] sm:$0xff] }
 0x429   : > { %v3762_v2 = vpack.c.bf16 %v2348_v63, %v2346_v62  ;;  %v2373_v62 = vld [vmem:[#allocation12 + $0x8e0] sm:$0xff]  ;;  %v2375_v63 = vld [vmem:[#allocation12 + $0x8f0] sm:$0xff] }
 0x42a   : > { %v3792_v1 = vpack.c.bf16 %v2375_v63, %v2373_v62  ;;  %v2518_v62 = vld [vmem:[#allocation12 + $0xa28] sm:$0xff]  ;;  %v2520_v63 = vld [vmem:[#allocation12 + $0xa38] sm:$0xff] }
 0x42b   : > { %3725 = vmatpush1.bf16.msra.mxu1 %v3724_v46  ;;  %v2345_v46 = vld [vmem:[#allocation12 + $0x800] sm:$0xff] }
 0x42c   : > { %3727 = vmatprep.subr.bf16.mxu1 %v3726_v47  ;;  %v2347_v47 = vld [vmem:[#allocation12 + $0x810] sm:$0xff] }
 0x42d   : > { %v3764_v12 = vpack.c.bf16 %v2347_v47, %v2345_v46  ;;  %v2377_v46 = vld [vmem:[#allocation12 + $0x900] sm:$0xff]  ;;  %v2379_v47 = vld [vmem:[#allocation12 + $0x910] sm:$0xff] }
 0x42e   : > { %v3796_v5 = vpack.c.bf16 %v2379_v47, %v2377_v46  ;;  %v2509_v47 = vld [vmem:[#allocation2 + $0x8] sm:$0xe0] }
 0x42f   : > { %3729 = vmatpush1.bf16.msra.mxu1 %v3728_v11  ;;  %v2174_v11 = vld [vmem:[#allocation2 + $0x20] sm:$0x7] }
 0x430   : > { %3731 = vmatprep.subr.bf16.mxu1 %v3730_v16  ;;  %v2246_v16 = vrot.slane %v4886_v32, 3  ;;  %v2251_v19 = vrot.slane %v2174_v11, 3  ;;  %v2381_v11 = vld [vmem:[#allocation12 + $0x920] sm:$0xff] }
 0x432   : > { %v2252_v27 = vsel %vm1035_vm3, %v2246_v16, %v2251_v19  ;;  %v2390_v19 = vld [vmem:[#allocation12 + $0x968] sm:$0xff] }
 0x433   : > { %3733 = vmatpush1.bf16.msra.mxu1 %v3732_v17  ;;  %v2351_v17 = vld [vmem:[#allocation12 + $0x830] sm:$0xff] }
 0x434   : > { %3735 = vmatprep.subr.bf16.mxu1 %v3734_v18  ;;  %v2247_v18 = vsel %vm1035_vm3, %v2245_v8, %v2246_v16  ;;  %v3768_v32 = vpack.c.bf16 %v2351_v17, %v2349_v15  ;;  %v2382_v8 = vld [vmem:[#allocation12 + $0x928] sm:$0xff]  ;;  %v2383_v16 = vld [vmem:[#allocation12 + $0x930] sm:$0xff]  ;;  %v2385_v17 = vld [vmem:[#allocation12 + $0x940] sm:$0xff] }
 0x435   : > { %v3798_v10 = vpack.c.bf16 %v2384_v9, %v2382_v8  ;;  %v3830_v8 = vpack.c.bf16 %v2520_v63, %v2518_v62  ;;  %v2517_v9 = vld [vmem:[#allocation12 + $0xa20] sm:$0xff]  ;;  %v2550_v62 = vld [vmem:[#allocation12 + $0xb28] sm:$0xff]  ;;  %v2552_v63 = vld [vmem:[#allocation12 + $0xb38] sm:$0xff] }
 0x437   : > { %3737 = vmatpush1.bf16.msra.mxu1 %v3736_v23  ;;  %v2416_v23 = vrot.slane %v2341_v13, 4  ;;  %v2388_v13 = vld [vmem:[#allocation12 + $0x958] sm:$0xff] }
 0x438   : > { %3739 = vmatprep.subr.bf16.mxu1 %v3738_v29  ;;  %v2417_v29 = vrot.slane %v4890_v35, 4 }
 0x43a   : > { %v2418_v31 = vsel %vm1204_vm4, %v2416_v23, %v2417_v29  ;;  %v2389_v23 = vld [vmem:[#allocation12 + $0x960] sm:$0xff] }
 0x43b   : > { %3741 = vmatpush1.bf16.msra.mxu1 %v3740_v28  ;;  %v2358_v28 = vld [vmem:[#allocation12 + $0x868] sm:$0xff] }
 0x43c   : > { %3743 = vmatprep.subr.bf16.mxu1 %v3742_v30  ;;  %v2360_v30 = vld [vmem:[#allocation12 + $0x878] sm:$0xff] }
 0x43d   : > { %v3774_v34 = vpack.c.bf16 %v2360_v30, %v2358_v28  ;;  %v2393_v28 = vld [vmem:[#allocation12 + $0x980] sm:$0xff]  ;;  %v2395_v30 = vld [vmem:[#allocation12 + $0x990] sm:$0xff] }
 0x43f   : > { %3745 = vmatpush1.bf16.msra.mxu1 %v3744_v37  ;;  %v2362_v37 = vld [vmem:[#allocation12 + $0x888] sm:$0xff] }
 0x440   : > { %3747 = vmatprep.subr.bf16.mxu1 %v3746_v38  ;;  %v2364_v38 = vld [vmem:[#allocation12 + $0x898] sm:$0xff] }
 0x441   : > { %v3778_v40 = vpack.c.bf16 %v2364_v38, %v2362_v37  ;;  %v2399_v37 = vld [vmem:[#allocation12 + $0x9b0] sm:$0xff]  ;;  %v2402_v38 = vld [vmem:[#allocation12 + $0x9c8] sm:$0xff] }
 0x443   : > { %3749 = vmatpush1.bf16.msra.mxu1 %v3748_v44  ;;  %v2366_v44 = vld [vmem:[#allocation12 + $0x8a8] sm:$0xff] }
 0x444   : > { %3751 = vmatprep.subr.bf16.mxu1 %v3750_v48  ;;  %v2368_v48 = vld [vmem:[#allocation12 + $0x8b8] sm:$0xff] }
 0x445   : > { %v3782_v50 = vpack.c.bf16 %v2368_v48, %v2366_v44  ;;  %v2403_v44 = vld [vmem:[#allocation12 + $0x9d0] sm:$0xff]  ;;  %v2406_v48 = vld [vmem:[#allocation12 + $0x9e8] sm:$0xff] }
 0x447   : > { %3753 = vmatpush1.bf16.msra.mxu1 %v3752_v51  ;;  %v2370_v51 = vld [vmem:[#allocation12 + $0x8c8] sm:$0xff] }
 0x448   : > { %3755 = vmatprep.subr.bf16.mxu1 %v3754_v52  ;;  %v2372_v52 = vld [vmem:[#allocation12 + $0x8d8] sm:$0xff] }
 0x449   : > { %v3786_v61 = vpack.c.bf16 %v2372_v52, %v2370_v51  ;;  %v2407_v51 = vld [vmem:[#allocation12 + $0x9f0] sm:$0xff]  ;;  %v2514_v52 = vld [vmem:[#allocation12 + $0xa08] sm:$0xff] }
 0x44a   : > { %v3824_v55 = vpack.c.bf16 %v2407_v51, %v2405_v3  ;;  %v2544_v3 = vld [vmem:[#allocation12 + $0xaf8] sm:$0xff] }
 0x44b   : > { %3757 = vmatpush1.bf16.msra.mxu1 %v3756_v57  ;;  %v2374_v57 = vld [vmem:[#allocation12 + $0x8e8] sm:$0xff] }
 0x44c   : > { %3759 = vmatprep.subr.bf16.mxu1 %v3758_v58  ;;  %v2376_v58 = vld [vmem:[#allocation12 + $0x8f8] sm:$0xff] }
 0x44d   : > { %v3790_v60 = vpack.c.bf16 %v2376_v58, %v2374_v57  ;;  %v2513_v58 = vld [vmem:[#allocation12 + $0xa00] sm:$0xff] }
 0x44f   : > { %3761 = vmatpush1.bf16.msra.mxu1 %v3760_v0  ;;  %v2380_v0 = vld [vmem:[#allocation12 + $0x918] sm:$0xff] }
 0x450   : > { %3763 = vmatprep.subr.bf16.mxu1 %v3762_v2  ;;  %v3794_v2 = vpack.c.bf16 %v2380_v0, %v2378_v42  ;;  %v2421_v42 = vrot.slane %v2343_v56, 4  ;;  %v2342_v0 = vld [vmem:[#allocation2 + $0x20] sm:$0xf]  ;;  %v2548_v56 = vld [vmem:[#allocation12 + $0xb18] sm:$0xff] }
 0x452   : > { %2324 = vmatmul.mubr.f32.vlgmr.msra.gmra.mrb[0].mxu1 %v2247_v18  ;;  %v2387_v18 = vld [vmem:[#allocation12 + $0x950] sm:$0xff] }
 0x453   : > { %2329 = vmatprep.mubr.f32.mxu1 %v2254_v22  ;;  %3765 = vmatpush1.bf16.msra.mxu1 %v3764_v12  ;;  %v2386_v12 = vld [vmem:[#allocation12 + $0x948] sm:$0xff]  ;;  %v3804_v21 = vpack.c.bf16 %v2387_v18, %v2385_v17  ;;  %v3806_v22 = vpack.c.bf16 %v2392_v20, %v2390_v19  ;;  %v2521_v20 = vld [vmem:[#allocation12 + $0xa40] sm:$0xff] }
 0x454   : > { %3767 = vmatprep.subr.bf16.mxu1 %v3766_v14  ;;  %v3800_v14 = vpack.c.bf16 %v2383_v16, %v2381_v11  ;;  %v3802_v15 = vpack.c.bf16 %v2388_v13, %v2386_v12  ;;  %v2419_v11 = vrot.slane %v2342_v0, 4  ;;  %v2522_v16 = vld [vmem:[#allocation12 + $0xa48] sm:$0xff]  ;;  %v2524_v12 = vld [vmem:[#allocation12 + $0xa58] sm:$0xff]  ;;  %v2422_v13 = vsel %vm1204_vm4, %v2417_v29, %v2421_v42 }
 0x455   : > { %v4936_v17 = vld [vmem:[#allocation2 + $0x18] sm:$0xff]  ;;  %v3834_v19 = vpack.c.bf16 %v2524_v12, %v2522_v16  ;;  %v3862_v0 = vpack.c.bf16 %v2552_v63, %v2550_v62  ;;  %v2560_v12 = vld [vmem:[#allocation12 + $0xb78] sm:$0xff] }
 0x456   : > { %2330 = vmatmul.mubr.f32.gmra.mrb[2].mxu1 %v2252_v27  ;;  %v2585_v18 = vrot.slane %v4936_v17, 5  ;;  %v2558_v16 = vld [vmem:[#allocation12 + $0xb68] sm:$0xff]  ;;  %v2685_v63 = vld [vmem:[#allocation12 + $0xc20] sm:$0xff] }
 0x457   : > { %3769 = vmatpush1.bf16.msra.mxu1 %v3768_v32  ;;  %2491 = vmatprep.mubr.f32.mxu1 %v2418_v31  ;;  %v2391_v32 = vld [vmem:[#allocation12 + $0x970] sm:$0xff]  ;;  %v2398_v31 = vld [vmem:[#allocation12 + $0x9a8] sm:$0xff] }
 0x458   : > { %3771 = vmatprep.subr.bf16.mxu1 %v3770_v24  ;;  %v2394_v24 = vld [vmem:[#allocation12 + $0x988] sm:$0xff]  ;;  %v3808_v26 = vpack.c.bf16 %v2391_v32, %v2389_v23  ;;  %v2528_v32 = vld [vmem:[#allocation12 + $0xa78] sm:$0xff] }
 0x459   : > { %v3810_v27 = vpack.c.bf16 %v2396_v25, %v2394_v24  ;;  %v2526_v23 = vld [vmem:[#allocation12 + $0xa68] sm:$0xff]  ;;  %v2525_v25 = vld [vmem:[#allocation12 + $0xa60] sm:$0xff] }
 0x45a   : > { %v3838_v24 = vpack.c.bf16 %v2528_v32, %v2526_v23  ;;  %v2561_v32 = vld [vmem:[#allocation12 + $0xb80] sm:$0xff] }
 0x45b   : > { %3773 = vmatpush1.bf16.msra.mxu1 %v3772_v33  ;;  %v2400_v33 = vld [vmem:[#allocation12 + $0x9b8] sm:$0xff] }
 0x45c   : > { %3775 = vmatprep.subr.bf16.mxu1 %v3774_v34  ;;  %v3812_v34 = vpack.c.bf16 %v2395_v30, %v2393_v28  ;;  %v3814_v36 = vpack.c.bf16 %v2400_v33, %v2398_v31  ;;  %v2532_v28 = vld [vmem:[#allocation12 + $0xa98] sm:$0xff]  ;;  %v2529_v33 = vld [vmem:[#allocation12 + $0xa80] sm:$0xff] }
 0x45f   : > { %3777 = vmatpush1.bf16.msra.mxu1 %v3776_v39  ;;  %v2404_v39 = vld [vmem:[#allocation12 + $0x9d8] sm:$0xff] }
 0x460   : > { %3779 = vmatprep.subr.bf16.mxu1 %v3778_v40  ;;  %v3816_v40 = vpack.c.bf16 %v2399_v37, %v2397_v43  ;;  %v3818_v45 = vpack.c.bf16 %v2404_v39, %v2402_v38  ;;  %v2536_v43 = vld [vmem:[#allocation12 + $0xab8] sm:$0xff]  ;;  %v2533_v39 = vld [vmem:[#allocation12 + $0xaa0] sm:$0xff] }
 0x463   : > { %3781 = vmatpush1.bf16.msra.mxu1 %v3780_v49  ;;  %v2408_v49 = vld [vmem:[#allocation12 + $0x9f8] sm:$0xff] }
 0x464   : > { %3783 = vmatprep.subr.bf16.mxu1 %v3782_v50  ;;  %v3820_v50 = vpack.c.bf16 %v2403_v44, %v2401_v41  ;;  %v3822_v53 = vpack.c.bf16 %v2408_v49, %v2406_v48  ;;  %v2540_v41 = vld [vmem:[#allocation12 + $0xad8] sm:$0xff]  ;;  %v2537_v49 = vld [vmem:[#allocation12 + $0xac0] sm:$0xff] }
 0x467   : > { %3785 = vmatpush1.bf16.msra.mxu1 %v3784_v54  ;;  %v2516_v54 = vld [vmem:[#allocation12 + $0xa18] sm:$0xff] }
 0x468   : > { %3787 = vmatprep.subr.bf16.mxu1 %v3786_v61  ;;  %v2340_v61 = vld [vmem:[#allocation2] sm:$0xf0]  ;;  %v3826_v57 = vpack.c.bf16 %v2516_v54, %v2514_v52  ;;  %v2541_v54 = vld [vmem:[#allocation12 + $0xae0] sm:$0xff] }
 0x46b   : > { %3789 = vmatpush1.bf16.msra.mxu1 %v3788_v59  ;;  %v2515_v59 = vld [vmem:[#allocation12 + $0xa10] sm:$0xff] }
 0x46c   : > { %3791 = vmatprep.subr.bf16.mxu1 %v3790_v60  ;;  %v2413_v60 = vrot.slane %v2340_v61, 4  ;;  %v3828_v46 = vpack.c.bf16 %v2515_v59, %v2513_v58  ;;  %v2543_v61 = vld [vmem:[#allocation12 + $0xaf0] sm:$0xff]  ;;  %v2545_v59 = vld [vmem:[#allocation12 + $0xb00] sm:$0xff] }
 0x46f   : > { %3793 = vmatpush1.bf16.msra.mxu1 %v3792_v1  ;;  %v4929_v1 = vld [vmem:[#allocation2 + $0x10] sm:$0xff] }
 0x470   : > { %3795 = vmatprep.subr.bf16.mxu1 %v3794_v2  ;;  %v2414_v2 = vrot.slane %v4929_v1, 4 }
 0x473   : > { %3797 = vmatpush1.bf16.msra.mxu1 %v3796_v5  ;;  %v2519_v5 = vld [vmem:[#allocation12 + $0xa30] sm:$0xff] }
 0x474   : > { %3799 = vmatprep.subr.bf16.mxu1 %v3798_v10  ;;  %v2415_v10 = vsel %vm1204_vm4, %v2413_v60, %v2414_v2  ;;  %v2547_v60 = vld [vmem:[#allocation12 + $0xb10] sm:$0xff] }
 0x475   : > { %v3860_v42 = vpack.c.bf16 %v2547_v60, %v2545_v59  ;;  %v2677_v60 = vld [vmem:[#allocation2 + $0x8] sm:$0xc0] }
 0x477   : > { %3801 = vmatpush1.bf16.msra.mxu1 %v3800_v14  ;;  %v2584_v14 = vrot.slane %v2509_v47, 5  ;;  %v2554_v47 = vld [vmem:[#allocation12 + $0xb48] sm:$0xff] }
 0x478   : > { %3803 = vmatprep.subr.bf16.mxu1 %v3802_v15  ;;  %v3832_v15 = vpack.c.bf16 %v2519_v5, %v2517_v9 }
 0x479   : > { %v2586_v35 = vsel %vm440_vm0, %v2584_v14, %v2585_v18  ;;  %v3870_v14 = vpack.c.bf16 %v2560_v12, %v2558_v16  ;;  %v2689_v16 = vld [vmem:[#allocation12 + $0xc40] sm:$0xff]  ;;  %v2691_v12 = vld [vmem:[#allocation12 + $0xc50] sm:$0xff] }
 0x47b   : > { %3805 = vmatpush1.bf16.msra.mxu1 %v3804_v21  ;;  %v2523_v21 = vld [vmem:[#allocation12 + $0xa50] sm:$0xff] }
 0x47c   : > { %3807 = vmatprep.subr.bf16.mxu1 %v3806_v22  ;;  %v2420_v22 = vsel %vm1204_vm4, %v2414_v2, %v2419_v11  ;;  %v3836_v29 = vpack.c.bf16 %v2523_v21, %v2521_v20  ;;  %v2549_v2 = vld [vmem:[#allocation12 + $0xb20] sm:$0xff]  ;;  %v2555_v11 = vld [vmem:[#allocation12 + $0xb50] sm:$0xff]  ;;  %v2562_v20 = vld [vmem:[#allocation12 + $0xb88] sm:$0xff] }
 0x47d   : > { %v2564_v21 = vld [vmem:[#allocation12 + $0xb98] sm:$0xff] }
 0x47e   : > { %v3874_v23 = vpack.c.bf16 %v2564_v21, %v2562_v20  ;;  %v2693_v21 = vld [vmem:[#allocation12 + $0xc60] sm:$0xff] }
 0x47f   : > { %3809 = vmatpush1.bf16.msra.mxu1 %v3808_v26  ;;  %v2527_v26 = vld [vmem:[#allocation12 + $0xa70] sm:$0xff] }
 0x480   : > { %3811 = vmatprep.subr.bf16.mxu1 %v3810_v27  ;;  %v2530_v27 = vld [vmem:[#allocation12 + $0xa88] sm:$0xff]  ;;  %v3840_v30 = vpack.c.bf16 %v2527_v26, %v2525_v25 }
 0x481   : > { %v3842_v31 = vpack.c.bf16 %v2532_v28, %v2530_v27  ;;  %v2565_v27 = vld [vmem:[#allocation12 + $0xba0] sm:$0xff]  ;;  %v2567_v28 = vld [vmem:[#allocation12 + $0xbb0] sm:$0xff] }
 0x483   : > { %3813 = vmatpush1.bf16.msra.mxu1 %v3812_v34  ;;  %v2531_v34 = vld [vmem:[#allocation12 + $0xa90] sm:$0xff] }
 0x484   : > { %3815 = vmatprep.subr.bf16.mxu1 %v3814_v36  ;;  %v2534_v36 = vld [vmem:[#allocation12 + $0xaa8] sm:$0xff]  ;;  %v3844_v37 = vpack.c.bf16 %v2531_v34, %v2529_v33  ;;  %v3880_v33 = vpack.c.bf16 %v2567_v28, %v2565_v27  ;;  %v2704_v27 = vld [vmem:[#allocation12 + $0xcb8] sm:$0xff] }
 0x485   : > { %v3846_v38 = vpack.c.bf16 %v2536_v43, %v2534_v36  ;;  %v2569_v36 = vld [vmem:[#allocation12 + $0xbc0] sm:$0xff]  ;;  %v2571_v43 = vld [vmem:[#allocation12 + $0xbd0] sm:$0xff] }
 0x487   : > { %3817 = vmatpush1.bf16.msra.mxu1 %v3816_v40  ;;  %v2535_v40 = vld [vmem:[#allocation12 + $0xab0] sm:$0xff] }
 0x488   : > { %3819 = vmatprep.subr.bf16.mxu1 %v3818_v45  ;;  %v2538_v45 = vld [vmem:[#allocation12 + $0xac8] sm:$0xff]  ;;  %v3848_v44 = vpack.c.bf16 %v2535_v40, %v2533_v39  ;;  %v3884_v39 = vpack.c.bf16 %v2571_v43, %v2569_v36  ;;  %v2708_v36 = vld [vmem:[#allocation12 + $0xcd8] sm:$0xff] }
 0x489   : > { %v3850_v48 = vpack.c.bf16 %v2540_v41, %v2538_v45  ;;  %v2573_v45 = vld [vmem:[#allocation12 + $0xbe0] sm:$0xff]  ;;  %v2575_v41 = vld [vmem:[#allocation12 + $0xbf0] sm:$0xff] }
 0x48b   : > { %3821 = vmatpush1.bf16.msra.mxu1 %v3820_v50  ;;  %v2539_v50 = vld [vmem:[#allocation12 + $0xad0] sm:$0xff] }
 0x48c   : > { %3823 = vmatprep.subr.bf16.mxu1 %v3822_v53  ;;  %v2542_v53 = vld [vmem:[#allocation12 + $0xae8] sm:$0xff]  ;;  %v3852_v51 = vpack.c.bf16 %v2539_v50, %v2537_v49  ;;  %v2508_v49 = vld [vmem:[#allocation2] sm:$0xe0]  ;;  %v3888_v50 = vpack.c.bf16 %v2575_v41, %v2573_v45  ;;  %v2712_v45 = vld [vmem:[#allocation12 + $0xcf8] sm:$0xff] }
 0x48d   : > { %v3854_v52 = vpack.c.bf16 %v2544_v3, %v2542_v53  ;;  %v2511_v53 = vld [vmem:[#allocation2 + $0x28] sm:$0x1f] }
 0x48f   : > { %3825 = vmatpush1.bf16.msra.mxu1 %v3824_v55  ;;  %v2546_v55 = vld [vmem:[#allocation12 + $0xb08] sm:$0xff] }
 0x490   : > { %3827 = vmatprep.subr.bf16.mxu1 %v3826_v57  ;;  %v3856_v57 = vpack.c.bf16 %v2543_v61, %v2541_v54  ;;  %v3858_v58 = vpack.c.bf16 %v2548_v56, %v2546_v55  ;;  %v2581_v54 = vrot.slane %v2508_v49, 5  ;;  %v2686_v61 = vld [vmem:[#allocation12 + $0xc28] sm:$0xff]  ;;  %v2688_v55 = vld [vmem:[#allocation12 + $0xc38] sm:$0xff]  ;;  %v2589_v56 = vrot.slane %v2511_v53, 5  ;;  %v2711_v49 = vld [vmem:[#allocation12 + $0xcf0] sm:$0xff] }
 0x491   : > { %v3894_v62 = vpack.c.bf16 %v2688_v55, %v2686_v61  ;;  %v2716_v53 = vld [vmem:[#allocation12 + $0xd18] sm:$0xff]  ;;  %v2718_v61 = vld [vmem:[#allocation12 + $0xd28] sm:$0xff] }
 0x492   : > { %2492 = vmatmul.mubr.f32.vlgmr.msra.gmra.mrb[0].mxu1 %v2415_v10  ;;  %v2553_v10 = vld [vmem:[#allocation12 + $0xb40] sm:$0xff]  ;;  %v2720_v55 = vld [vmem:[#allocation12 + $0xd38] sm:$0xff] }
 0x493   : > { %2497 = vmatprep.mubr.f32.mxu1 %v2422_v13  ;;  %3829 = vmatpush1.bf16.msra.mxu1 %v3828_v46  ;;  %v2551_v46 = vld [vmem:[#allocation12 + $0xb30] sm:$0xff]  ;;  %v3868_v13 = vpack.c.bf16 %v2555_v11, %v2553_v10  ;;  %v2753_v10 = vrot.slane %v4936_v17, 6 }
 0x494   : > { %3831 = vmatprep.subr.bf16.mxu1 %v3830_v8  ;;  %v2556_v8 = vld [vmem:[#allocation12 + $0xb58] sm:$0xff]  ;;  %v3864_v9 = vpack.c.bf16 %v2551_v46, %v2549_v2  ;;  %v2690_v46 = vld [vmem:[#allocation12 + $0xc48] sm:$0xff] }
 0x495   : > { %v3866_v5 = vpack.c.bf16 %v2556_v8, %v2554_v47  ;;  %v2692_v47 = vld [vmem:[#allocation12 + $0xc58] sm:$0xff]  ;;  %v2590_v8 = vsel %vm440_vm0, %v2585_v18, %v2589_v56  ;;  %v3900_v18 = vpack.c.bf16 %v2691_v12, %v2689_v16  ;;  %v2730_v16 = vld [vmem:[#allocation12 + $0xd88] sm:$0xff] }
 0x496   : > { %2498 = vmatmul.mubr.f32.gmra.mrb[2].mxu1 %v2420_v22  ;;  %v3898_v11 = vpack.c.bf16 %v2692_v47, %v2690_v46  ;;  %v2726_v46 = vld [vmem:[#allocation12 + $0xd68] sm:$0xff]  ;;  %v2728_v47 = vld [vmem:[#allocation12 + $0xd78] sm:$0xff] }
 0x497   : > { %3833 = vmatpush1.bf16.msra.mxu1 %v3832_v15  ;;  %2659 = vmatprep.mubr.f32.mxu1 %v2586_v35  ;;  %v2557_v15 = vld [vmem:[#allocation12 + $0xb60] sm:$0xff]  ;;  %v2563_v35 = vld [vmem:[#allocation12 + $0xb90] sm:$0xff]  ;;  %v2732_v12 = vld [vmem:[#allocation12 + $0xd98] sm:$0xff] }
 0x498   : > { %3835 = vmatprep.subr.bf16.mxu1 %v3834_v19  ;;  %v2559_v19 = vld [vmem:[#allocation12 + $0xb70] sm:$0xff]  ;;  %v3876_v25 = vpack.c.bf16 %v2563_v35, %v2561_v32  ;;  %v2700_v32 = vld [vmem:[#allocation12 + $0xc98] sm:$0xff] }
 0x499   : > { %v3872_v22 = vpack.c.bf16 %v2559_v19, %v2557_v15  ;;  %v2696_v15 = vld [vmem:[#allocation12 + $0xc78] sm:$0xff] }
 0x49b   : > { %3837 = vmatpush1.bf16.msra.mxu1 %v3836_v29  ;;  %v2566_v29 = vld [vmem:[#allocation12 + $0xba8] sm:$0xff] }
 0x49c   : > { %3839 = vmatprep.subr.bf16.mxu1 %v3838_v24  ;;  %v2568_v24 = vld [vmem:[#allocation12 + $0xbb8] sm:$0xff] }
 0x49d   : > { %v3878_v26 = vpack.c.bf16 %v2568_v24, %v2566_v29  ;;  %v2697_v24 = vld [vmem:[#allocation12 + $0xc80] sm:$0xff] }
 0x49f   : > { %3841 = vmatpush1.bf16.msra.mxu1 %v3840_v30  ;;  %v2570_v30 = vld [vmem:[#allocation12 + $0xbc8] sm:$0xff] }
 0x4a0   : > { %3843 = vmatprep.subr.bf16.mxu1 %v3842_v31  ;;  %v2572_v31 = vld [vmem:[#allocation12 + $0xbd8] sm:$0xff] }
 0x4a1   : > { %v3882_v34 = vpack.c.bf16 %v2572_v31, %v2570_v30  ;;  %v2701_v31 = vld [vmem:[#allocation12 + $0xca0] sm:$0xff] }
 0x4a3   : > { %3845 = vmatpush1.bf16.msra.mxu1 %v3844_v37  ;;  %v2574_v37 = vld [vmem:[#allocation12 + $0xbe8] sm:$0xff] }
 0x4a4   : > { %3847 = vmatprep.subr.bf16.mxu1 %v3846_v38  ;;  %v2576_v38 = vld [vmem:[#allocation12 + $0xbf8] sm:$0xff] }
 0x4a5   : > { %v3886_v40 = vpack.c.bf16 %v2576_v38, %v2574_v37  ;;  %v2705_v38 = vld [vmem:[#allocation12 + $0xcc0] sm:$0xff] }
 0x4a7   : > { %3849 = vmatpush1.bf16.msra.mxu1 %v3848_v44  ;;  %v2682_v44 = vld [vmem:[#allocation12 + $0xc08] sm:$0xff] }
 0x4a8   : > { %3851 = vmatprep.subr.bf16.mxu1 %v3850_v48  ;;  %v2684_v48 = vld [vmem:[#allocation12 + $0xc18] sm:$0xff] }
 0x4a9   : > { %v3890_v3 = vpack.c.bf16 %v2684_v48, %v2682_v44  ;;  %v2709_v48 = vld [vmem:[#allocation12 + $0xce0] sm:$0xff] }
 0x4ab   : > { %3853 = vmatpush1.bf16.msra.mxu1 %v3852_v51  ;;  %v2681_v51 = vld [vmem:[#allocation12 + $0xc00] sm:$0xff] }
 0x4ac   : > { %3855 = vmatprep.subr.bf16.mxu1 %v3854_v52  ;;  %v2683_v52 = vld [vmem:[#allocation12 + $0xc10] sm:$0xff] }
 0x4ad   : > { %v3892_v59 = vpack.c.bf16 %v2683_v52, %v2681_v51  ;;  %v2713_v52 = vld [vmem:[#allocation12 + $0xd00] sm:$0xff] }
 0x4af   : > { %3857 = vmatpush1.bf16.msra.mxu1 %v3856_v57  ;;  %v2510_v57 = vld [vmem:[#allocation2 + $0x20] sm:$0x1f] }
 0x4b0   : > { %3859 = vmatprep.subr.bf16.mxu1 %v3858_v58  ;;  %v2582_v58 = vrot.slane %v4929_v1, 5  ;;  %v2587_v2 = vrot.slane %v2510_v57, 5  ;;  %v3926_v57 = vpack.c.bf16 %v2720_v55, %v2718_v61  ;;  %v2845_v61 = vld [vmem:[%s4774_s21 + $0x8] sm:$0xff] }
 0x4b3   : > { %3861 = vmatpush1.bf16.msra.mxu1 %v3860_v42  ;;  %v2687_v42 = vld [vmem:[#allocation12 + $0xc30] sm:$0xff] }
 0x4b4   : > { %3863 = vmatprep.subr.bf16.mxu1 %v3862_v0  ;;  %v2583_v0 = vsel %vm440_vm0, %v2581_v54, %v2582_v58  ;;  %v2715_v54 = vld [vmem:[#allocation12 + $0xd10] sm:$0xff] }
 0x4b5   : > { %v3924_v56 = vpack.c.bf16 %v2715_v54, %v2713_v52  ;;  %v2844_v52 = vld [vmem:[%s4774_s21] sm:$0xff] }
 0x4b7   : > { %3865 = vmatpush1.bf16.msra.mxu1 %v3864_v9  ;;  %v2752_v9 = vrot.slane %v2677_v60, 6  ;;  %v2722_v60 = vld [vmem:[#allocation12 + $0xd48] sm:$0xff] }
 0x4b8   : > { %3867 = vmatprep.subr.bf16.mxu1 %v3866_v5  ;;  %v3896_v5 = vpack.c.bf16 %v2687_v42, %v2685_v63 }
 0x4b9   : > { %v2754_v19 = vsel %vm1541_vm5, %v2752_v9, %v2753_v10  ;;  %v3934_v9 = vpack.c.bf16 %v2728_v47, %v2726_v46 }
 0x4bb   : > { %3869 = vmatpush1.bf16.msra.mxu1 %v3868_v13  ;;  %v2588_v13 = vsel %vm440_vm0, %v2582_v58, %v2587_v2  ;;  %v2717_v58 = vld [vmem:[#allocation12 + $0xd20] sm:$0xff]  ;;  %v2723_v2 = vld [vmem:[#allocation12 + $0xd50] sm:$0xff] }
 0x4bc   : > { %3871 = vmatprep.subr.bf16.mxu1 %v3870_v14  ;;  %v2694_v14 = vld [vmem:[#allocation12 + $0xc68] sm:$0xff] }
 0x4bd   : > { %v3902_v20 = vpack.c.bf16 %v2696_v15, %v2694_v14  ;;  %v3938_v14 = vpack.c.bf16 %v2732_v12, %v2730_v16  ;;  %v2729_v15 = vld [vmem:[#allocation12 + $0xd80] sm:$0xff] }
 0x4bf   : > { %3873 = vmatpush1.bf16.msra.mxu1 %v3872_v22  ;;  %v2695_v22 = vld [vmem:[#allocation12 + $0xc70] sm:$0xff] }
 0x4c0   : > { %3875 = vmatprep.subr.bf16.mxu1 %v3874_v23  ;;  %v2698_v23 = vld [vmem:[#allocation12 + $0xc88] sm:$0xff]  ;;  %v3904_v35 = vpack.c.bf16 %v2695_v22, %v2693_v21 }
 0x4c1   : > { %v3906_v29 = vpack.c.bf16 %v2700_v32, %v2698_v23  ;;  %v2733_v23 = vld [vmem:[#allocation12 + $0xda0] sm:$0xff]  ;;  %v2735_v32 = vld [vmem:[#allocation12 + $0xdb0] sm:$0xff] }
 0x4c3   : > { %3877 = vmatpush1.bf16.msra.mxu1 %v3876_v25  ;;  %v2699_v25 = vld [vmem:[#allocation12 + $0xc90] sm:$0xff] }
 0x4c4   : > { %3879 = vmatprep.subr.bf16.mxu1 %v3878_v26  ;;  %v2702_v26 = vld [vmem:[#allocation12 + $0xca8] sm:$0xff]  ;;  %v3908_v28 = vpack.c.bf16 %v2699_v25, %v2697_v24  ;;  %v3944_v24 = vpack.c.bf16 %v2735_v32, %v2733_v23 }
 0x4c5   : > { %v3910_v30 = vpack.c.bf16 %v2704_v27, %v2702_v26  ;;  %v2737_v26 = vld [vmem:[#allocation12 + $0xdc0] sm:$0xff]  ;;  %v2739_v27 = vld [vmem:[#allocation12 + $0xdd0] sm:$0xff] }
 0x4c7   : > { %3881 = vmatpush1.bf16.msra.mxu1 %v3880_v33  ;;  %v2703_v33 = vld [vmem:[#allocation12 + $0xcb0] sm:$0xff] }
 0x4c8   : > { %3883 = vmatprep.subr.bf16.mxu1 %v3882_v34  ;;  %v2706_v34 = vld [vmem:[#allocation12 + $0xcc8] sm:$0xff]  ;;  %v3912_v43 = vpack.c.bf16 %v2703_v33, %v2701_v31  ;;  %v3948_v31 = vpack.c.bf16 %v2739_v27, %v2737_v26 }
 0x4c9   : > { %v3914_v37 = vpack.c.bf16 %v2708_v36, %v2706_v34  ;;  %v2741_v34 = vld [vmem:[#allocation12 + $0xde0] sm:$0xff]  ;;  %v2743_v36 = vld [vmem:[#allocation12 + $0xdf0] sm:$0xff] }
 0x4cb   : > { %3885 = vmatpush1.bf16.msra.mxu1 %v3884_v39  ;;  %v2707_v39 = vld [vmem:[#allocation12 + $0xcd0] sm:$0xff] }
 0x4cc   : > { %3887 = vmatprep.subr.bf16.mxu1 %v3886_v40  ;;  %v2710_v40 = vld [vmem:[#allocation12 + $0xce8] sm:$0xff]  ;;  %v3916_v41 = vpack.c.bf16 %v2707_v39, %v2705_v38  ;;  %v2679_v38 = vld [vmem:[#allocation2 + $0x28] sm:$0x3f] }
 0x4cd   : > { %v3918_v44 = vpack.c.bf16 %v2712_v45, %v2710_v40  ;;  %v2757_v40 = vrot.slane %v2679_v38, 6  ;;  %v2678_v45 = vld [vmem:[#allocation2 + $0x20] sm:$0x3f] }
 0x4cf   : > { %3889 = vmatpush1.bf16.msra.mxu1 %v3888_v50  ;;  %v2714_v50 = vld [vmem:[#allocation12 + $0xd08] sm:$0xff] }
 0x4d0   : > { %3891 = vmatprep.subr.bf16.mxu1 %v3890_v3  ;;  %v3920_v3 = vpack.c.bf16 %v2711_v49, %v2709_v48  ;;  %v3922_v51 = vpack.c.bf16 %v2716_v53, %v2714_v50  ;;  %v2755_v48 = vrot.slane %v2678_v45, 6  ;;  %v2758_v49 = vsel %vm1541_vm5, %v2753_v10, %v2757_v40  ;;  %v1671_v53 = vld [vmem:[#allocation14] sm:$0x3] }
 0x4d2   : > { %2660 = vmatmul.mubr.f32.vlgmr.msra.gmra.mrb[0].mxu1 %v2583_v0  ;;  %v2721_v0 = vld [vmem:[#allocation12 + $0xd40] sm:$0xff] }
 0x4d3   : > { %2665 = vmatprep.mubr.f32.mxu1 %v2590_v8  ;;  %3893 = vmatpush1.bf16.msra.mxu1 %v3892_v59  ;;  %v2719_v59 = vld [vmem:[#allocation12 + $0xd30] sm:$0xff]  ;;  %v3932_v8 = vpack.c.bf16 %v2723_v2, %v2721_v0 }
 0x4d4   : > { %3895 = vmatprep.subr.bf16.mxu1 %v3894_v62  ;;  %v2724_v62 = vld [vmem:[#allocation12 + $0xd58] sm:$0xff]  ;;  %v3928_v63 = vpack.c.bf16 %v2719_v59, %v2717_v58  ;;  %v2846_v58 = vld [vmem:[%s4774_s21 + $0x10] sm:$0xff] }
 0x4d5   : > { %v3930_v42 = vpack.c.bf16 %v2724_v62, %v2722_v60 }
 0x4d6   : > { %2666 = vmatmul.mubr.f32.gmra.mrb[2].mxu1 %v2588_v13 }
 0x4d7   : > { %3897 = vmatpush1.bf16.msra.mxu1 %v3896_v5  ;;  %2827 = vmatprep.mubr.f32.mxu1 %v2754_v19  ;;  %v2725_v5 = vld [vmem:[#allocation12 + $0xd60] sm:$0xff]  ;;  %v2731_v19 = vld [vmem:[#allocation12 + $0xd90] sm:$0xff] }
 0x4d8   : > { %3899 = vmatprep.subr.bf16.mxu1 %v3898_v11  ;;  %v2727_v11 = vld [vmem:[#allocation12 + $0xd70] sm:$0xff]  ;;  %v3940_v21 = vpack.c.bf16 %v2731_v19, %v2729_v15 }
 0x4d9   : > { %v3936_v13 = vpack.c.bf16 %v2727_v11, %v2725_v5 }
 0x4db   : > { %3901 = vmatpush1.bf16.msra.mxu1 %v3900_v18  ;;  %v2734_v18 = vld [vmem:[#allocation12 + $0xda8] sm:$0xff] }
 0x4dc   : > { %3903 = vmatprep.subr.bf16.mxu1 %v3902_v20  ;;  %v2736_v20 = vld [vmem:[#allocation12 + $0xdb8] sm:$0xff] }
 0x4dd   : > { %v3942_v22 = vpack.c.bf16 %v2736_v20, %v2734_v18 }
 0x4df   : > { %3905 = vmatpush1.bf16.msra.mxu1 %v3904_v35  ;;  %v2738_v35 = vld [vmem:[#allocation12 + $0xdc8] sm:$0xff] }
 0x4e0   : > { %3907 = vmatprep.subr.bf16.mxu1 %v3906_v29  ;;  %v2740_v29 = vld [vmem:[#allocation12 + $0xdd8] sm:$0xff] }
 0x4e1   : > { %v3946_v25 = vpack.c.bf16 %v2740_v29, %v2738_v35 }
 0x4e3   : > { %3909 = vmatpush1.bf16.msra.mxu1 %v3908_v28  ;;  %v2742_v28 = vld [vmem:[#allocation12 + $0xde8] sm:$0xff] }
 0x4e4   : > { %3911 = vmatprep.subr.bf16.mxu1 %v3910_v30  ;;  %v2744_v30 = vld [vmem:[#allocation12 + $0xdf8] sm:$0xff] }
 0x4e5   : > { %v3950_v33 = vpack.c.bf16 %v2744_v30, %v2742_v28 }
 0x4e7   : > { %3913 = vmatpush1.bf16.msra.mxu1 %v3912_v43  ;;  %v2676_v43 = vld [vmem:[#allocation2] sm:$0xc0] }
 0x4e8   : > { %3915 = vmatprep.subr.bf16.mxu1 %v3914_v37  ;;  %v3952_v37 = vpack.c.bf16 %v2743_v36, %v2741_v34  ;;  %v2749_v39 = vrot.slane %v2676_v43, 6 }
 0x4eb   : > { %3917 = vmatpush1.bf16.msra.mxu1 %v3916_v41  ;;  %v2750_v41 = vrot.slane %v4929_v1, 6  ;;  %v1680_v1 = vrot.slane %v1671_v53, %v467_v7  ;;  %v2847_v7 = vld [vmem:[%s4774_s21 + $0x18] sm:$0xff] }
 0x4ec   : > { %3919 = vmatprep.subr.bf16.mxu1 %v3918_v44 }
 0x4ed   : > { %v2751_v44 = vsel %vm1541_vm5, %v2749_v39, %v2750_v41  ;;  %v2756_v50 = vsel %vm1541_vm5, %v2750_v41, %v2755_v48 }
 0x4ef   : > { %3921 = vmatpush1.bf16.msra.mxu1 %v3920_v3  ;;  %v1676_v3 = vrot.slane %v1671_v53, %v463_v6 }
 0x4f0   : > { %3923 = vmatprep.subr.bf16.mxu1 %v3922_v51 }
 0x4f3   : > { %3925 = vmatpush1.bf16.msra.mxu1 %v3924_v56 }
 0x4f4   : > { %3927 = vmatprep.subr.bf16.mxu1 %v3926_v57 }
 0x4f7   : > { %3929 = vmatpush1.bf16.msra.mxu1 %v3928_v63 }
 0x4f8   : > { %3931 = vmatprep.subr.bf16.mxu1 %v3930_v42 }
 0x4fb   : > { %3933 = vmatpush1.bf16.msra.mxu1 %v3932_v8 }
 0x4fc   : > { %3935 = vmatprep.subr.bf16.mxu1 %v3934_v9 }
 0x4ff   : > { %3937 = vmatpush1.bf16.msra.mxu1 %v3936_v13 }
 0x500   : > { %3939 = vmatprep.subr.bf16.mxu1 %v3938_v14 }
 0x503   : > { %3941 = vmatpush1.bf16.msra.mxu1 %v3940_v21 }
 0x504   : > { %3943 = vmatprep.subr.bf16.mxu1 %v3942_v22 }
 0x507   : > { %3945 = vmatpush1.bf16.msra.mxu1 %v3944_v24 }
 0x508   : > { %3947 = vmatprep.subr.bf16.mxu1 %v3946_v25 }
 0x50b   : > { %3949 = vmatpush1.bf16.msra.mxu1 %v3948_v31 }
 0x50c   : > { %3951 = vmatprep.subr.bf16.mxu1 %v3950_v33 }
 0x50f   : > { %3953 = vmatpush1.bf16.msra.mxu1 %v3952_v37 }
 0x512   : > { %2828 = vmatmul.mubr.f32.vlgmr.msra.gmra.mrb[0].mxu1 %v2751_v44 }
 0x513   : > { %2833 = vmatprep.mubr.f32.mxu1 %v2758_v49 }
 0x516   : > { %2834 = vmatmul.mubr.f32.gmra.mrb[2].mxu1 %v2756_v50 }
 0x5e5   : > { %v2829_v51 = vpop.f32.mrb[0].mxu1 }
 0x5e6   : > { %v3958_v54 = vadd.f32 %v2829_v51, %v1676_v3  ;;  %v2831_v17 = vpop.f32.mrb[1].mxu1 }
 0x5e7   : > { %v3959_v10 = vadd.f32 %v2831_v17, %v1680_v1 }
 0x5e8   : > { %v2848_v55 = vadd.f32 %v3958_v54, %v2844_v52 }
 0x5e9   : > { %v2849_v56 = vadd.f32 %v3959_v10, %v2845_v61  ;;  %v2835_v57 = vpop.f32.mrb[2].mxu1 }
 0x5ea   : > { %2852 = vst [vmem:[%s427_s30] sm:$0xff] %v2848_v55  ;;  %v3960_v6 = vadd.f32 %v2835_v57, %v1676_v3  ;;  %v2837_v4 = vpop.f32.mrb[3].mxu1 }
 0x5eb   : > { %2853 = vst [vmem:[%s427_s30 + $0x8] sm:$0xff] %v2849_v56  ;;  %v3961_v59 = vadd.f32 %v2837_v4, %v1680_v1 }
 0x5ec   : > { %v2850_v60 = vadd.f32 %v3960_v6, %v2846_v58 }
 0x5ed   : > { %v2851_v62 = vadd.f32 %v3961_v59, %v2847_v7 }
 0x5ee   : > { %2854 = vst [vmem:[%s427_s30 + $0x10] sm:$0xff] %v2850_v60 }
 0x5ef   : > { %2855 = vst [vmem:[%s427_s30 + $0x18] sm:$0xff] %v2851_v62 }
 0x5f0   : > { %4329 = shalt.err (!%p4326_p12)
}
 0x5f1   : > { %s4330_s14 = scalar_lea.hbm %s4974_s29, 512  ;;  %s4334_s1 = scalar_lea.hbm %s5083_s3, 1024 }
 0x5f2   : > { %p4331_p8 = scmp.ne.s32.totalorder %s4974_s29, %s4330_s14  ;;  %p4335_p1 = scmp.lt.u32.totalorder %s4974_s29, %s5083_s3 }
 0x5f3   : > { %p4336_p6 = scmp.lt.u32.totalorder %s4334_s1, %s4330_s14  ;;  %p4338_p5 = scmp.lt.u32.totalorder %s4330_s14, %s4974_s29 }
 0x5f4   : > { %p4332_p10 = pnand %p4331_p8, %p5084_p2 }
 0x5f5   : > { %p4337_p3 = por %p4336_p6, %p4335_p1 }
 0x5f6   : > { %p4333_p11 = pneg %p4332_p10 }
 0x5f7   : > { %p4339_p4 = por %p4338_p5, %p4337_p3 }
 0x5f9   : > { %p4340_p0 = pnand %p4339_p4, %p4333_p11 }
 0x5fb   : > { %4343 = shalt.err (!%p4340_p0)
}
 0x5fc   : > { %s4407_s12 = smov 256   ;;  %s4408_s5 = smov 16  }
 0x5fd   : > { %4032 = dma.vmem_to_hbm [thread:$0]  (%p5084_p2), %s4969_s13, 512, %s4974_s29, %s2857_s28, %s4407_s12, %s4407_s12, %s4408_s5  }
 0x5fe PF: > { %s5085_s9 = sld [smem:[#allocation21_spill]]  ;;  %s5086_s16 = sld [smem:[#allocation23_spill]] }
 0x5ff   : > { %s5087_s21 = sld [smem:[#allocation22_spill]] }
 0x604   : > { %s2885_s30 = sand.u32 1, %s5085_s9   ;;  %p5088_p13 = scmp.ne.s32.totalorder %s5086_s16, 0 }
 0x605   : > { %p5089_p7 = scmp.ge.s32.totalorder %s5087_s21, 2  ;;  %s2886_s8 = scalar_lea.sflag [#allocation5], %s2885_s30 }
 0x607   : > { %p4058_p9 = pnand %p5089_p7, %p5088_p13 }
 0x609   : > { %4377 = dma.done.wait (!%p4058_p9), %s2886_s8, 512  }
 0x60a   : > { %4379 = vsyncadd (!%p4058_p9), %s2886_s8, 4294966784  ;;  %s5090_s27 = sld [smem:[#allocation24_spill]]  ;;  %s5091_s20 = sld [smem:[#allocation25_spill]] }
 0x60b   : > { %s5092_s24 = smov %s4386_s25  ;;  %s5093_s25 = smov %s4390_s26 }
 0x610   : > { %p25_p12 = scmp.ge.s32.totalorder %s5090_s27, 4   ;;  %s5094_s26 = smov %s5091_s20 }
 0x612   :  { %27 = sbr.rel (!%p25_p12) target bundleno = 14 (0xe), region = 145 }
 0x619   :  { %2891 = vsyncpa [#allocation4], 1 }
 0x61a   :  { %2893 = vsyncpa [#allocation4 + $0x1], 1 }
 0x61b   :  { %2894 = vsyncpa [#allocation7], 1 }
 0x61c   :  { %2896 = vsyncpa [#allocation7 + $0x1], 1 }
 0x61d   :  { %2897 = vsyncpa [#allocation10], 1 }
 0x61e   :  { %2898 = vsyncpa [#allocation13], 1 }
 0x61f   :  { %2899 = vsyncpa [#allocation5], 1 }
 0x620   :  { %2901 = vsyncpa [#allocation5 + $0x1], 1 }

</bundles_post_ra>
